<compile_context>
chip_gen: v5e
topology: v5e:2x2
jax: 0.10.0
libtpu: 0.0.40
codegen_flags: <defaults>
</compile_context>

<pallas_src>
import jax
import jax.numpy as jnp
from jax.experimental import pallas as pl
from jax.experimental.pallas import tpu as pltpu


INPUT_SIZE = 784
Z_SIZE = 20
HIDDEN_SIZE = int((INPUT_SIZE - Z_SIZE) / 2 + Z_SIZE)  # 402, same as PyTorch __init__


def _round_up(n, m):
    return (n + m - 1) // m * m


H_P = _round_up(HIDDEN_SIZE, 128)  # 512 (internal lane padding of the hidden dim)
Z_P = 128                          # internal lane padding of the latent dim


def _vae_kernel(
    x_ref, eps_ref,
    w1_ref, b1_ref,
    w2_ref, b2_ref,
    wh_ref, bh_ref,
    wd1_ref, bd1_ref,
    wd2_ref, bd2_ref,
    recon_ref, z_ref, mu_ref, lv_ref,
    eps_buf,
):
    f32 = jnp.float32
    bf16 = jnp.bfloat16

    x = x_ref[...].astype(bf16)                                        # (TB, 784)

    # ---- encoder: Linear -> ReLU -> Linear -> ReLU -> fused (mu|log_var) head ----
    h1 = jnp.dot(x, w1_ref[...], preferred_element_type=f32) + b1_ref[...]
    h1 = jnp.maximum(h1, 0.0).astype(bf16)                             # (TB, 512)
    h2 = jnp.dot(h1, w2_ref[...], preferred_element_type=f32) + b2_ref[...]
    h2 = jnp.maximum(h2, 0.0).astype(bf16)                             # (TB, 512)

    head = jnp.dot(h2, wh_ref[...], preferred_element_type=f32) + bh_ref[...]  # (TB, 256)
    mu = head[:, :Z_P]          # lane-aligned slice; valid lanes [0:20), rest exactly 0
    log_var = head[:, Z_P:]     # lane-aligned slice; valid lanes [0:20), rest exactly 0

    # ---- pad eps (TB, 20) -> (TB, 128) inside VMEM (no HBM copy in the wrapper) ----
    eps_buf[...] = jnp.zeros_like(eps_buf)
    eps_buf[:, :Z_SIZE] = eps_ref[...]
    eps = eps_buf[...]                                                 # padded lanes = 0

    # ---- reparameterize (f32 elementwise): z = mu + eps * exp(0.5 * log_var) ----
    std = jnp.exp(0.5 * log_var)        # padded lanes: exp(0) = 1
    z = mu + eps * std                  # padded lanes: 0 + 0*1 = 0 (exact)

    # ---- decoder: Linear -> ReLU -> Linear -> Sigmoid ----
    d1 = jnp.dot(z.astype(bf16), wd1_ref[...], preferred_element_type=f32) + bd1_ref[...]
    d1 = jnp.maximum(d1, 0.0).astype(bf16)                             # (TB, 512)
    logits = jnp.dot(d1, wd2_ref[...], preferred_element_type=f32) + bd2_ref[...]  # (TB, 784)

    # numerically stable sigmoid on the EUP: sigmoid(x) = 0.5 * (tanh(x/2) + 1)
    recon_ref[...] = (0.5 * (jnp.tanh(0.5 * logits) + 1.0)).astype(recon_ref.dtype)

    # latent outputs at their final logical width (lane-masked 20-wide stores;
    # negligible next to the recon stream, and zero wrapper post-processing)
    z_ref[...] = z[:, :Z_SIZE]
    mu_ref[...] = mu[:, :Z_SIZE]
    lv_ref[...] = log_var[:, :Z_SIZE]


def init_params(key):
    """Deterministic synthetic parameters, PyTorch-like semantics.
    nn.Linear stores W as (out, in); we store the transposed (in, out) layout so
    the kernel/reference do x @ W + b. The final encoder layer (402 -> 40) is
    pre-split into mu / log_var halves (identical to slicing its output)."""
    ks = jax.random.split(key, 12)

    def lin(kw, kb, fan_in, fan_out):
        bound = 1.0 / jnp.sqrt(fan_in)
        w = jax.random.uniform(kw, (fan_in, fan_out), jnp.float32, -bound, bound)
        b = jax.random.uniform(kb, (1, fan_out), jnp.float32, -bound, bound)
        return w, b

    w1, b1 = lin(ks[0], ks[1], INPUT_SIZE, HIDDEN_SIZE)        # encoder L1
    w2, b2 = lin(ks[2], ks[3], HIDDEN_SIZE, HIDDEN_SIZE)       # encoder L2
    w3, b3 = lin(ks[4], ks[5], HIDDEN_SIZE, 2 * Z_SIZE)        # encoder head (mu|log_var)
    wmu, bmu = w3[:, :Z_SIZE], b3[:, :Z_SIZE]
    wlv, blv = w3[:, Z_SIZE:], b3[:, Z_SIZE:]
    wd1, bd1 = lin(ks[6], ks[7], Z_SIZE, HIDDEN_SIZE)          # decoder L1
    wd2, bd2 = lin(ks[8], ks[9], HIDDEN_SIZE, INPUT_SIZE)      # decoder L2
    return (w1, b1, w2, b2, wmu, bmu, wlv, blv, wd1, bd1, wd2, bd2)


def pack_params(params):
    """Pad only the *internal* dims (hidden -> 512, latent -> 128), fuse the
    mu/log_var head into one (512, 256) matmul, cast weights to bf16 (biases stay
    f32). Padded rows/cols are zero so padded lanes contribute nothing. The 784
    input/output feature dim is left un-padded (Mosaic pads K internally)."""
    (w1, b1, w2, b2, wmu, bmu, wlv, blv, wd1, bd1, wd2, bd2) = params
    bf16 = jnp.bfloat16

    def pad_w(w, rows, cols):
        out = jnp.zeros((rows, cols), jnp.float32)
        out = out.at[:w.shape[0], :w.shape[1]].set(w)
        return out.astype(bf16)

    def pad_b(bv, cols):
        out = jnp.zeros((1, cols), jnp.float32)
        return out.at[:, :bv.shape[1]].set(bv)

    w1p, b1p = pad_w(w1, INPUT_SIZE, H_P), pad_b(b1, H_P)            # (784, 512)
    w2p, b2p = pad_w(w2, H_P, H_P), pad_b(b2, H_P)                   # (512, 512)

    wh = jnp.zeros((H_P, 2 * Z_P), jnp.float32)                      # fused mu|log_var head
    wh = wh.at[:HIDDEN_SIZE, :Z_SIZE].set(wmu)
    wh = wh.at[:HIDDEN_SIZE, Z_P:Z_P + Z_SIZE].set(wlv)
    wh = wh.astype(bf16)
    bh = jnp.zeros((1, 2 * Z_P), jnp.float32)
    bh = bh.at[:, :Z_SIZE].set(bmu)
    bh = bh.at[:, Z_P:Z_P + Z_SIZE].set(blv)

    wd1p, bd1p = pad_w(wd1, Z_P, H_P), pad_b(bd1, H_P)               # (128, 512)
    wd2p, bd2p = pad_w(wd2, H_P, INPUT_SIZE), pad_b(bd2, INPUT_SIZE) # (512, 784)
    return (w1p, b1p, w2p, b2p, wh, bh, wd1p, bd1p, wd2p, bd2p)


def _pick_tile(b):
    if b < 256:
        return b          # one tile; block dims == array dims, zero padding
    if b < 1024:
        return 128        # >= 2 grid steps -> both v7x TensorCores get work
    return 256            # amortize per-step pipeline overhead at large batch


@jax.jit
def vae_forward(x, eps, packed_params):
    """x: (B, ...) image batch (flattened to 784 like x.view(-1, 784));
    eps: (B, Z_SIZE) standard-normal noise. Returns (recon[bf16], z, mu, log_var)."""
    b = x.shape[0]
    x2d = x.reshape(b, INPUT_SIZE).astype(jnp.float32)   # view-like, no pad copy
    eps = eps.astype(jnp.float32)

    tb = _pick_tile(b)
    n_tiles = pl.cdiv(b, tb)   # partial last block handled by Pallas (rows are independent)

    (w1, b1, w2, b2, wh, bh, wd1, bd1, wd2, bd2) = packed_params

    def act_spec(cols):
        return pl.BlockSpec((tb, cols), lambda i: (i, 0))

    def w_spec(arr):
        # constant block index -> stays VMEM-resident across grid steps (no re-DMA)
        return pl.BlockSpec(arr.shape, lambda i: (0, 0))

    in_specs = [
        act_spec(INPUT_SIZE),    # x tile (f32; cast to bf16 in-kernel)
        act_spec(Z_SIZE),        # eps tile (padded to 128 lanes in-kernel)
        w_spec(w1), w_spec(b1),
        w_spec(w2), w_spec(b2),
        w_spec(wh), w_spec(bh),
        w_spec(wd1), w_spec(bd1),
        w_spec(wd2), w_spec(bd2),
    ]
    out_specs = (act_spec(INPUT_SIZE), act_spec(Z_SIZE), act_spec(Z_SIZE), act_spec(Z_SIZE))
    out_shapes = (
        jax.ShapeDtypeStruct((b, INPUT_SIZE), jnp.bfloat16),  # recon (bf16 writeback)
        jax.ShapeDtypeStruct((b, Z_SIZE), jnp.float32),       # z
        jax.ShapeDtypeStruct((b, Z_SIZE), jnp.float32),       # mu
        jax.ShapeDtypeStruct((b, Z_SIZE), jnp.float32),       # log_var
    )

    macs = (INPUT_SIZE * H_P + H_P * H_P + H_P * 2 * Z_P + Z_P * H_P + H_P * INPUT_SIZE)
    weight_bytes = sum(int(a.size) * a.dtype.itemsize for a in packed_params)
    cost = pl.CostEstimate(
        flops=2 * b * macs,
        transcendentals=b * (Z_P + INPUT_SIZE),
        bytes_accessed=weight_bytes
        + b * (INPUT_SIZE * 4 + Z_SIZE * 4 + INPUT_SIZE * 2 + 3 * Z_SIZE * 4),
    )

    recon, z, mu, log_var = pl.pallas_call(
        _vae_kernel,
        out_shape=out_shapes,
        grid_spec=pltpu.PrefetchScalarGridSpec(
            num_scalar_prefetch=0,
            grid=(n_tiles,),
            in_specs=in_specs,
            out_specs=out_specs,
            scratch_shapes=[pltpu.VMEM((tb, Z_P), jnp.float32)],  # in-kernel eps pad
        ),
        compiler_params=pltpu.CompilerParams(
            dimension_semantics=("parallel",),
            vmem_limit_bytes=32 << 20,
        ),
        cost_estimate=cost,
    )(x2d, eps, w1, b1, w2, b2, wh, bh, wd1, bd1, wd2, bd2)

    return recon, z, mu, log_var


def reference_forward(x, eps, params, matmul_dtype=jnp.float32):
    """Pure-JAX reference mirroring the PyTorch forward. With matmul_dtype=bf16 it
    mimics the kernel's numerics (bf16 operands, f32 accumulation/elementwise)."""
    (w1, b1, w2, b2, wmu, bmu, wlv, blv, wd1, bd1, wd2, bd2) = params
    c = lambda a: a.astype(matmul_dtype)
    f32 = jnp.float32
    h = x.reshape(x.shape[0], INPUT_SIZE).astype(jnp.float32)
    h1 = jax.nn.relu(jnp.dot(c(h), c(w1), preferred_element_type=f32) + b1)
    h2 = jax.nn.relu(jnp.dot(c(h1), c(w2), preferred_element_type=f32) + b2)
    mu = jnp.dot(c(h2), c(wmu), preferred_element_type=f32) + bmu
    log_var = jnp.dot(c(h2), c(wlv), preferred_element_type=f32) + blv
    z = mu + eps * jnp.exp(0.5 * log_var)
    d1 = jax.nn.relu(jnp.dot(c(z), c(wd1), preferred_element_type=f32) + bd1)
    recon = jax.nn.sigmoid(jnp.dot(c(d1), c(wd2), preferred_element_type=f32) + bd2)
    return recon, z, mu, log_var


def _check(outs, x, eps, params):
    recon, z, mu, log_var = outs
    recon32 = recon.astype(jnp.float32)
    # tight check vs a reference with identical numerics (bf16 matmuls, f32 accum);
    # recon tolerance widened for its bf16 output quantization (<= ~2e-3 abs).
    br_recon, br_z, br_mu, br_lv = reference_forward(x, eps, params, jnp.bfloat16)
    assert jnp.allclose(recon32, br_recon, atol=1e-2, rtol=1e-2)
    assert jnp.allclose(z, br_z, atol=1e-3, rtol=1e-3)
    assert jnp.allclose(mu, br_mu, atol=1e-3, rtol=1e-3)
    assert jnp.allclose(log_var, br_lv, atol=1e-3, rtol=1e-3)
    # loose check vs the full-f32 PyTorch-equivalent reference (bf16 rounding)
    fr_recon, fr_z, fr_mu, fr_lv = reference_forward(x, eps, params, jnp.float32)
    assert jnp.allclose(recon32, fr_recon, atol=3e-2, rtol=3e-2)
    assert jnp.allclose(z, fr_z, atol=2e-2, rtol=2e-2)
    assert jnp.allclose(mu, fr_mu, atol=2e-2, rtol=2e-2)
    assert jnp.allclose(log_var, fr_lv, atol=2e-2, rtol=2e-2)


if __name__ == "__main__":
    key = jax.random.PRNGKey(0)
    k_param, k_x, k_eps, k_x2, k_eps2 = jax.random.split(key, 5)

    params = init_params(k_param)
    packed = pack_params(params)

    # --- small batch (single-tile path), NCHW image batch like the PyTorch module ---
    # TODO(synk): eps is drawn outside the kernel (jax.random.normal) to mirror
    # torch.randn_like reproducibly; in-kernel pltpu PRNG sampling would not match
    # a pure-JAX reference bit-for-bit.
    B = 4
    x = jax.random.uniform(k_x, (B, 1, 28, 28), jnp.float32)
    eps = jax.random.normal(k_eps, (B, Z_SIZE), jnp.float32)

    recon, z, mu, log_var = vae_forward(x, eps, packed)
    jax.block_until_ready((recon, z, mu, log_var))

    assert recon.shape == (B, INPUT_SIZE) and recon.dtype == jnp.bfloat16
    assert z.shape == (B, Z_SIZE) and mu.shape == (B, Z_SIZE) and log_var.shape == (B, Z_SIZE)
    _check((recon, z, mu, log_var), x, eps, params)

    # --- larger batch: exercises the gridded (multi-tile) path incl. a partial last block ---
    B2 = 300  # tb = 128 -> 3 grid steps, last block partial
    x2 = jax.random.uniform(k_x2, (B2, 1, 28, 28), jnp.float32)
    eps2 = jax.random.normal(k_eps2, (B2, Z_SIZE), jnp.float32)
    outs2 = vae_forward(x2, eps2, packed)
    jax.block_until_ready(outs2)
    assert outs2[0].shape == (B2, INPUT_SIZE) and outs2[1].shape == (B2, Z_SIZE)
    _check(outs2, x2, eps2, params)

    print("KERNEL_OK")
</pallas_src>

<mosaic_0001>
module attributes {stable_mosaic.version = 11 : i64} {
  func.func @_vae_kernel(%arg0: i32, %arg1: memref<4x784xf32, #tpu.memory_space<vmem>>, %arg2: memref<4x20xf32, #tpu.memory_space<vmem>>, %arg3: memref<784x512xbf16, #tpu.memory_space<vmem>>, %arg4: memref<1x512xf32, #tpu.memory_space<vmem>>, %arg5: memref<512x512xbf16, #tpu.memory_space<vmem>>, %arg6: memref<1x512xf32, #tpu.memory_space<vmem>>, %arg7: memref<512x256xbf16, #tpu.memory_space<vmem>>, %arg8: memref<1x256xf32, #tpu.memory_space<vmem>>, %arg9: memref<128x512xbf16, #tpu.memory_space<vmem>>, %arg10: memref<1x512xf32, #tpu.memory_space<vmem>>, %arg11: memref<512x784xbf16, #tpu.memory_space<vmem>>, %arg12: memref<1x784xf32, #tpu.memory_space<vmem>>, %arg13: memref<4x784xbf16, #tpu.memory_space<vmem>>, %arg14: memref<4x20xf32, #tpu.memory_space<vmem>>, %arg15: memref<4x20xf32, #tpu.memory_space<vmem>>, %arg16: memref<4x20xf32, #tpu.memory_space<vmem>>, %arg17: memref<4x128xf32, #tpu.memory_space<vmem>>) attributes {dimension_semantics = [#tpu.dimension_semantics<parallel>], iteration_bounds = array<i64: 1>, scalar_prefetch = 0 : i64, scratch_operands = 1 : i64, tpu.core_type = #tpu.core_type<tc>, window_params = [{transform_indices = @transform_0, window_bounds = array<i64: 4, 784>}, {transform_indices = @transform_1, window_bounds = array<i64: 4, 20>}, {pipeline_mode = #tpu.pipeline_mode<synchronous>, transform_indices = @transform_2, window_bounds = array<i64: 784, 512>}, {pipeline_mode = #tpu.pipeline_mode<synchronous>, transform_indices = @transform_3, window_bounds = array<i64: 1, 512>}, {pipeline_mode = #tpu.pipeline_mode<synchronous>, transform_indices = @transform_4, window_bounds = array<i64: 512, 512>}, {pipeline_mode = #tpu.pipeline_mode<synchronous>, transform_indices = @transform_5, window_bounds = array<i64: 1, 512>}, {pipeline_mode = #tpu.pipeline_mode<synchronous>, transform_indices = @transform_6, window_bounds = array<i64: 512, 256>}, {pipeline_mode = #tpu.pipeline_mode<synchronous>, transform_indices = @transform_7, window_bounds = array<i64: 1, 256>}, {pipeline_mode = #tpu.pipeline_mode<synchronous>, transform_indices = @transform_8, window_bounds = array<i64: 128, 512>}, {pipeline_mode = #tpu.pipeline_mode<synchronous>, transform_indices = @transform_9, window_bounds = array<i64: 1, 512>}, {pipeline_mode = #tpu.pipeline_mode<synchronous>, transform_indices = @transform_10, window_bounds = array<i64: 512, 784>}, {pipeline_mode = #tpu.pipeline_mode<synchronous>, transform_indices = @transform_11, window_bounds = array<i64: 1, 784>}, {transform_indices = @transform_12, window_bounds = array<i64: 4, 784>}, {transform_indices = @transform_13, window_bounds = array<i64: 4, 20>}, {transform_indices = @transform_14, window_bounds = array<i64: 4, 20>}, {transform_indices = @transform_15, window_bounds = array<i64: 4, 20>}]} {
    %c0 = arith.constant 0 : index
    %c0_0 = arith.constant 0 : index
    %0 = vector.load %arg1[%c0, %c0_0] : memref<4x784xf32, #tpu.memory_space<vmem>>, vector<4x784xf32>
    %1 = arith.truncf %0 : vector<4x784xf32> to vector<4x784xbf16>
    %c0_1 = arith.constant 0 : index
    %c0_2 = arith.constant 0 : index
    %2 = vector.load %arg3[%c0_1, %c0_2] : memref<784x512xbf16, #tpu.memory_space<vmem>>, vector<784x512xbf16>
    %cst = arith.constant dense<0.000000e+00> : vector<4x512xf32>
    %3 = tpu.matmul %1, %2, %cst {dimension_numbers = #tpu.dot_dimension_numbers<[1], [0], [0], [1], [0, 0, 1, 1], [], []>} : vector<4x784xbf16>, vector<784x512xbf16>, vector<4x512xf32> -> vector<4x512xf32>
    %c0_3 = arith.constant 0 : index
    %c0_4 = arith.constant 0 : index
    %4 = vector.load %arg4[%c0_3, %c0_4] : memref<1x512xf32, #tpu.memory_space<vmem>>, vector<1x512xf32>
    %5 = vector.broadcast %4 : vector<1x512xf32> to vector<4x512xf32>
    %6 = arith.addf %3, %5 : vector<4x512xf32>
    %cst_5 = arith.constant 0.000000e+00 : f32
    %7 = vector.broadcast %cst_5 : f32 to vector<4x512xf32>
    %8 = arith.maximumf %6, %7 : vector<4x512xf32>
    %9 = arith.truncf %8 : vector<4x512xf32> to vector<4x512xbf16>
    %c0_6 = arith.constant 0 : index
    %c0_7 = arith.constant 0 : index
    %10 = vector.load %arg5[%c0_6, %c0_7] : memref<512x512xbf16, #tpu.memory_space<vmem>>, vector<512x512xbf16>
    %cst_8 = arith.constant dense<0.000000e+00> : vector<4x512xf32>
    %11 = tpu.matmul %9, %10, %cst_8 {dimension_numbers = #tpu.dot_dimension_numbers<[1], [0], [0], [1], [0, 0, 1, 1], [], []>} : vector<4x512xbf16>, vector<512x512xbf16>, vector<4x512xf32> -> vector<4x512xf32>
    %c0_9 = arith.constant 0 : index
    %c0_10 = arith.constant 0 : index
    %12 = vector.load %arg6[%c0_9, %c0_10] : memref<1x512xf32, #tpu.memory_space<vmem>>, vector<1x512xf32>
    %13 = vector.broadcast %12 : vector<1x512xf32> to vector<4x512xf32>
    %14 = arith.addf %11, %13 : vector<4x512xf32>
    %cst_11 = arith.constant 0.000000e+00 : f32
    %15 = vector.broadcast %cst_11 : f32 to vector<4x512xf32>
    %16 = arith.maximumf %14, %15 : vector<4x512xf32>
    %17 = arith.truncf %16 : vector<4x512xf32> to vector<4x512xbf16>
    %c0_12 = arith.constant 0 : index
    %c0_13 = arith.constant 0 : index
    %18 = vector.load %arg7[%c0_12, %c0_13] : memref<512x256xbf16, #tpu.memory_space<vmem>>, vector<512x256xbf16>
    %cst_14 = arith.constant dense<0.000000e+00> : vector<4x256xf32>
    %19 = tpu.matmul %17, %18, %cst_14 {dimension_numbers = #tpu.dot_dimension_numbers<[1], [0], [0], [1], [0, 0, 1, 1], [], []>} : vector<4x512xbf16>, vector<512x256xbf16>, vector<4x256xf32> -> vector<4x256xf32>
    %c0_15 = arith.constant 0 : index
    %c0_16 = arith.constant 0 : index
    %20 = vector.load %arg8[%c0_15, %c0_16] : memref<1x256xf32, #tpu.memory_space<vmem>>, vector<1x256xf32>
    %21 = vector.broadcast %20 : vector<1x256xf32> to vector<4x256xf32>
    %22 = arith.addf %19, %21 : vector<4x256xf32>
    %23 = vector.extract_strided_slice %22 {offsets = [0, 0], sizes = [4, 128], strides = [1, 1]} : vector<4x256xf32> to vector<4x128xf32>
    %24 = vector.extract_strided_slice %22 {offsets = [0, 128], sizes = [4, 128], strides = [1, 1]} : vector<4x256xf32> to vector<4x128xf32>
    %cst_17 = arith.constant 0.000000e+00 : f32
    %25 = vector.broadcast %cst_17 : f32 to vector<4x128xf32>
    %c0_18 = arith.constant 0 : index
    %c0_19 = arith.constant 0 : index
    %26 = vector.load %arg17[%c0_18, %c0_19] : memref<4x128xf32, #tpu.memory_space<vmem>>, vector<4x128xf32>
    tpu.vector_store %arg17[%c0_18, %c0_19], %25 {strides = array<i32>} : memref<4x128xf32, #tpu.memory_space<vmem>>, vector<4x128xf32>,
    %c0_20 = arith.constant 0 : index
    %c0_21 = arith.constant 0 : index
    %27 = vector.load %arg2[%c0_20, %c0_21] : memref<4x20xf32, #tpu.memory_space<vmem>>, vector<4x20xf32>
    %c0_22 = arith.constant 0 : index
    %c0_23 = arith.constant 0 : index
    %28 = vector.load %arg17[%c0_22, %c0_23] : memref<4x128xf32, #tpu.memory_space<vmem>>, vector<4x20xf32>
    tpu.vector_store %arg17[%c0_22, %c0_23], %27 {strides = array<i32>} : memref<4x128xf32, #tpu.memory_space<vmem>>, vector<4x20xf32>,
    %c0_24 = arith.constant 0 : index
    %c0_25 = arith.constant 0 : index
    %29 = vector.load %arg17[%c0_24, %c0_25] : memref<4x128xf32, #tpu.memory_space<vmem>>, vector<4x128xf32>
    %cst_26 = arith.constant 5.000000e-01 : f32
    %30 = vector.broadcast %cst_26 : f32 to vector<4x128xf32>
    %31 = arith.mulf %30, %24 : vector<4x128xf32>
    %32 = math.exp %31 : vector<4x128xf32>
    %33 = arith.mulf %29, %32 : vector<4x128xf32>
    %34 = arith.addf %23, %33 : vector<4x128xf32>
    %35 = arith.truncf %34 : vector<4x128xf32> to vector<4x128xbf16>
    %c0_27 = arith.constant 0 : index
    %c0_28 = arith.constant 0 : index
    %36 = vector.load %arg9[%c0_27, %c0_28] : memref<128x512xbf16, #tpu.memory_space<vmem>>, vector<128x512xbf16>
    %cst_29 = arith.constant dense<0.000000e+00> : vector<4x512xf32>
    %37 = tpu.matmul %35, %36, %cst_29 {dimension_numbers = #tpu.dot_dimension_numbers<[1], [0], [0], [1], [0, 0, 1, 1], [], []>} : vector<4x128xbf16>, vector<128x512xbf16>, vector<4x512xf32> -> vector<4x512xf32>
    %c0_30 = arith.constant 0 : index
    %c0_31 = arith.constant 0 : index
    %38 = vector.load %arg10[%c0_30, %c0_31] : memref<1x512xf32, #tpu.memory_space<vmem>>, vector<1x512xf32>
    %39 = vector.broadcast %38 : vector<1x512xf32> to vector<4x512xf32>
    %40 = arith.addf %37, %39 : vector<4x512xf32>
    %cst_32 = arith.constant 0.000000e+00 : f32
    %41 = vector.broadcast %cst_32 : f32 to vector<4x512xf32>
    %42 = arith.maximumf %40, %41 : vector<4x512xf32>
    %43 = arith.truncf %42 : vector<4x512xf32> to vector<4x512xbf16>
    %c0_33 = arith.constant 0 : index
    %c0_34 = arith.constant 0 : index
    %44 = vector.load %arg11[%c0_33, %c0_34] : memref<512x784xbf16, #tpu.memory_space<vmem>>, vector<512x784xbf16>
    %cst_35 = arith.constant dense<0.000000e+00> : vector<4x784xf32>
    %45 = tpu.matmul %43, %44, %cst_35 {dimension_numbers = #tpu.dot_dimension_numbers<[1], [0], [0], [1], [0, 0, 1, 1], [], []>} : vector<4x512xbf16>, vector<512x784xbf16>, vector<4x784xf32> -> vector<4x784xf32>
    %c0_36 = arith.constant 0 : index
    %c0_37 = arith.constant 0 : index
    %46 = vector.load %arg12[%c0_36, %c0_37] : memref<1x784xf32, #tpu.memory_space<vmem>>, vector<1x784xf32>
    %47 = vector.broadcast %46 : vector<1x784xf32> to vector<4x784xf32>
    %48 = arith.addf %45, %47 : vector<4x784xf32>
    %cst_38 = arith.constant 5.000000e-01 : f32
    %49 = vector.broadcast %cst_38 : f32 to vector<4x784xf32>
    %50 = arith.mulf %49, %48 : vector<4x784xf32>
    %51 = math.tanh %50 : vector<4x784xf32>
    %cst_39 = arith.constant 1.000000e+00 : f32
    %52 = vector.broadcast %cst_39 : f32 to vector<4x784xf32>
    %53 = arith.addf %51, %52 : vector<4x784xf32>
    %cst_40 = arith.constant 5.000000e-01 : f32
    %54 = vector.broadcast %cst_40 : f32 to vector<4x784xf32>
    %55 = arith.mulf %54, %53 : vector<4x784xf32>
    %56 = arith.truncf %55 : vector<4x784xf32> to vector<4x784xbf16>
    %c0_41 = arith.constant 0 : index
    %c0_42 = arith.constant 0 : index
    %57 = vector.load %arg13[%c0_41, %c0_42] : memref<4x784xbf16, #tpu.memory_space<vmem>>, vector<4x784xbf16>
    tpu.vector_store %arg13[%c0_41, %c0_42], %56 {strides = array<i32>} : memref<4x784xbf16, #tpu.memory_space<vmem>>, vector<4x784xbf16>,
    %58 = vector.extract_strided_slice %34 {offsets = [0, 0], sizes = [4, 20], strides = [1, 1]} : vector<4x128xf32> to vector<4x20xf32>
    %c0_43 = arith.constant 0 : index
    %c0_44 = arith.constant 0 : index
    %59 = vector.load %arg14[%c0_43, %c0_44] : memref<4x20xf32, #tpu.memory_space<vmem>>, vector<4x20xf32>
    tpu.vector_store %arg14[%c0_43, %c0_44], %58 {strides = array<i32>} : memref<4x20xf32, #tpu.memory_space<vmem>>, vector<4x20xf32>,
    %60 = vector.extract_strided_slice %23 {offsets = [0, 0], sizes = [4, 20], strides = [1, 1]} : vector<4x128xf32> to vector<4x20xf32>
    %c0_45 = arith.constant 0 : index
    %c0_46 = arith.constant 0 : index
    %61 = vector.load %arg15[%c0_45, %c0_46] : memref<4x20xf32, #tpu.memory_space<vmem>>, vector<4x20xf32>
    tpu.vector_store %arg15[%c0_45, %c0_46], %60 {strides = array<i32>} : memref<4x20xf32, #tpu.memory_space<vmem>>, vector<4x20xf32>,
    %62 = vector.extract_strided_slice %24 {offsets = [0, 0], sizes = [4, 20], strides = [1, 1]} : vector<4x128xf32> to vector<4x20xf32>
    %c0_47 = arith.constant 0 : index
    %c0_48 = arith.constant 0 : index
    %63 = vector.load %arg16[%c0_47, %c0_48] : memref<4x20xf32, #tpu.memory_space<vmem>>, vector<4x20xf32>
    tpu.vector_store %arg16[%c0_47, %c0_48], %62 {strides = array<i32>} : memref<4x20xf32, #tpu.memory_space<vmem>>, vector<4x20xf32>,
    return
  }
  func.func @transform_0(%arg0: i32) -> (i32, i32) {
    %c0_i32 = arith.constant 0 : i32
    %c0_i32_0 = arith.constant 0 : i32
    return %arg0, %c0_i32 : i32, i32
  }
  func.func @transform_1(%arg0: i32) -> (i32, i32) {
    %c0_i32 = arith.constant 0 : i32
    %c0_i32_0 = arith.constant 0 : i32
    return %arg0, %c0_i32 : i32, i32
  }
  func.func @transform_2(%arg0: i32) -> (i32, i32) {
    %c0_i32 = arith.constant 0 : i32
    %c0_i32_0 = arith.constant 0 : i32
    %c0_i32_1 = arith.constant 0 : i32
    return %c0_i32, %c0_i32_0 : i32, i32
  }
  func.func @transform_3(%arg0: i32) -> (i32, i32) {
    %c0_i32 = arith.constant 0 : i32
    %c0_i32_0 = arith.constant 0 : i32
    %c0_i32_1 = arith.constant 0 : i32
    return %c0_i32, %c0_i32_0 : i32, i32
  }
  func.func @transform_4(%arg0: i32) -> (i32, i32) {
    %c0_i32 = arith.constant 0 : i32
    %c0_i32_0 = arith.constant 0 : i32
    %c0_i32_1 = arith.constant 0 : i32
    return %c0_i32, %c0_i32_0 : i32, i32
  }
  func.func @transform_5(%arg0: i32) -> (i32, i32) {
    %c0_i32 = arith.constant 0 : i32
    %c0_i32_0 = arith.constant 0 : i32
    %c0_i32_1 = arith.constant 0 : i32
    return %c0_i32, %c0_i32_0 : i32, i32
  }
  func.func @transform_6(%arg0: i32) -> (i32, i32) {
    %c0_i32 = arith.constant 0 : i32
    %c0_i32_0 = arith.constant 0 : i32
    %c0_i32_1 = arith.constant 0 : i32
    return %c0_i32, %c0_i32_0 : i32, i32
  }
  func.func @transform_7(%arg0: i32) -> (i32, i32) {
    %c0_i32 = arith.constant 0 : i32
    %c0_i32_0 = arith.constant 0 : i32
    %c0_i32_1 = arith.constant 0 : i32
    return %c0_i32, %c0_i32_0 : i32, i32
  }
  func.func @transform_8(%arg0: i32) -> (i32, i32) {
    %c0_i32 = arith.constant 0 : i32
    %c0_i32_0 = arith.constant 0 : i32
    %c0_i32_1 = arith.constant 0 : i32
    return %c0_i32, %c0_i32_0 : i32, i32
  }
  func.func @transform_9(%arg0: i32) -> (i32, i32) {
    %c0_i32 = arith.constant 0 : i32
    %c0_i32_0 = arith.constant 0 : i32
    %c0_i32_1 = arith.constant 0 : i32
    return %c0_i32, %c0_i32_0 : i32, i32
  }
  func.func @transform_10(%arg0: i32) -> (i32, i32) {
    %c0_i32 = arith.constant 0 : i32
    %c0_i32_0 = arith.constant 0 : i32
    %c0_i32_1 = arith.constant 0 : i32
    return %c0_i32, %c0_i32_0 : i32, i32
  }
  func.func @transform_11(%arg0: i32) -> (i32, i32) {
    %c0_i32 = arith.constant 0 : i32
    %c0_i32_0 = arith.constant 0 : i32
    %c0_i32_1 = arith.constant 0 : i32
    return %c0_i32, %c0_i32_0 : i32, i32
  }
  func.func @transform_12(%arg0: i32) -> (i32, i32) {
    %c0_i32 = arith.constant 0 : i32
    %c0_i32_0 = arith.constant 0 : i32
    return %arg0, %c0_i32 : i32, i32
  }
  func.func @transform_13(%arg0: i32) -> (i32, i32) {
    %c0_i32 = arith.constant 0 : i32
    %c0_i32_0 = arith.constant 0 : i32
    return %arg0, %c0_i32 : i32, i32
  }
  func.func @transform_14(%arg0: i32) -> (i32, i32) {
    %c0_i32 = arith.constant 0 : i32
    %c0_i32_0 = arith.constant 0 : i32
    return %arg0, %c0_i32 : i32, i32
  }
  func.func @transform_15(%arg0: i32) -> (i32, i32) {
    %c0_i32 = arith.constant 0 : i32
    %c0_i32_0 = arith.constant 0 : i32
    return %arg0, %c0_i32 : i32, i32
  }
}

</mosaic_0001>

<bundles_post_ra>
// kernel: vae_forward.1
= control target key start
LH: loop header
LB: loop body
LE: loop exit
PB: predicated region body
PF: predicated region fallthrough
CT: control target
= control target key end

     0   :  { %21 = vsyncpa [#allocation4], 0  ;;  %s12897_s0 = inlined_call_operand.vmem [shape: f32[4,784], index: 0, kind: input, shape index: {}]   ;;  %s12898_s1 = inlined_call_operand.vmem [shape: f32[4,20], index: 1, kind: input, shape index: {}]   ;;  %s12899_s2 = inlined_call_operand.vmem [shape: bf16[784,512], index: 2, kind: input, shape index: {}]   ;;  %s12900_s3 = inlined_call_operand.vmem [shape: f32[1,512], index: 3, kind: input, shape index: {}]   ;;  %s12901_s4 = inlined_call_operand.vmem [shape: bf16[512,512], index: 4, kind: input, shape index: {}]   ;;  %s12902_s5 = inlined_call_operand.vmem [shape: f32[1,512], index: 5, kind: input, shape index: {}]   ;;  %s12903_s6 = inlined_call_operand.vmem [shape: bf16[512,256], index: 6, kind: input, shape index: {}]   ;;  %s12904_s7 = inlined_call_operand.vmem [shape: f32[1,256], index: 7, kind: input, shape index: {}]   ;;  %s12905_s8 = inlined_call_operand.vmem [shape: bf16[128,512], index: 8, kind: input, shape index: {}]   ;;  %s12906_s9 = inlined_call_operand.vmem [shape: f32[1,512], index: 9, kind: input, shape index: {}]   ;;  %s12907_s10 = inlined_call_operand.vmem [shape: bf16[512,784], index: 10, kind: input, shape index: {}]   ;;  %s12908_s11 = inlined_call_operand.vmem [shape: f32[1,784], index: 11, kind: input, shape index: {}]   ;;  %s12909_s12 = inlined_call_operand.hbm [shape: bf16[4,784], index: 12, kind: output, shape index: {0}]   ;;  %s12910_s13 = inlined_call_operand.hbm [shape: f32[4,20], index: 13, kind: output, shape index: {1}]   ;;  %s12911_s14 = inlined_call_operand.hbm [shape: f32[4,20], index: 14, kind: output, shape index: {2}]   ;;  %s12912_s15 = inlined_call_operand.hbm [shape: f32[4,20], index: 15, kind: output, shape index: {3}]  }
   0x1   :  { %22 = vsyncpa [#allocation6], 0  ;;  %v5443_v0 = vld [vmem:[%s12899_s2 + $0xe0] sm:$0xf]  ;;  %v7939_v1 = vld [vmem:[%s12899_s2 + $0xec] sm:$0xf0] }
   0x2   :  { %v5571_v2 = vld [vmem:[%s12899_s2 + $0x1e0] sm:$0xf]  ;;  %v5444_v3 = vor.u32 %v7939_v1, %v5443_v0  ;;  %v7971_v4 = vld [vmem:[%s12899_s2 + $0x1ec] sm:$0xf0]  ;;  %vm1271_vm0 = vcmask 130048  }
   0x3   :  { %v5699_v5 = vld [vmem:[%s12899_s2 + $0x2e0] sm:$0xf]  ;;  %v8003_v6 = vld [vmem:[%s12899_s2 + $0x2ec] sm:$0xf0]  ;;  %v5572_v7 = vor.u32 %v7971_v4, %v5571_v2 }
   0x4   :  { %v5700_v8 = vor.u32 %v8003_v6, %v5699_v5  ;;  %v5827_v9 = vld [vmem:[%s12899_s2 + $0x3e0] sm:$0xf]  ;;  %v8035_v10 = vld [vmem:[%s12899_s2 + $0x3ec] sm:$0xf0]  ;;  %1275 = vmatpush.bf16.msra.mxu0 %v5444_v3 }
   0x5   :  { %v5427_v11 = vld [vmem:[%s12899_s2 + $0xc0] sm:$0xf]  ;;  %v5828_v12 = vor.u32 %v8035_v10, %v5827_v9  ;;  %v7935_v13 = vld [vmem:[%s12899_s2 + $0xcc] sm:$0xf0]  ;;  %1288 = vmatpush.bf16.msra.mxu1 %v5572_v7 }
   0x6   :  { %v5555_v14 = vld [vmem:[%s12899_s2 + $0x1c0] sm:$0xf]  ;;  %v7967_v15 = vld [vmem:[%s12899_s2 + $0x1cc] sm:$0xf0]  ;;  %1301 = vmatpush.bf16.msra.mxu2 %v5700_v8  ;;  %v5428_v16 = vor.u32 %v7935_v13, %v5427_v11 }
   0x7   :  { %v5556_v17 = vor.u32 %v7967_v15, %v5555_v14  ;;  %v5683_v18 = vld [vmem:[%s12899_s2 + $0x2c0] sm:$0xf]  ;;  %v7999_v19 = vld [vmem:[%s12899_s2 + $0x2cc] sm:$0xf0]  ;;  %1314 = vmatpush.bf16.msra.mxu3 %v5828_v12 }
   0x8   :  { %v5811_v20 = vld [vmem:[%s12899_s2 + $0x3c0] sm:$0xf]  ;;  %v5684_v21 = vor.u32 %v7999_v19, %v5683_v18  ;;  %v8031_v22 = vld [vmem:[%s12899_s2 + $0x3cc] sm:$0xf0]  ;;  %1276 = vmatpush.bf16.msra.mxu0 %v5428_v16 }
   0x9   :  { %v5411_v23 = vld [vmem:[%s12899_s2 + $0xa0] sm:$0xf]  ;;  %v7931_v24 = vld [vmem:[%s12899_s2 + $0xac] sm:$0xf0]  ;;  %v5812_v25 = vor.u32 %v8031_v22, %v5811_v20  ;;  %1289 = vmatpush.bf16.msra.mxu1 %v5556_v17  ;;  %v50_v22 = vld [vmem:[%s12897_s0 + $0x8] sm:$0xff] }
   0xa   :  { %v5539_v26 = vld [vmem:[%s12899_s2 + $0x1a0] sm:$0xf]  ;;  %v7963_v27 = vld [vmem:[%s12899_s2 + $0x1ac] sm:$0xf0]  ;;  %v5412_v29 = vor.u32 %v7931_v24, %v5411_v23  ;;  %1302 = vmatpush.bf16.msra.mxu2 %v5684_v21  ;;  %59 = vst [vmem:[#allocation1 + $0x10] ss:$2 sm:$0xff] %v50_v22 }
   0xb   :  { %v5667_v28 = vld [vmem:[%s12899_s2 + $0x2a0] sm:$0xf]  ;;  %v7995_v30 = vld [vmem:[%s12899_s2 + $0x2ac] sm:$0xf0]  ;;  %v5540_v33 = vor.u32 %v7963_v27, %v5539_v26  ;;  %1315 = vmatpush.bf16.msra.mxu3 %v5812_v25 }
   0xc   :  { %v5795_v31 = vld [vmem:[%s12899_s2 + $0x3a0] sm:$0xf]  ;;  %v8027_v32 = vld [vmem:[%s12899_s2 + $0x3ac] sm:$0xf0]  ;;  %v5668_v34 = vor.u32 %v7995_v30, %v5667_v28  ;;  %1277 = vmatpush.bf16.msra.mxu0 %v5412_v29 }
   0xd   :  { %v5395_v35 = vld [vmem:[%s12899_s2 + $0x80] sm:$0xf]  ;;  %v7927_v36 = vld [vmem:[%s12899_s2 + $0x8c] sm:$0xf0]  ;;  %v5796_v38 = vor.u32 %v8027_v32, %v5795_v31  ;;  %1290 = vmatpush.bf16.msra.mxu1 %v5540_v33  ;;  %v7937_v33 = vld [vmem:[%s12899_s2 + $0xe4] sm:$0xf] }
   0xe   :  { %v5523_v37 = vld [vmem:[%s12899_s2 + $0x180] sm:$0xf]  ;;  %v7959_v39 = vld [vmem:[%s12899_s2 + $0x18c] sm:$0xf0]  ;;  %v5396_v44 = vor.u32 %v7927_v36, %v5395_v35  ;;  %1303 = vmatpush.bf16.msra.mxu2 %v5668_v34  ;;  %v5445_v35 = vld [vmem:[%s12899_s2 + $0xf0] sm:$0xf0] }
   0xf   :  { %v5651_v40 = vld [vmem:[%s12899_s2 + $0x280] sm:$0xf]  ;;  %v7991_v41 = vld [vmem:[%s12899_s2 + $0x28c] sm:$0xf0]  ;;  %v5524_v45 = vor.u32 %v7959_v39, %v5523_v37  ;;  %1316 = vmatpush.bf16.msra.mxu3 %v5796_v38 }
  0x10   :  { %v5779_v42 = vld [vmem:[%s12899_s2 + $0x380] sm:$0xf]  ;;  %v8023_v43 = vld [vmem:[%s12899_s2 + $0x38c] sm:$0xf0]  ;;  %v5652_v46 = vor.u32 %v7991_v41, %v5651_v40  ;;  %1278 = vmatpush.bf16.msra.mxu0 %v5396_v44  ;;  %v7969_v40 = vld [vmem:[%s12899_s2 + $0x1e4] sm:$0xf] }
  0x11   :  { %v5379_v47 = vld [vmem:[%s12899_s2 + $0x60] sm:$0xf]  ;;  %v7923_v48 = vld [vmem:[%s12899_s2 + $0x6c] sm:$0xf0]  ;;  %v5780_v50 = vor.u32 %v8023_v43, %v5779_v42  ;;  %1291 = vmatpush.bf16.msra.mxu1 %v5524_v45  ;;  %v5573_v41 = vld [vmem:[%s12899_s2 + $0x1f0] sm:$0xf0] }
  0x12   :  { %v5507_v49 = vld [vmem:[%s12899_s2 + $0x160] sm:$0xf]  ;;  %v7955_v51 = vld [vmem:[%s12899_s2 + $0x16c] sm:$0xf0]  ;;  %v5380_v56 = vor.u32 %v7923_v48, %v5379_v47  ;;  %1304 = vmatpush.bf16.msra.mxu2 %v5652_v46 }
  0x13   :  { %v5635_v52 = vld [vmem:[%s12899_s2 + $0x260] sm:$0xf]  ;;  %v7987_v53 = vld [vmem:[%s12899_s2 + $0x26c] sm:$0xf0]  ;;  %v5508_v57 = vor.u32 %v7955_v51, %v5507_v49  ;;  %1317 = vmatpush.bf16.msra.mxu3 %v5780_v50  ;;  %v5448_v49 = vor.u32 %v7937_v33, %v5445_v35  ;;  %v7933_v51 = vld [vmem:[%s12899_s2 + $0xc4] sm:$0xf] }
  0x14   :  { %v5763_v54 = vld [vmem:[%s12899_s2 + $0x360] sm:$0xf]  ;;  %v8019_v55 = vld [vmem:[%s12899_s2 + $0x36c] sm:$0xf0]  ;;  %v5636_v58 = vor.u32 %v7987_v53, %v5635_v52  ;;  %1279 = vmatpush.bf16.msra.mxu0 %v5380_v56  ;;  %v5429_v52 = vld [vmem:[%s12899_s2 + $0xd0] sm:$0xf0] }
  0x15   :  { %v5363_v59 = vld [vmem:[%s12899_s2 + $0x40] sm:$0xf]  ;;  %v7919_v60 = vld [vmem:[%s12899_s2 + $0x4c] sm:$0xf0]  ;;  %v5764_v62 = vor.u32 %v8019_v55, %v5763_v54  ;;  %1292 = vmatpush.bf16.msra.mxu1 %v5508_v57  ;;  %v5381_v33 = vld [vmem:[%s12899_s2 + $0x70] sm:$0xf0] }
  0x16   :  { %v5491_v61 = vld [vmem:[%s12899_s2 + $0x140] sm:$0xf]  ;;  %v7951_v63 = vld [vmem:[%s12899_s2 + $0x14c] sm:$0xf0]  ;;  %v5364_v4 = vor.u32 %v7919_v60, %v5363_v59  ;;  %1305 = vmatpush.bf16.msra.mxu2 %v5636_v58  ;;  %v5576_v58 = vor.u32 %v7969_v40, %v5573_v41  ;;  %v7965_v60 = vld [vmem:[%s12899_s2 + $0x1c4] sm:$0xf] }
  0x17   :  { %v5619_v0 = vld [vmem:[%s12899_s2 + $0x240] sm:$0xf]  ;;  %v7983_v1 = vld [vmem:[%s12899_s2 + $0x24c] sm:$0xf0]  ;;  %v5492_v6 = vor.u32 %v7951_v63, %v5491_v61  ;;  %1318 = vmatpush.bf16.msra.mxu3 %v5764_v62  ;;  %v5557_v61 = vld [vmem:[%s12899_s2 + $0x1d0] sm:$0xf0]  ;;  %v5432_v63 = vor.u32 %v7933_v51, %v5429_v52 }
  0x18   :  { %v5747_v2 = vld [vmem:[%s12899_s2 + $0x340] sm:$0xf]  ;;  %v8015_v3 = vld [vmem:[%s12899_s2 + $0x34c] sm:$0xf0]  ;;  %v5620_v7 = vor.u32 %v7983_v1, %v5619_v0  ;;  %1280 = vmatpush.bf16.msra.mxu0 %v5364_v4  ;;  %v7929_v4 = vld [vmem:[%s12899_s2 + $0xa4] sm:$0xf] }
  0x19   :  { %v5347_v5 = vld [vmem:[%s12899_s2 + $0x20] sm:$0xf]  ;;  %v7915_v8 = vld [vmem:[%s12899_s2 + $0x2c] sm:$0xf0]  ;;  %v5748_v11 = vor.u32 %v8015_v3, %v5747_v2  ;;  %1293 = vmatpush.bf16.msra.mxu1 %v5492_v6  ;;  %v5560_v6 = vor.u32 %v7965_v60, %v5557_v61  ;;  %v7913_v60 = vld [vmem:[%s12899_s2 + $0x24] sm:$0xf] }
  0x1a   :  { %v5475_v9 = vld [vmem:[%s12899_s2 + $0x120] sm:$0xf]  ;;  %v7947_v10 = vld [vmem:[%s12899_s2 + $0x12c] sm:$0xf0]  ;;  %v5348_v18 = vor.u32 %v7915_v8, %v5347_v5  ;;  %1306 = vmatpush.bf16.msra.mxu2 %v5620_v7  ;;  %v5413_v5 = vld [vmem:[%s12899_s2 + $0xb0] sm:$0xf0] }
  0x1b   :  { %v5603_v12 = vld [vmem:[%s12899_s2 + $0x220] sm:$0xf]  ;;  %v7979_v13 = vld [vmem:[%s12899_s2 + $0x22c] sm:$0xf0]  ;;  %v5476_v23 = vor.u32 %v7947_v10, %v5475_v9  ;;  %1319 = vmatpush.bf16.msra.mxu3 %v5748_v11  ;;  %v5349_v61 = vld [vmem:[%s12899_s2 + $0x30] sm:$0xf0] }
  0x1c   :  { %v5731_v14 = vld [vmem:[%s12899_s2 + $0x320] sm:$0xf]  ;;  %v8011_v15 = vld [vmem:[%s12899_s2 + $0x32c] sm:$0xf0]  ;;  %v5604_v24 = vor.u32 %v7979_v13, %v5603_v12  ;;  %1281 = vmatpush.bf16.msra.mxu0 %v5348_v18  ;;  %v7961_v12 = vld [vmem:[%s12899_s2 + $0x1a4] sm:$0xf] }
  0x1d   :  { %v5331_v16 = vld [vmem:[%s12899_s2] sm:$0xf]  ;;  %v7911_v17 = vld [vmem:[%s12899_s2 + $0xc] sm:$0xf0]  ;;  %v5732_v27 = vor.u32 %v8011_v15, %v5731_v14  ;;  %1294 = vmatpush.bf16.msra.mxu1 %v5476_v23  ;;  %v5541_v13 = vld [vmem:[%s12899_s2 + $0x1b0] sm:$0xf0]  ;;  %v5416_v15 = vor.u32 %v7929_v4, %v5413_v5 }
  0x1e   :  { %v5459_v19 = vld [vmem:[%s12899_s2 + $0x100] sm:$0xf]  ;;  %v7943_v20 = vld [vmem:[%s12899_s2 + $0x10c] sm:$0xf0]  ;;  %v5332_v34 = vor.u32 %v7911_v17, %v5331_v16  ;;  %1307 = vmatpush.bf16.msra.mxu2 %v5604_v24  ;;  %v5544_v22 = vor.u32 %v7961_v12, %v5541_v13  ;;  %v7957_v24 = vld [vmem:[%s12899_s2 + $0x184] sm:$0xf] }
  0x1f   :  { %v5587_v21 = vld [vmem:[%s12899_s2 + $0x200] sm:$0xf]  ;;  %v7975_v25 = vld [vmem:[%s12899_s2 + $0x20c] sm:$0xf0]  ;;  %v5460_v38 = vor.u32 %v7943_v20, %v5459_v19  ;;  %1320 = vmatpush.bf16.msra.mxu3 %v5732_v27  ;;  %v7925_v20 = vld [vmem:[%s12899_s2 + $0x84] sm:$0xf] }
  0x20   :  { %v5715_v26 = vld [vmem:[%s12899_s2 + $0x300] sm:$0xf]  ;;  %v8007_v28 = vld [vmem:[%s12899_s2 + $0x30c] sm:$0xf0]  ;;  %v5588_v39 = vor.u32 %v7975_v25, %v5587_v21  ;;  %1282 = vmatpush.bf16.msra.mxu0 %v5332_v34  ;;  %v5397_v21 = vld [vmem:[%s12899_s2 + $0x90] sm:$0xf0] }
  0x21   :  { %v5955_v29 = vld [vmem:[%s12899_s2 + $0x4e0] sm:$0xf]  ;;  %v8067_v30 = vld [vmem:[%s12899_s2 + $0x4ec] sm:$0xf0]  ;;  %v5716_v44 = vor.u32 %v8007_v28, %v5715_v26  ;;  %1295 = vmatpush.bf16.msra.mxu1 %v5460_v38  ;;  %v5525_v25 = vld [vmem:[%s12899_s2 + $0x190] sm:$0xf0]  ;;  %v5400_v28 = vor.u32 %v7925_v20, %v5397_v21 }
  0x22   :  { %v6083_v31 = vld [vmem:[%s12899_s2 + $0x5e0] sm:$0xf]  ;;  %v8099_v32 = vld [vmem:[%s12899_s2 + $0x5ec] sm:$0xf0]  ;;  %v5956_v45 = vor.u32 %v8067_v30, %v5955_v29  ;;  %1308 = vmatpush.bf16.msra.mxu2 %v5588_v39  ;;  %v52_v34 = vld [vmem:[%s12897_s0 + $0x18] sm:$0xf]  ;;  %v5528_v35 = vor.u32 %v7957_v24, %v5525_v25 }
  0x23   :  { %v6099_v36 = vld [vmem:[%s12899_s2 + $0x600] sm:$0xf]  ;;  %v8103_v37 = vld [vmem:[%s12899_s2 + $0x60c] sm:$0xf0]  ;;  %v6084_v48 = vor.u32 %v8099_v32, %v6083_v31  ;;  %1321 = vmatpush.bf16.msra.mxu3 %v5716_v44  ;;  %v7921_v32 = vld [vmem:[%s12899_s2 + $0x64] sm:$0xf] }
  0x24   :  { %v5939_v42 = vld [vmem:[%s12899_s2 + $0x4c0] sm:$0xf]  ;;  %v8063_v46 = vld [vmem:[%s12899_s2 + $0x4cc] sm:$0xf0]  ;;  %v6100_v56 = vor.u32 %v8103_v37, %v6099_v36  ;;  %1327 = vmatpush.bf16.msrb.mxu0 %v5956_v45  ;;  %63 = vst [vmem:[#allocation1 + $0x30] ss:$2 sm:$0xff] %v52_v34  ;;  %v5384_v40 = vor.u32 %v7921_v32, %v5381_v33 }
  0x25   :  { %v49_v43 = vld [vmem:[%s12897_s0] sm:$0xff]  ;;  %v8095_v50 = vld [vmem:[%s12899_s2 + $0x5cc] sm:$0xf0]  ;;  %v67_v54 = vld.sshfl [vmem:[#allocation1 + $0x18] sm:$0xff pattern:$0x75316420]  ;;  %v5940_v59 = vor.u32 %v8063_v46, %v5939_v42  ;;  %1340 = vmatpush.bf16.msrb.mxu1 %v6084_v48 }
  0x26   :  { %v6067_v47 = vld [vmem:[%s12899_s2 + $0x5c0] sm:$0xf]  ;;  %57 = vst [vmem:[#allocation1] ss:$2 sm:$0xff] %v49_v43  ;;  %v9009_v57 = vpack.c.bf16 %v67_v54, %v67_v54  ;;  %v8059_v1 = vld [vmem:[%s12899_s2 + $0x4ac] sm:$0xf0]  ;;  %1360 = vmatpush.bf16.msrb.mxu2 %v6100_v56 }
  0x27   :  { %v66_v53 = vld.sshfl [vmem:[#allocation1 + $0x10] sm:$0xff pattern:$0x75316420]  ;;  %1366 = vmatpush.bf16.msrb.mxu3 %v5448_v49  ;;  %v6068_v62 = vor.u32 %v8095_v50, %v6067_v47  ;;  %v5923_v0 = vld [vmem:[%s12899_s2 + $0x4a0] sm:$0xf] }
  0x28   :  { %v9007_v55 = vpack.c.bf16 %v66_v53, %v66_v53  ;;  %v6051_v2 = vld [vmem:[%s12899_s2 + $0x5a0] sm:$0xf]  ;;  %v8091_v3 = vld [vmem:[%s12899_s2 + $0x5ac] sm:$0xf0]  ;;  %1322 = vmatmul.bf16.vlgmr.msra.gmra.mxu3 %v9009_v57  ;;  %1328 = vmatpush.bf16.msrb.mxu0 %v5940_v59  ;;  %v5924_v10 = vor.u32 %v8059_v1, %v5923_v0  ;;  %v7953_v37 = vld [vmem:[%s12899_s2 + $0x164] sm:$0xf] }
  0x29   :  { %1341 = vmatpush.bf16.msrb.mxu1 %v6068_v62  ;;  %v6052_v14 = vor.u32 %v8091_v3, %v6051_v2  ;;  %v5907_v16 = vld [vmem:[%s12899_s2 + $0x480] sm:$0xf]  ;;  %v8055_v17 = vld [vmem:[%s12899_s2 + $0x48c] sm:$0xf0]  ;;  %v5509_v38 = vld [vmem:[%s12899_s2 + $0x170] sm:$0xf0] }
  0x2a   :  { %1309 = vmatmul.bf16.vlgmr.msra.gmra.mxu2 %v9007_v55  ;;  %v6035_v18 = vld [vmem:[%s12899_s2 + $0x580] sm:$0xf]  ;;  %v8087_v19 = vld [vmem:[%s12899_s2 + $0x58c] sm:$0xf0]  ;;  %v5908_v23 = vor.u32 %v8055_v17, %v5907_v16  ;;  %v7917_v45 = vld [vmem:[%s12899_s2 + $0x44] sm:$0xf]  ;;  %v5512_v50 = vor.u32 %v7953_v37, %v5509_v38 }
  0x2b   :  { %1379 = vmatpush.bf16.msra.mxu2 %v5576_v58  ;;  %1367 = vmatpush.bf16.msrb.mxu3 %v5432_v63  ;;  %v5891_v26 = vld [vmem:[%s12899_s2 + $0x460] sm:$0xf]  ;;  %v6036_v27 = vor.u32 %v8087_v19, %v6035_v18  ;;  %v8051_v29 = vld [vmem:[%s12899_s2 + $0x46c] sm:$0xf0]  ;;  %v5365_v46 = vld [vmem:[%s12899_s2 + $0x50] sm:$0xf0] }
  0x2c   :  { %1329 = vmatpush.bf16.msrb.mxu0 %v5924_v10  ;;  %v6019_v30 = vld [vmem:[%s12899_s2 + $0x560] sm:$0xf]  ;;  %v8083_v31 = vld [vmem:[%s12899_s2 + $0x56c] sm:$0xf0]  ;;  %v5892_v36 = vor.u32 %v8051_v29, %v5891_v26  ;;  %v7949_v47 = vld [vmem:[%s12899_s2 + $0x144] sm:$0xf]  ;;  %v5368_v56 = vor.u32 %v7917_v45, %v5365_v46 }
  0x2d   :  { %v64_v7 = vld.sshfl [vmem:[#allocation1] sm:$0xff pattern:$0x75316420]  ;;  %v65_v8 = vld.sshfl [vmem:[#allocation1 + $0x8] sm:$0xff pattern:$0x75316420]  ;;  %1342 = vmatpush.bf16.msrb.mxu1 %v6052_v14  ;;  %v6020_v39 = vor.u32 %v8083_v31, %v6019_v30 }
  0x2e   :  { %v9037_v9 = vpack.c.bf16 %v64_v7, %v64_v7  ;;  %v9039_v11 = vpack.c.bf16 %v65_v8, %v65_v8  ;;  %v5875_v41 = vld [vmem:[%s12899_s2 + $0x440] sm:$0xf]  ;;  %v8047_v42 = vld [vmem:[%s12899_s2 + $0x44c] sm:$0xf0]  ;;  %v5493_v48 = vld [vmem:[%s12899_s2 + $0x150] sm:$0xf0]  ;;  %v5352_v8 = vor.u32 %v7913_v60, %v5349_v61 }
  0x2f   :  { %1380 = vmatpush.bf16.msra.mxu2 %v5560_v6  ;;  %1368 = vmatpush.bf16.msrb.mxu3 %v5416_v15  ;;  %v6003_v43 = vld [vmem:[%s12899_s2 + $0x540] sm:$0xf]  ;;  %v8079_v44 = vld [vmem:[%s12899_s2 + $0x54c] sm:$0xf0]  ;;  %v5876_v51 = vor.u32 %v8047_v42, %v5875_v41  ;;  %v7945_v0 = vld [vmem:[%s12899_s2 + $0x124] sm:$0xf]  ;;  %v5496_v2 = vor.u32 %v7949_v47, %v5493_v48 }
  0x30   :  { %1283 = vmatmul.bf16.vlgmr.msra.gmra.mxu0 %v9037_v9  ;;  %1296 = vmatmul.bf16.vlgmr.msra.gmra.mxu1 %v9039_v11  ;;  %v51_v49 = vld [vmem:[%s12897_s0 + $0x10] sm:$0xff]  ;;  %v5859_v52 = vld [vmem:[%s12899_s2 + $0x420] sm:$0xf]  ;;  %v6004_v54 = vor.u32 %v8079_v44, %v6003_v43  ;;  %v7909_v12 = vld [vmem:[%s12899_s2 + $0x4] sm:$0xf] }
  0x31   :  { %1330 = vmatpush.bf16.msrb.mxu0 %v5908_v23  ;;  %1343 = vmatpush.bf16.msrb.mxu1 %v6036_v27  ;;  %v8043_v53 = vld [vmem:[%s12899_s2 + $0x42c] sm:$0xf0]  ;;  %61 = vst [vmem:[#allocation1 + $0x20] ss:$2 sm:$0xff] %v51_v49  ;;  %v5987_v58 = vld [vmem:[%s12899_s2 + $0x520] sm:$0xf] }
  0x32   :  { %v8075_v59 = vld [vmem:[%s12899_s2 + $0x52c] sm:$0xf0]  ;;  %v5477_v1 = vld [vmem:[%s12899_s2 + $0x130] sm:$0xf0]  ;;  %v5860_v3 = vor.u32 %v8043_v53, %v5859_v52  ;;  %v5843_v4 = vld [vmem:[%s12899_s2 + $0x400] sm:$0xf] }
  0x33   :  { %1381 = vmatpush.bf16.msra.mxu2 %v5544_v22  ;;  %1369 = vmatpush.bf16.msrb.mxu3 %v5400_v28  ;;  %v70_v62 = vld.sshfl [vmem:[#allocation1 + $0x30] sm:$0xff pattern:$0x75316420]  ;;  %v5971_v6 = vld [vmem:[%s12899_s2 + $0x500] sm:$0xf]  ;;  %v5988_v7 = vor.u32 %v8075_v59, %v5987_v58  ;;  %v5480_v20 = vor.u32 %v7945_v0, %v5477_v1 }
  0x34   :  { %v9145_v63 = vpack.c.bf16 %v70_v62, %v70_v62  ;;  %v8039_v5 = vld [vmem:[%s12899_s2 + $0x40c] sm:$0xf0]  ;;  %v5333_v13 = vld [vmem:[%s12899_s2 + $0x10] sm:$0xf0]  ;;  %v8001_v14 = vld [vmem:[%s12899_s2 + $0x2e4] sm:$0xf] }
  0x35   :  { %1331 = vmatpush.bf16.msrb.mxu0 %v5892_v36  ;;  %1344 = vmatpush.bf16.msrb.mxu1 %v6020_v39  ;;  %v8071_v10 = vld [vmem:[%s12899_s2 + $0x50c] sm:$0xf0]  ;;  %v5701_v15 = vld [vmem:[%s12899_s2 + $0x2f0] sm:$0xf0]  ;;  %v8033_v16 = vld [vmem:[%s12899_s2 + $0x3e4] sm:$0xf]  ;;  %v5844_v21 = vor.u32 %v8039_v5, %v5843_v4  ;;  %v5336_v25 = vor.u32 %v7909_v12, %v5333_v13 }
  0x36   :  { %v5829_v17 = vld [vmem:[%s12899_s2 + $0x3f0] sm:$0xf0]  ;;  %v8065_v18 = vld [vmem:[%s12899_s2 + $0x4e4] sm:$0xf]  ;;  %v5972_v24 = vor.u32 %v8071_v10, %v5971_v6  ;;  %v5704_v28 = vor.u32 %v8001_v14, %v5701_v15 }
  0x37   :  { %1382 = vmatpush.bf16.msra.mxu2 %v5528_v35  ;;  %1370 = vmatpush.bf16.msrb.mxu3 %v5384_v40  ;;  %v5957_v19 = vld [vmem:[%s12899_s2 + $0x4f0] sm:$0xf0]  ;;  %v7941_v23 = vld [vmem:[%s12899_s2 + $0x104] sm:$0xf]  ;;  %v5832_v29 = vor.u32 %v8033_v16, %v5829_v17 }
  0x38   :  { %v68_v22 = vld.sshfl [vmem:[#allocation1 + $0x20] sm:$0xff pattern:$0x75316420]  ;;  %v5461_v26 = vld [vmem:[%s12899_s2 + $0x110] sm:$0xf0]  ;;  %v5960_v33 = vor.u32 %v8065_v18, %v5957_v19 }
  0x39   :  { %1332 = vmatpush.bf16.msrb.mxu0 %v5876_v51  ;;  %1345 = vmatpush.bf16.msrb.mxu1 %v6004_v54  ;;  %v69_v27 = vld.sshfl [vmem:[#allocation1 + $0x28] sm:$0xff pattern:$0x75316420]  ;;  %v8097_v30 = vld [vmem:[%s12899_s2 + $0x5e4] sm:$0xf]  ;;  %v9206_v34 = vpack.c.bf16 %v68_v22, %v68_v22  ;;  %v5464_v38 = vor.u32 %v7941_v23, %v5461_v26 }
  0x3a   :  { %6113 = vmatmul.msk.bf16.vlgmr.msrb.gmra.mxu2 %vm1271_vm0, %v9145_v63  ;;  %v6085_v31 = vld [vmem:[%s12899_s2 + $0x5f0] sm:$0xf0]  ;;  %v7997_v32 = vld [vmem:[%s12899_s2 + $0x2c4] sm:$0xf]  ;;  %v9217_v39 = vpack.c.bf16 %v69_v27, %v69_v27 }
  0x3b   :  { %1383 = vmatpush.bf16.msra.mxu2 %v5512_v50  ;;  %1371 = vmatpush.bf16.msrb.mxu3 %v5368_v56  ;;  %v5685_v35 = vld [vmem:[%s12899_s2 + $0x2d0] sm:$0xf0]  ;;  %v8029_v36 = vld [vmem:[%s12899_s2 + $0x3c4] sm:$0xf]  ;;  %v6088_v42 = vor.u32 %v8097_v30, %v6085_v31 }
  0x3c   :  { %v5813_v37 = vld [vmem:[%s12899_s2 + $0x3d0] sm:$0xf0]  ;;  %v8061_v40 = vld [vmem:[%s12899_s2 + $0x4c4] sm:$0xf]  ;;  %v5688_v43 = vor.u32 %v7997_v32, %v5685_v35 }
  0x3d   :  { %1333 = vmatpush.bf16.msrb.mxu0 %v5860_v3  ;;  %1346 = vmatpush.bf16.msrb.mxu1 %v5988_v7  ;;  %v5941_v41 = vld [vmem:[%s12899_s2 + $0x4d0] sm:$0xf0]  ;;  %v5816_v44 = vor.u32 %v8029_v36, %v5813_v37  ;;  %v8093_v45 = vld [vmem:[%s12899_s2 + $0x5c4] sm:$0xf] }
  0x3e   :  { %v6069_v46 = vld [vmem:[%s12899_s2 + $0x5d0] sm:$0xf0]  ;;  %v7993_v47 = vld [vmem:[%s12899_s2 + $0x2a4] sm:$0xf]  ;;  %v5944_v48 = vor.u32 %v8061_v40, %v5941_v41 }
  0x3f   :  { %1384 = vmatpush.bf16.msra.mxu2 %v5496_v2  ;;  %1372 = vmatpush.bf16.msrb.mxu3 %v5352_v8  ;;  %v5669_v49 = vld [vmem:[%s12899_s2 + $0x2b0] sm:$0xf0]  ;;  %v8025_v50 = vld [vmem:[%s12899_s2 + $0x3a4] sm:$0xf]  ;;  %v6072_v54 = vor.u32 %v8093_v45, %v6069_v46 }
  0x40   :  { %v5797_v51 = vld [vmem:[%s12899_s2 + $0x3b0] sm:$0xf0]  ;;  %v8057_v52 = vld [vmem:[%s12899_s2 + $0x4a4] sm:$0xf]  ;;  %v5672_v56 = vor.u32 %v7993_v47, %v5669_v49 }
  0x41   :  { %1334 = vmatpush.bf16.msrb.mxu0 %v5844_v21  ;;  %1347 = vmatpush.bf16.msrb.mxu1 %v5972_v24  ;;  %v5925_v53 = vld [vmem:[%s12899_s2 + $0x4b0] sm:$0xf0]  ;;  %v5800_v58 = vor.u32 %v8025_v50, %v5797_v51  ;;  %v8089_v59 = vld [vmem:[%s12899_s2 + $0x5a4] sm:$0xf] }
  0x42   :  { %v6053_v60 = vld [vmem:[%s12899_s2 + $0x5b0] sm:$0xf0]  ;;  %v7989_v61 = vld [vmem:[%s12899_s2 + $0x284] sm:$0xf]  ;;  %v5928_v62 = vor.u32 %v8057_v52, %v5925_v53 }
  0x43   :  { %1385 = vmatpush.bf16.msra.mxu2 %v5480_v20  ;;  %1373 = vmatpush.bf16.msrb.mxu3 %v5336_v25  ;;  %v5653_v0 = vld [vmem:[%s12899_s2 + $0x290] sm:$0xf0]  ;;  %v8021_v1 = vld [vmem:[%s12899_s2 + $0x384] sm:$0xf]  ;;  %v6056_v5 = vor.u32 %v8089_v59, %v6053_v60  ;;  %v5451_v59 = vld [vmem:[%s12899_s2 + $0xe8] sm:$0xf] }
  0x44   :  { %1335 = vmatmul.bf16.vlgmr.msrb.gmra.mxu0 %v9206_v34  ;;  %1348 = vmatmul.bf16.vlgmr.msrb.gmra.mxu1 %v9217_v39  ;;  %v5781_v2 = vld [vmem:[%s12899_s2 + $0x390] sm:$0xf0]  ;;  %v8053_v3 = vld [vmem:[%s12899_s2 + $0x484] sm:$0xf]  ;;  %v5656_v6 = vor.u32 %v7989_v61, %v5653_v0  ;;  %v7940_v60 = vld [vmem:[%s12899_s2 + $0xf4] sm:$0xf0] }
  0x45   :  { %1392 = vmatpush.bf16.msra.mxu0 %v5704_v28  ;;  %1405 = vmatpush.bf16.msra.mxu1 %v5832_v29  ;;  %v5909_v4 = vld [vmem:[%s12899_s2 + $0x490] sm:$0xf0]  ;;  %v5784_v7 = vor.u32 %v8021_v1, %v5781_v2  ;;  %v8085_v8 = vld [vmem:[%s12899_s2 + $0x584] sm:$0xf]  ;;  %v5707_v1 = vld [vmem:[%s12899_s2 + $0x2e8] sm:$0xf] }
  0x46   :  { %1374 = vmatmul.bf16.vlgmr.msrb.gmra.mxu3 %v9037_v9  ;;  %v6037_v10 = vld [vmem:[%s12899_s2 + $0x590] sm:$0xf0]  ;;  %v7985_v12 = vld [vmem:[%s12899_s2 + $0x264] sm:$0xf]  ;;  %v5912_v13 = vor.u32 %v8053_v3, %v5909_v4  ;;  %v8004_v2 = vld [vmem:[%s12899_s2 + $0x2f4] sm:$0xf0] }
  0x47   :  { %1418 = vmatpush.bf16.msra.mxu3 %v5960_v33  ;;  %1386 = vmatpush.bf16.msra.mxu2 %v5464_v38  ;;  %v5637_v14 = vld [vmem:[%s12899_s2 + $0x270] sm:$0xf0]  ;;  %v8017_v15 = vld [vmem:[%s12899_s2 + $0x364] sm:$0xf]  ;;  %v6040_v19 = vor.u32 %v8085_v8, %v6037_v10  ;;  %v5452_v8 = vor.u32 %v7940_v60, %v5451_v59  ;;  %v5835_v10 = vld [vmem:[%s12899_s2 + $0x3e8] sm:$0xf] }
  0x48   :  { %v5765_v16 = vld [vmem:[%s12899_s2 + $0x370] sm:$0xf0]  ;;  %v8049_v17 = vld [vmem:[%s12899_s2 + $0x464] sm:$0xf]  ;;  %v5640_v20 = vor.u32 %v7985_v12, %v5637_v14  ;;  %v8036_v12 = vld [vmem:[%s12899_s2 + $0x3f4] sm:$0xf0] }
  0x49   :  { %1393 = vmatpush.bf16.msra.mxu0 %v5688_v43  ;;  %1406 = vmatpush.bf16.msra.mxu1 %v5816_v44  ;;  %v5893_v18 = vld [vmem:[%s12899_s2 + $0x470] sm:$0xf0]  ;;  %v5768_v21 = vor.u32 %v8017_v15, %v5765_v16  ;;  %v8081_v22 = vld [vmem:[%s12899_s2 + $0x564] sm:$0xf]  ;;  %v5579_v14 = vld [vmem:[%s12899_s2 + $0x1e8] sm:$0xf]  ;;  %v5708_v16 = vor.u32 %v8004_v2, %v5707_v1 }
  0x4a   :  { %1387 = vmatmul.bf16.vlgmr.msra.gmra.mxu2 %v9039_v11  ;;  %v6021_v23 = vld [vmem:[%s12899_s2 + $0x570] sm:$0xf0]  ;;  %v7981_v24 = vld [vmem:[%s12899_s2 + $0x244] sm:$0xf]  ;;  %v5896_v25 = vor.u32 %v8049_v17, %v5893_v18  ;;  %v7972_v15 = vld [vmem:[%s12899_s2 + $0x1f4] sm:$0xf0] }
  0x4b   :  { %1431 = vmatpush.bf16.msrb.mxu2 %v6088_v42  ;;  %1419 = vmatpush.bf16.msra.mxu3 %v5944_v48  ;;  %v5621_v26 = vld [vmem:[%s12899_s2 + $0x250] sm:$0xf0]  ;;  %v8013_v27 = vld [vmem:[%s12899_s2 + $0x344] sm:$0xf]  ;;  %v6024_v31 = vor.u32 %v8081_v22, %v6021_v23  ;;  %v5435_v18 = vld [vmem:[%s12899_s2 + $0xc8] sm:$0xf]  ;;  %v5580_v23 = vor.u32 %v7972_v15, %v5579_v14 }
  0x4c   :  { %v5749_v28 = vld [vmem:[%s12899_s2 + $0x350] sm:$0xf0]  ;;  %v8045_v29 = vld [vmem:[%s12899_s2 + $0x444] sm:$0xf]  ;;  %v5624_v32 = vor.u32 %v7981_v24, %v5621_v26  ;;  %v8000_v22 = vld [vmem:[%s12899_s2 + $0x2d4] sm:$0xf0] }
  0x4d   :  { %1394 = vmatpush.bf16.msra.mxu0 %v5672_v56  ;;  %1407 = vmatpush.bf16.msra.mxu1 %v5800_v58  ;;  %v5877_v30 = vld [vmem:[%s12899_s2 + $0x450] sm:$0xf0]  ;;  %v5752_v33 = vor.u32 %v8013_v27, %v5749_v28  ;;  %v8077_v35 = vld [vmem:[%s12899_s2 + $0x544] sm:$0xf]  ;;  %v5819_v24 = vld [vmem:[%s12899_s2 + $0x3c8] sm:$0xf] }
  0x4e   :  { %v6005_v36 = vld [vmem:[%s12899_s2 + $0x550] sm:$0xf0]  ;;  %v7977_v37 = vld [vmem:[%s12899_s2 + $0x224] sm:$0xf]  ;;  %v5880_v38 = vor.u32 %v8045_v29, %v5877_v30  ;;  %v5563_v27 = vld [vmem:[%s12899_s2 + $0x1c8] sm:$0xf] }
  0x4f   :  { %1432 = vmatpush.bf16.msrb.mxu2 %v6072_v54  ;;  %1420 = vmatpush.bf16.msra.mxu3 %v5928_v62  ;;  %v5605_v40 = vld [vmem:[%s12899_s2 + $0x230] sm:$0xf0]  ;;  %v8009_v41 = vld [vmem:[%s12899_s2 + $0x324] sm:$0xf]  ;;  %v6008_v45 = vor.u32 %v8077_v35, %v6005_v36  ;;  %v7968_v28 = vld [vmem:[%s12899_s2 + $0x1d4] sm:$0xf0] }
  0x50   :  { %v5733_v42 = vld [vmem:[%s12899_s2 + $0x330] sm:$0xf0]  ;;  %v8041_v43 = vld [vmem:[%s12899_s2 + $0x424] sm:$0xf]  ;;  %v5608_v48 = vor.u32 %v7977_v37, %v5605_v40  ;;  %v5419_v30 = vld [vmem:[%s12899_s2 + $0xa8] sm:$0xf]  ;;  %v5564_v36 = vor.u32 %v7968_v28, %v5563_v27 }
  0x51   :  { %1395 = vmatpush.bf16.msra.mxu0 %v5656_v6  ;;  %1408 = vmatpush.bf16.msra.mxu1 %v5784_v7  ;;  %v5861_v44 = vld [vmem:[%s12899_s2 + $0x430] sm:$0xf0]  ;;  %v8073_v46 = vld [vmem:[%s12899_s2 + $0x524] sm:$0xf]  ;;  %v5736_v49 = vor.u32 %v8009_v41, %v5733_v42  ;;  %v7996_v35 = vld [vmem:[%s12899_s2 + $0x2b4] sm:$0xf0] }
  0x52   :  { %v5989_v47 = vld [vmem:[%s12899_s2 + $0x530] sm:$0xf0]  ;;  %v7973_v50 = vld [vmem:[%s12899_s2 + $0x204] sm:$0xf]  ;;  %v5864_v53 = vor.u32 %v8041_v43, %v5861_v44  ;;  %v5803_v37 = vld [vmem:[%s12899_s2 + $0x3a8] sm:$0xf] }
  0x53   :  { %1433 = vmatpush.bf16.msrb.mxu2 %v6056_v5  ;;  %1421 = vmatpush.bf16.msra.mxu3 %v5912_v13  ;;  %v5589_v51 = vld [vmem:[%s12899_s2 + $0x210] sm:$0xf0]  ;;  %v8005_v52 = vld [vmem:[%s12899_s2 + $0x304] sm:$0xf]  ;;  %v5992_v62 = vor.u32 %v8073_v46, %v5989_v47  ;;  %v5547_v41 = vld [vmem:[%s12899_s2 + $0x1a8] sm:$0xf] }
  0x54   :  { %v5717_v54 = vld [vmem:[%s12899_s2 + $0x310] sm:$0xf0]  ;;  %v8037_v56 = vld [vmem:[%s12899_s2 + $0x404] sm:$0xf]  ;;  %v5592_v3 = vor.u32 %v7973_v50, %v5589_v51  ;;  %v7964_v42 = vld [vmem:[%s12899_s2 + $0x1b4] sm:$0xf0] }
  0x55   :  { %1396 = vmatpush.bf16.msra.mxu0 %v5640_v20  ;;  %1409 = vmatpush.bf16.msra.mxu1 %v5768_v21  ;;  %v5845_v58 = vld [vmem:[%s12899_s2 + $0x410] sm:$0xf0]  ;;  %v8101_v61 = vld [vmem:[%s12899_s2 + $0x604] sm:$0xf]  ;;  %v5720_v4 = vor.u32 %v8005_v52, %v5717_v54  ;;  %v5836_v20 = vor.u32 %v8036_v12, %v5835_v10  ;;  %v5691_v21 = vld [vmem:[%s12899_s2 + $0x2c8] sm:$0xf] }
  0x56   :  { %v6101_v0 = vld [vmem:[%s12899_s2 + $0x610] sm:$0xf0]  ;;  %v8069_v5 = vld [vmem:[%s12899_s2 + $0x504] sm:$0xf]  ;;  %v5848_v7 = vor.u32 %v8037_v56, %v5845_v58  ;;  %v5692_v29 = vor.u32 %v8000_v22, %v5691_v21  ;;  %v5403_v44 = vld [vmem:[%s12899_s2 + $0x88] sm:$0xf] }
  0x57   :  { %1434 = vmatpush.bf16.msrb.mxu2 %v6040_v19  ;;  %1422 = vmatpush.bf16.msra.mxu3 %v5896_v25  ;;  %v5973_v6 = vld [vmem:[%s12899_s2 + $0x510] sm:$0xf0]  ;;  %v6104_v13 = vor.u32 %v8101_v61, %v6101_v0  ;;  %v7936_v19 = vld [vmem:[%s12899_s2 + $0xd4] sm:$0xf0]  ;;  %v5659_v47 = vld [vmem:[%s12899_s2 + $0x288] sm:$0xf] }
  0x58   :  { %v5976_v17 = vor.u32 %v8069_v5, %v5973_v6  ;;  %v8032_v25 = vld [vmem:[%s12899_s2 + $0x3d4] sm:$0xf0]  ;;  %v5436_v26 = vor.u32 %v7936_v19, %v5435_v18  ;;  %v5787_v50 = vld [vmem:[%s12899_s2 + $0x388] sm:$0xf] }
  0x59   :  { %1397 = vmatpush.bf16.msra.mxu0 %v5624_v32  ;;  %1410 = vmatpush.bf16.msra.mxu1 %v5752_v33  ;;  %v5820_v32 = vor.u32 %v8032_v25, %v5819_v24  ;;  %v5675_v33 = vld [vmem:[%s12899_s2 + $0x2a8] sm:$0xf]  ;;  %v8024_v51 = vld [vmem:[%s12899_s2 + $0x394] sm:$0xf0] }
  0x5a   :  { %v5676_v43 = vor.u32 %v7996_v35, %v5675_v33  ;;  %v7960_v54 = vld [vmem:[%s12899_s2 + $0x194] sm:$0xf0]  ;;  %v5387_v58 = vld [vmem:[%s12899_s2 + $0x68] sm:$0xf]  ;;  %v5788_v60 = vor.u32 %v8024_v51, %v5787_v50 }
  0x5b   :  { %1435 = vmatpush.bf16.msrb.mxu2 %v6024_v31  ;;  %1423 = vmatpush.bf16.msra.mxu3 %v5880_v38  ;;  %v7932_v31 = vld [vmem:[%s12899_s2 + $0xb4] sm:$0xf0]  ;;  %v5643_v61 = vld [vmem:[%s12899_s2 + $0x268] sm:$0xf] }
  0x5c   :  { %v8028_v38 = vld [vmem:[%s12899_s2 + $0x3b4] sm:$0xf0]  ;;  %v5420_v40 = vor.u32 %v7932_v31, %v5419_v30  ;;  %v5771_v1 = vld [vmem:[%s12899_s2 + $0x368] sm:$0xf] }
  0x5d   :  { %1398 = vmatpush.bf16.msra.mxu0 %v5608_v48  ;;  %1411 = vmatpush.bf16.msra.mxu1 %v5736_v49  ;;  %v5804_v46 = vor.u32 %v8028_v38, %v5803_v37  ;;  %v7992_v48 = vld [vmem:[%s12899_s2 + $0x294] sm:$0xf0]  ;;  %v5548_v49 = vor.u32 %v7964_v42, %v5547_v41 }
  0x5e   :  { %v5660_v56 = vor.u32 %v7992_v48, %v5659_v47  ;;  %v7924_v59 = vld [vmem:[%s12899_s2 + $0x74] sm:$0xf0] }
  0x5f   :  { %1436 = vmatpush.bf16.msrb.mxu2 %v6008_v45  ;;  %1424 = vmatpush.bf16.msra.mxu3 %v5864_v53  ;;  %v7928_v45 = vld [vmem:[%s12899_s2 + $0x94] sm:$0xf0]  ;;  %v5531_v53 = vld [vmem:[%s12899_s2 + $0x188] sm:$0xf] }
  0x60   :  { %v5404_v52 = vor.u32 %v7928_v45, %v5403_v44  ;;  %v5532_v0 = vor.u32 %v7960_v54, %v5531_v53  ;;  %v8020_v2 = vld [vmem:[%s12899_s2 + $0x374] sm:$0xf0] }
  0x61   :  { %1399 = vmatpush.bf16.msra.mxu0 %v5592_v3  ;;  %1412 = vmatpush.bf16.msra.mxu1 %v5720_v4 }
  0x63   :  { %1437 = vmatpush.bf16.msrb.mxu2 %v5992_v62  ;;  %1425 = vmatpush.bf16.msra.mxu3 %v5848_v7  ;;  %v7988_v62 = vld [vmem:[%s12899_s2 + $0x274] sm:$0xf0] }
  0x64   :  { %1400 = vmatmul.bf16.vlgmr.msra.gmra.mxu0 %v9007_v55  ;;  %1413 = vmatmul.bf16.vlgmr.msra.gmra.mxu1 %v9009_v57 }
  0x65   :  { %1457 = vmatpush.bf16.msrb.mxu1 %v5452_v8  ;;  %1483 = vmatpush.bf16.msrb.mxu0 %v5708_v16 }
  0x66   :  { %1426 = vmatmul.bf16.vlgmr.msra.gmra.mxu3 %v9206_v34 }
  0x67   :  { %1451 = vmatpush.bf16.msrb.mxu3 %v6104_v13  ;;  %1438 = vmatpush.bf16.msrb.mxu2 %v5976_v17 }
  0x69   :  { %1458 = vmatpush.bf16.msrb.mxu1 %v5436_v26  ;;  %1484 = vmatpush.bf16.msrb.mxu0 %v5692_v29 }
  0x6a   :  { %1439 = vmatmul.bf16.vlgmr.msrb.gmra.mxu2 %v9217_v39 }
  0x6b   :  { %1496 = vmatpush.bf16.msra.mxu2 %v5836_v20  ;;  %1470 = vmatpush.bf16.msra.mxu3 %v5580_v23 }
  0x6d   :  { %1459 = vmatpush.bf16.msrb.mxu1 %v5420_v40  ;;  %1485 = vmatpush.bf16.msrb.mxu0 %v5676_v43 }
  0x6f   :  { %1497 = vmatpush.bf16.msra.mxu2 %v5820_v32  ;;  %1471 = vmatpush.bf16.msra.mxu3 %v5564_v36 }
  0x73   :  { %1498 = vmatpush.bf16.msra.mxu2 %v5804_v46  ;;  %1472 = vmatpush.bf16.msra.mxu3 %v5548_v49 }
  0x74   :  { %23 = vsyncpa [#allocation9], 0  ;;  %1460 = vmatpush.bf16.msrb.mxu1 %v5404_v52  ;;  %v5388_v3 = vor.u32 %v7924_v59, %v5387_v58  ;;  %v5515_v4 = vld [vmem:[%s12899_s2 + $0x168] sm:$0xf]  ;;  %v7956_v5 = vld [vmem:[%s12899_s2 + $0x174] sm:$0xf0]  ;;  %1486 = vmatpush.bf16.msrb.mxu0 %v5660_v56  ;;  %v5644_v6 = vor.u32 %v7988_v62, %v5643_v61  ;;  %v5772_v10 = vor.u32 %v8020_v2, %v5771_v1 }
  0x75   :  { %v5371_v7 = vld [vmem:[%s12899_s2 + $0x48] sm:$0xf]  ;;  %v7920_v8 = vld [vmem:[%s12899_s2 + $0x54] sm:$0xf0]  ;;  %v5516_v14 = vor.u32 %v7956_v5, %v5515_v4  ;;  %v7938_v50 = vld [vmem:[%s12899_s2 + $0xec] sm:$0xf] }
  0x76   :  { %v5627_v12 = vld [vmem:[%s12899_s2 + $0x248] sm:$0xf]  ;;  %v7984_v13 = vld [vmem:[%s12899_s2 + $0x254] sm:$0xf0]  ;;  %v5372_v17 = vor.u32 %v7920_v8, %v5371_v7  ;;  %6114 = vmatmul.msk.bf16.vlgmr.msrb.gmra.mxu3 %vm1271_vm0, %v9145_v63  ;;  %v5453_v51 = vld [vmem:[%s12899_s2 + $0xf8] sm:$0xf0] }
  0x77   :  { %1499 = vmatpush.bf16.msra.mxu2 %v5788_v60  ;;  %1473 = vmatpush.bf16.msra.mxu3 %v5532_v0  ;;  %v5755_v15 = vld [vmem:[%s12899_s2 + $0x348] sm:$0xf]  ;;  %v8016_v16 = vld [vmem:[%s12899_s2 + $0x354] sm:$0xf0]  ;;  %v5628_v20 = vor.u32 %v7984_v13, %v5627_v12  ;;  %v7970_v62 = vld [vmem:[%s12899_s2 + $0x1ec] sm:$0xf]  ;;  %v5456_v2 = vor.u32 %v7938_v50, %v5453_v51 }
  0x78   :  { %1461 = vmatpush.bf16.msrb.mxu1 %v5388_v3  ;;  %v5499_v18 = vld [vmem:[%s12899_s2 + $0x148] sm:$0xf]  ;;  %v7952_v19 = vld [vmem:[%s12899_s2 + $0x154] sm:$0xf0]  ;;  %1487 = vmatpush.bf16.msrb.mxu0 %v5644_v6  ;;  %v5756_v23 = vor.u32 %v8016_v16, %v5755_v15  ;;  %v5581_v0 = vld [vmem:[%s12899_s2 + $0x1f8] sm:$0xf0] }
  0x79   :  { %v5355_v21 = vld [vmem:[%s12899_s2 + $0x28] sm:$0xf]  ;;  %v7916_v22 = vld [vmem:[%s12899_s2 + $0x34] sm:$0xf0]  ;;  %v5500_v26 = vor.u32 %v7952_v19, %v5499_v18  ;;  %v7934_v4 = vld [vmem:[%s12899_s2 + $0xcc] sm:$0xf]  ;;  %v5584_v7 = vor.u32 %v7970_v62, %v5581_v0 }
  0x7a   :  { %v5611_v24 = vld [vmem:[%s12899_s2 + $0x228] sm:$0xf]  ;;  %v7980_v25 = vld [vmem:[%s12899_s2 + $0x234] sm:$0xf0]  ;;  %v5356_v29 = vor.u32 %v7916_v22, %v5355_v21  ;;  %v5437_v5 = vld [vmem:[%s12899_s2 + $0xd8] sm:$0xf0] }
  0x7b   :  { %1500 = vmatpush.bf16.msra.mxu2 %v5772_v10  ;;  %1474 = vmatpush.bf16.msra.mxu3 %v5516_v14  ;;  %v5739_v27 = vld [vmem:[%s12899_s2 + $0x328] sm:$0xf]  ;;  %v8012_v28 = vld [vmem:[%s12899_s2 + $0x334] sm:$0xf0]  ;;  %v5612_v33 = vor.u32 %v7980_v25, %v5611_v24  ;;  %v7966_v14 = vld [vmem:[%s12899_s2 + $0x1cc] sm:$0xf]  ;;  %v5440_v16 = vor.u32 %v7934_v4, %v5437_v5 }
  0x7c   :  { %1462 = vmatpush.bf16.msrb.mxu1 %v5372_v17  ;;  %v5483_v30 = vld [vmem:[%s12899_s2 + $0x128] sm:$0xf]  ;;  %v7948_v31 = vld [vmem:[%s12899_s2 + $0x134] sm:$0xf0]  ;;  %1488 = vmatpush.bf16.msrb.mxu0 %v5628_v20  ;;  %v5740_v38 = vor.u32 %v8012_v28, %v5739_v27  ;;  %v5565_v15 = vld [vmem:[%s12899_s2 + $0x1d8] sm:$0xf0] }
  0x7d   :  { %v5339_v32 = vld [vmem:[%s12899_s2 + $0x8] sm:$0xf]  ;;  %v7912_v35 = vld [vmem:[%s12899_s2 + $0x14] sm:$0xf0]  ;;  %v5484_v44 = vor.u32 %v7948_v31, %v5483_v30  ;;  %v7930_v18 = vld [vmem:[%s12899_s2 + $0xac] sm:$0xf]  ;;  %v5568_v21 = vor.u32 %v7966_v14, %v5565_v15 }
  0x7e   :  { %v5963_v36 = vld [vmem:[%s12899_s2 + $0x4e8] sm:$0xf]  ;;  %v8068_v37 = vld [vmem:[%s12899_s2 + $0x4f4] sm:$0xf0]  ;;  %v5340_v48 = vor.u32 %v7912_v35, %v5339_v32  ;;  %v5421_v19 = vld [vmem:[%s12899_s2 + $0xb8] sm:$0xf0] }
  0x7f   :  { %1501 = vmatpush.bf16.msra.mxu2 %v5756_v23  ;;  %v5467_v40 = vld [vmem:[%s12899_s2 + $0x108] sm:$0xf]  ;;  %v7976_v42 = vld [vmem:[%s12899_s2 + $0x214] sm:$0xf0]  ;;  %1475 = vmatpush.bf16.msra.mxu3 %v5500_v26  ;;  %v5964_v52 = vor.u32 %v8068_v37, %v5963_v36  ;;  %v7962_v26 = vld [vmem:[%s12899_s2 + $0x1ac] sm:$0xf]  ;;  %v5424_v28 = vor.u32 %v7930_v18, %v5421_v19 }
  0x80   :  { %v5595_v41 = vld [vmem:[%s12899_s2 + $0x208] sm:$0xf]  ;;  %v8008_v45 = vld [vmem:[%s12899_s2 + $0x314] sm:$0xf0]  ;;  %1463 = vmatpush.bf16.msrb.mxu1 %v5356_v29  ;;  %1489 = vmatpush.bf16.msrb.mxu0 %v5612_v33  ;;  %v5549_v27 = vld [vmem:[%s12899_s2 + $0x1b8] sm:$0xf0] }
  0x81   :  { %v5723_v43 = vld [vmem:[%s12899_s2 + $0x308] sm:$0xf]  ;;  %v8104_v47 = vld [vmem:[%s12899_s2 + $0x614] sm:$0xf0]  ;;  %v5596_v53 = vor.u32 %v7976_v42, %v5595_v41  ;;  %v7926_v30 = vld [vmem:[%s12899_s2 + $0x8c] sm:$0xf]  ;;  %v5552_v33 = vor.u32 %v7962_v26, %v5549_v27 }
  0x82   :  { %v6107_v46 = vld [vmem:[%s12899_s2 + $0x608] sm:$0xf]  ;;  %v7944_v49 = vld [vmem:[%s12899_s2 + $0x114] sm:$0xf0]  ;;  %v5724_v59 = vor.u32 %v8008_v45, %v5723_v43  ;;  %v5405_v31 = vld [vmem:[%s12899_s2 + $0x98] sm:$0xf0] }
  0x83   :  { %v6091_v54 = vld [vmem:[%s12899_s2 + $0x5e8] sm:$0xf]  ;;  %v8100_v56 = vld [vmem:[%s12899_s2 + $0x5f4] sm:$0xf0]  ;;  %1502 = vmatpush.bf16.msra.mxu2 %v5740_v38  ;;  %v6108_v61 = vor.u32 %v8104_v47, %v6107_v46  ;;  %1476 = vmatpush.bf16.msra.mxu3 %v5484_v44  ;;  %v5468_v1 = vor.u32 %v7944_v49, %v5467_v40  ;;  %v7958_v40 = vld [vmem:[%s12899_s2 + $0x18c] sm:$0xf]  ;;  %v5408_v42 = vor.u32 %v7926_v30, %v5405_v31 }
  0x84   :  { %v5947_v58 = vld [vmem:[%s12899_s2 + $0x4c8] sm:$0xf]  ;;  %v8064_v60 = vld [vmem:[%s12899_s2 + $0x4d4] sm:$0xf0]  ;;  %1464 = vmatpush.bf16.msrb.mxu1 %v5340_v48  ;;  %v6092_v3 = vor.u32 %v8100_v56, %v6091_v54  ;;  %1490 = vmatpush.bf16.msrb.mxu0 %v5596_v53  ;;  %v5533_v41 = vld [vmem:[%s12899_s2 + $0x198] sm:$0xf0] }
  0x85   :  { %v5948_v6 = vor.u32 %v8064_v60, %v5947_v58  ;;  %v6075_v8 = vld [vmem:[%s12899_s2 + $0x5c8] sm:$0xf]  ;;  %v8096_v10 = vld [vmem:[%s12899_s2 + $0x5d4] sm:$0xf0]  ;;  %v7922_v44 = vld [vmem:[%s12899_s2 + $0x6c] sm:$0xf]  ;;  %v5536_v47 = vor.u32 %v7958_v40, %v5533_v41 }
  0x86   :  { %v5931_v12 = vld [vmem:[%s12899_s2 + $0x4a8] sm:$0xf]  ;;  %v8060_v13 = vld [vmem:[%s12899_s2 + $0x4b4] sm:$0xf0]  ;;  %v6076_v17 = vor.u32 %v8096_v10, %v6075_v8  ;;  %v5389_v45 = vld [vmem:[%s12899_s2 + $0x78] sm:$0xf0] }
  0x87   :  { %1503 = vmatpush.bf16.msra.mxu2 %v5724_v59  ;;  %1477 = vmatpush.bf16.msra.mxu3 %v5468_v1  ;;  %v5932_v20 = vor.u32 %v8060_v13, %v5931_v12  ;;  %v6059_v22 = vld [vmem:[%s12899_s2 + $0x5a8] sm:$0xf]  ;;  %v8092_v23 = vld [vmem:[%s12899_s2 + $0x5b4] sm:$0xf0]  ;;  %v5517_v53 = vld [vmem:[%s12899_s2 + $0x178] sm:$0xf0]  ;;  %v5392_v54 = vor.u32 %v7922_v44, %v5389_v45 }
  0x88   :  { %1509 = vmatpush.bf16.msra.mxu1 %v5964_v52  ;;  %1542 = vmatpush.bf16.msra.mxu0 %v6108_v61  ;;  %v5915_v24 = vld [vmem:[%s12899_s2 + $0x488] sm:$0xf]  ;;  %v8056_v25 = vld [vmem:[%s12899_s2 + $0x494] sm:$0xf0]  ;;  %v6060_v29 = vor.u32 %v8092_v23, %v6059_v22  ;;  %v7954_v52 = vld [vmem:[%s12899_s2 + $0x16c] sm:$0xf] }
  0x89   :  { %1491 = vmatmul.bf16.vlgmr.msrb.gmra.mxu0 %v9007_v55  ;;  %1465 = vmatmul.bf16.vlgmr.msrb.gmra.mxu1 %v9037_v9  ;;  %v5916_v32 = vor.u32 %v8056_v25, %v5915_v24  ;;  %v6043_v35 = vld [vmem:[%s12899_s2 + $0x588] sm:$0xf]  ;;  %v8088_v36 = vld [vmem:[%s12899_s2 + $0x594] sm:$0xf0]  ;;  %v7918_v58 = vld [vmem:[%s12899_s2 + $0x4c] sm:$0xf]  ;;  %v5520_v61 = vor.u32 %v7954_v52, %v5517_v53 }
  0x8a   :  { %1478 = vmatmul.bf16.vlgmr.msra.gmra.mxu3 %v9039_v11  ;;  %1504 = vmatmul.bf16.vlgmr.msra.gmra.mxu2 %v9009_v57  ;;  %v5899_v37 = vld [vmem:[%s12899_s2 + $0x468] sm:$0xf]  ;;  %v8052_v38 = vld [vmem:[%s12899_s2 + $0x474] sm:$0xf0]  ;;  %v6044_v43 = vor.u32 %v8088_v36, %v6043_v35  ;;  %v5373_v59 = vld [vmem:[%s12899_s2 + $0x58] sm:$0xf0] }
  0x8b   :  { %1548 = vmatpush.bf16.msrb.mxu2 %v5456_v2  ;;  %1522 = vmatpush.bf16.msrb.mxu3 %v6092_v3  ;;  %v5900_v46 = vor.u32 %v8052_v38, %v5899_v37  ;;  %v6027_v48 = vld [vmem:[%s12899_s2 + $0x568] sm:$0xf]  ;;  %v8084_v49 = vld [vmem:[%s12899_s2 + $0x574] sm:$0xf0]  ;;  %v7950_v3 = vld [vmem:[%s12899_s2 + $0x14c] sm:$0xf]  ;;  %v5376_v5 = vor.u32 %v7918_v58, %v5373_v59 }
  0x8c   :  { %1510 = vmatpush.bf16.msra.mxu1 %v5948_v6  ;;  %1561 = vmatpush.bf16.msrb.mxu0 %v5584_v7  ;;  %v5883_v50 = vld [vmem:[%s12899_s2 + $0x448] sm:$0xf]  ;;  %v8048_v51 = vld [vmem:[%s12899_s2 + $0x454] sm:$0xf0]  ;;  %v6028_v56 = vor.u32 %v8084_v49, %v6027_v48  ;;  %v5501_v4 = vld [vmem:[%s12899_s2 + $0x158] sm:$0xf0] }
  0x8d   :  { %v5884_v60 = vor.u32 %v8048_v51, %v5883_v50  ;;  %v6011_v62 = vld [vmem:[%s12899_s2 + $0x548] sm:$0xf]  ;;  %v8080_v0 = vld [vmem:[%s12899_s2 + $0x554] sm:$0xf0]  ;;  %v7914_v7 = vld [vmem:[%s12899_s2 + $0x2c] sm:$0xf]  ;;  %v5504_v12 = vor.u32 %v7950_v3, %v5501_v4 }
  0x8e   :  { %v5867_v1 = vld [vmem:[%s12899_s2 + $0x428] sm:$0xf]  ;;  %v8044_v2 = vld [vmem:[%s12899_s2 + $0x434] sm:$0xf0]  ;;  %v6012_v6 = vor.u32 %v8080_v0, %v6011_v62  ;;  %v5357_v8 = vld [vmem:[%s12899_s2 + $0x38] sm:$0xf0] }
  0x8f   :  { %1549 = vmatpush.bf16.msrb.mxu2 %v5440_v16  ;;  %1523 = vmatpush.bf16.msrb.mxu3 %v6076_v17  ;;  %v5868_v10 = vor.u32 %v8044_v2, %v5867_v1  ;;  %v5995_v13 = vld [vmem:[%s12899_s2 + $0x528] sm:$0xf]  ;;  %v8076_v14 = vld [vmem:[%s12899_s2 + $0x534] sm:$0xf0]  ;;  %v7946_v17 = vld [vmem:[%s12899_s2 + $0x12c] sm:$0xf]  ;;  %v5360_v19 = vor.u32 %v7914_v7, %v5357_v8 }
  0x90   :  { %1511 = vmatpush.bf16.msra.mxu1 %v5932_v20  ;;  %1562 = vmatpush.bf16.msrb.mxu0 %v5568_v21  ;;  %v5851_v15 = vld [vmem:[%s12899_s2 + $0x408] sm:$0xf]  ;;  %v8040_v16 = vld [vmem:[%s12899_s2 + $0x414] sm:$0xf0]  ;;  %v5485_v18 = vld [vmem:[%s12899_s2 + $0x138] sm:$0xf0]  ;;  %v5996_v22 = vor.u32 %v8076_v14, %v5995_v13 }
  0x91   :  { %v8002_v20 = vld [vmem:[%s12899_s2 + $0x2ec] sm:$0xf]  ;;  %v5709_v21 = vld [vmem:[%s12899_s2 + $0x2f8] sm:$0xf0]  ;;  %v5979_v23 = vld [vmem:[%s12899_s2 + $0x508] sm:$0xf]  ;;  %v5852_v26 = vor.u32 %v8040_v16, %v5851_v15  ;;  %v5488_v27 = vor.u32 %v7946_v17, %v5485_v18 }
  0x92   :  { %v7910_v24 = vld [vmem:[%s12899_s2 + $0xc] sm:$0xf]  ;;  %v5341_v25 = vld [vmem:[%s12899_s2 + $0x18] sm:$0xf0]  ;;  %v5712_v31 = vor.u32 %v8002_v20, %v5709_v21  ;;  %vm3137_vm1 = vcmask 158720   ;;  %s8677_s0 = smov [#allocation5]  }
  0x93   :  { %1550 = vmatpush.bf16.msrb.mxu2 %v5424_v28  ;;  %1524 = vmatpush.bf16.msrb.mxu3 %v6060_v29  ;;  %v8072_v28 = vld [vmem:[%s12899_s2 + $0x514] sm:$0xf0]  ;;  %v8034_v29 = vld [vmem:[%s12899_s2 + $0x3ec] sm:$0xf]  ;;  %v5837_v30 = vld [vmem:[%s12899_s2 + $0x3f8] sm:$0xf0]  ;;  %v5344_v36 = vor.u32 %v7910_v24, %v5341_v25 }
  0x94   :  { %1512 = vmatpush.bf16.msra.mxu1 %v5916_v32  ;;  %1563 = vmatpush.bf16.msrb.mxu0 %v5552_v33  ;;  %v8066_v32 = vld [vmem:[%s12899_s2 + $0x4ec] sm:$0xf]  ;;  %v5965_v33 = vld [vmem:[%s12899_s2 + $0x4f8] sm:$0xf0]  ;;  %v5980_v41 = vor.u32 %v8072_v28, %v5979_v23  ;;  %v5840_v44 = vor.u32 %v8034_v29, %v5837_v30  ;;  %s5282_s20 = sshll.u32 %s8677_s0, 4  ;;  %s5295_s22 = sshll.u32 %s12911_s14, 4  ;;  %s5283_s20 = int_to_ptr.vmem [resolvable:$true] %s5282_s20  ;;  %s5296_s22 = int_to_ptr.hbm [resolvable:$true] %s5295_s22 }
  0x95   :  { %v7998_v35 = vld [vmem:[%s12899_s2 + $0x2cc] sm:$0xf]  ;;  %v5693_v37 = vld [vmem:[%s12899_s2 + $0x2d8] sm:$0xf0]  ;;  %v5968_v45 = vor.u32 %v8066_v32, %v5965_v33  ;;  %s5306_s24 = sshll.u32 %s12912_s15, 4  ;;  %vm5238_vm2 = vcmask 1041408   ;;  %s5307_s24 = int_to_ptr.hbm [resolvable:$true] %s5306_s24 }
  0x96   :  { %v7942_v38 = vld [vmem:[%s12899_s2 + $0x10c] sm:$0xf]  ;;  %v5469_v40 = vld [vmem:[%s12899_s2 + $0x118] sm:$0xf0]  ;;  %vm5242_vm3 = vcmask 1045508   ;;  %vm5246_vm4 = vcmask 1043456  }
  0x97   :  { %1551 = vmatpush.bf16.msrb.mxu2 %v5408_v42  ;;  %1525 = vmatpush.bf16.msrb.mxu3 %v6044_v43  ;;  %v8098_v42 = vld [vmem:[%s12899_s2 + $0x5ec] sm:$0xf]  ;;  %v6093_v43 = vld [vmem:[%s12899_s2 + $0x5f8] sm:$0xf0]  ;;  %v5472_v48 = vor.u32 %v7942_v38, %v5469_v40  ;;  %vm5258_vm5 = vcmask 1043458   ;;  %vm5260_vm7 = vcmask 128004  }
  0x98   :  { %1513 = vmatpush.bf16.msra.mxu1 %v5900_v46  ;;  %1564 = vmatpush.bf16.msrb.mxu0 %v5536_v47  ;;  %v8030_v46 = vld [vmem:[%s12899_s2 + $0x3cc] sm:$0xf]  ;;  %v5696_v47 = vor.u32 %v7998_v35, %v5693_v37  ;;  %v5821_v49 = vld [vmem:[%s12899_s2 + $0x3d8] sm:$0xf0]  ;;  %v6096_v52 = vor.u32 %v8098_v42, %v6093_v43  ;;  %vm5259_vm6 = vmor %vm5258_vm5, %vm5238_vm2  ;;  %s8680_s14 = smov [#allocation3]   ;;  %s5273_s26 = sshll.u32 %s12909_s12, 4  ;;  %s5274_s26 = int_to_ptr.hbm [resolvable:$true] %s5273_s26 }
  0x99   :  { %6115 = vmatmul.msk.bf16.vlgmr.msra.gmra.mxu0 %vm1271_vm0, %v9145_v63  ;;  %v8062_v50 = vld [vmem:[%s12899_s2 + $0x4cc] sm:$0xf]  ;;  %v5949_v51 = vld [vmem:[%s12899_s2 + $0x4d8] sm:$0xf0]  ;;  %v5824_v59 = vor.u32 %v8030_v46, %v5821_v49  ;;  %s5271_s15 = sshll.u32 %s8680_s14, 4  ;;  %vm5261_vm8 = vmor %vm5260_vm7, %vm5259_vm6  ;;  %s5272_s15 = int_to_ptr.vmem [resolvable:$true] %s5271_s15 }
  0x9a   :  { %v7994_v53 = vld [vmem:[%s12899_s2 + $0x2ac] sm:$0xf]  ;;  %v6077_v58 = vld [vmem:[%s12899_s2 + $0x5d8] sm:$0xf0] }
  0x9b   :  { %1552 = vmatpush.bf16.msrb.mxu2 %v5392_v54  ;;  %1526 = vmatpush.bf16.msrb.mxu3 %v6028_v56  ;;  %v5677_v54 = vld [vmem:[%s12899_s2 + $0x2b8] sm:$0xf0]  ;;  %v8094_v56 = vld [vmem:[%s12899_s2 + $0x5cc] sm:$0xf] }
  0x9c   :  { %1514 = vmatpush.bf16.msra.mxu1 %v5884_v60  ;;  %1565 = vmatpush.bf16.msrb.mxu0 %v5520_v61  ;;  %v5952_v60 = vor.u32 %v8062_v50, %v5949_v51  ;;  %v8026_v61 = vld [vmem:[%s12899_s2 + $0x3ac] sm:$0xf]  ;;  %v5680_v62 = vor.u32 %v7994_v53, %v5677_v54  ;;  %v5805_v0 = vld [vmem:[%s12899_s2 + $0x3b8] sm:$0xf0]  ;;  %v6080_v3 = vor.u32 %v8094_v56, %v6077_v58 }
  0x9d   :  { %v8058_v1 = vld [vmem:[%s12899_s2 + $0x4ac] sm:$0xf]  ;;  %v5933_v2 = vld [vmem:[%s12899_s2 + $0x4b8] sm:$0xf0]  ;;  %v5808_v8 = vor.u32 %v8026_v61, %v5805_v0 }
  0x9e   :  { %v7990_v4 = vld [vmem:[%s12899_s2 + $0x28c] sm:$0xf]  ;;  %v6061_v7 = vld [vmem:[%s12899_s2 + $0x5b8] sm:$0xf0] }
  0x9f   :  { %1553 = vmatpush.bf16.msrb.mxu2 %v5376_v5  ;;  %1527 = vmatpush.bf16.msrb.mxu3 %v6012_v6  ;;  %v5661_v5 = vld [vmem:[%s12899_s2 + $0x298] sm:$0xf0]  ;;  %v8090_v6 = vld [vmem:[%s12899_s2 + $0x5ac] sm:$0xf] }
  0xa0   :  { %1515 = vmatpush.bf16.msra.mxu1 %v5868_v10  ;;  %1566 = vmatpush.bf16.msrb.mxu0 %v5504_v12  ;;  %v5936_v10 = vor.u32 %v8058_v1, %v5933_v2  ;;  %v8022_v12 = vld [vmem:[%s12899_s2 + $0x38c] sm:$0xf]  ;;  %v5664_v13 = vor.u32 %v7990_v4, %v5661_v5  ;;  %v5917_v15 = vld [vmem:[%s12899_s2 + $0x498] sm:$0xf0]  ;;  %v6064_v16 = vor.u32 %v8090_v6, %v6061_v7  ;;  %v9982_v5 = vld [vmem:[%s12900_s3] sm:$0xf] }
  0xa1   :  { %v8054_v14 = vld [vmem:[%s12899_s2 + $0x48c] sm:$0xf]  ;;  %v5645_v18 = vld [vmem:[%s12899_s2 + $0x278] sm:$0xf0] }
  0xa2   :  { %v7986_v17 = vld [vmem:[%s12899_s2 + $0x26c] sm:$0xf]  ;;  %v6045_v20 = vld [vmem:[%s12899_s2 + $0x598] sm:$0xf0]  ;;  %v5920_v21 = vor.u32 %v8054_v14, %v5917_v15 }
  0xa3   :  { %1554 = vmatpush.bf16.msrb.mxu2 %v5360_v19  ;;  %1528 = vmatpush.bf16.msrb.mxu3 %v5996_v22  ;;  %v8086_v19 = vld [vmem:[%s12899_s2 + $0x58c] sm:$0xf]  ;;  %v5648_v23 = vor.u32 %v7986_v17, %v5645_v18  ;;  %v5773_v24 = vld [vmem:[%s12899_s2 + $0x378] sm:$0xf0]  ;;  %v6231_v17 = vld [vmem:[%s12901_s4 + $0xe0] sm:$0xf] }
  0xa4   :  { %1516 = vmatpush.bf16.msra.mxu1 %v5852_v26  ;;  %1567 = vmatpush.bf16.msrb.mxu0 %v5488_v27  ;;  %v8018_v22 = vld [vmem:[%s12899_s2 + $0x36c] sm:$0xf]  ;;  %v5901_v26 = vld [vmem:[%s12899_s2 + $0x478] sm:$0xf0]  ;;  %v6048_v28 = vor.u32 %v8086_v19, %v6045_v20  ;;  %v8135_v18 = vld [vmem:[%s12901_s4 + $0xec] sm:$0xf0] }
  0xa5   :  { %v8050_v25 = vld [vmem:[%s12899_s2 + $0x46c] sm:$0xf]  ;;  %v6029_v33 = vld [vmem:[%s12899_s2 + $0x578] sm:$0xf0] }
  0xa6   :  { %v7982_v30 = vld [vmem:[%s12899_s2 + $0x24c] sm:$0xf]  ;;  %v5904_v37 = vor.u32 %v8050_v25, %v5901_v26  ;;  %v5757_v42 = vld [vmem:[%s12899_s2 + $0x358] sm:$0xf0]  ;;  %v6232_v26 = vor.u32 %v8135_v18, %v6231_v17 }
  0xa7   :  { %1555 = vmatpush.bf16.msrb.mxu2 %v5344_v36  ;;  %1517 = vmatmul.bf16.vlgmr.msra.gmra.mxu1 %v9206_v34  ;;  %v8082_v32 = vld [vmem:[%s12899_s2 + $0x56c] sm:$0xf]  ;;  %v5776_v36 = vor.u32 %v8018_v22, %v5773_v24  ;;  %v6013_v49 = vld [vmem:[%s12899_s2 + $0x558] sm:$0xf0]  ;;  %v8167_v22 = vld [vmem:[%s12901_s4 + $0x1ec] sm:$0xf0] }
  0xa8   :  { %1574 = vmatpush.bf16.msrb.mxu1 %v5712_v31  ;;  %1529 = vmatpush.bf16.msrb.mxu3 %v5980_v41  ;;  %v5629_v31 = vld [vmem:[%s12899_s2 + $0x258] sm:$0xf0]  ;;  %v8014_v38 = vld [vmem:[%s12899_s2 + $0x34c] sm:$0xf] }
  0xa9   :  { %1568 = vmatpush.bf16.msrb.mxu0 %v5472_v48  ;;  %v5632_v40 = vor.u32 %v7982_v30, %v5629_v31  ;;  %v8046_v43 = vld [vmem:[%s12899_s2 + $0x44c] sm:$0xf]  ;;  %v5760_v50 = vor.u32 %v8014_v38, %v5757_v42  ;;  %v5741_v54 = vld [vmem:[%s12899_s2 + $0x338] sm:$0xf0]  ;;  %v6215_v30 = vld [vmem:[%s12901_s4 + $0xc0] sm:$0xf] }
  0xaa   :  { %1556 = vmatmul.bf16.vlgmr.msrb.gmra.mxu2 %v9037_v9  ;;  %v5789_v9 = vld [vmem:[%s12899_s2 + $0x398] sm:$0xf0]  ;;  %v7978_v46 = vld [vmem:[%s12899_s2 + $0x22c] sm:$0xf]  ;;  %v8131_v31 = vld [vmem:[%s12901_s4 + $0xcc] sm:$0xf0] }
  0xab   :  { %1600 = vmatpush.bf16.msra.mxu2 %v5968_v45  ;;  %1530 = vmatmul.bf16.vlgmr.msrb.gmra.mxu3 %v9217_v39  ;;  %v9926_v41 = vpop.f32.mrf.mxu3  ;;  %v6032_v45 = vor.u32 %v8082_v32, %v6029_v33  ;;  %v8078_v48 = vld [vmem:[%s12899_s2 + $0x54c] sm:$0xf]  ;;  %v5869_v58 = vld [vmem:[%s12899_s2 + $0x438] sm:$0xf0]  ;;  %v6343_v33 = vld [vmem:[%s12901_s4 + $0x1c0] sm:$0xf]  ;;  %v6216_v38 = vor.u32 %v8131_v31, %v6215_v30 }
  0xac   :  { %1587 = vmatpush.bf16.msra.mxu3 %v5840_v44  ;;  %1575 = vmatpush.bf16.msrb.mxu1 %v5696_v47  ;;  %v5885_v44 = vld [vmem:[%s12899_s2 + $0x458] sm:$0xf0]  ;;  %v8042_v56 = vld [vmem:[%s12899_s2 + $0x42c] sm:$0xf]  ;;  %v8127_v42 = vld [vmem:[%s12901_s4 + $0xac] sm:$0xf0] }
  0xad   :  { %1613 = vmatpush.bf16.msra.mxu0 %v6096_v52  ;;  %v9905_v27 = vpop.f32.mrf.mxu0  ;;  %v9907_v29 = vpop.f32.mrf.mxu1  ;;  %v5613_v47 = vld [vmem:[%s12899_s2 + $0x238] sm:$0xf0]  ;;  %v5888_v51 = vor.u32 %v8046_v43, %v5885_v44  ;;  %v8010_v52 = vld [vmem:[%s12899_s2 + $0x32c] sm:$0xf]  ;;  %v6361_v30 = vld [vmem:[%s12901_s4 + $0x1f0] sm:$0xf0] }
  0xae   :  { %1569 = vmatmul.bf16.vlgmr.msrb.gmra.mxu0 %v9039_v11  ;;  %v5792_v11 = vor.u32 %v8022_v12, %v5789_v9  ;;  %v9921_v35 = vpop.f32.mrf.mxu2  ;;  %v5616_v53 = vor.u32 %v7978_v46, %v5613_v47  ;;  %v5597_v61 = vld [vmem:[%s12899_s2 + $0x218] sm:$0xf0]  ;;  %v5744_v7 = vor.u32 %v8010_v52, %v5741_v54  ;;  %v8038_v9 = vld [vmem:[%s12899_s2 + $0x40c] sm:$0xf]  ;;  %v8123_v47 = vld [vmem:[%s12901_s4 + $0x8c] sm:$0xf0] }
  0xaf   :  { %1601 = vmatpush.bf16.msra.mxu2 %v5952_v60  ;;  %v7974_v60 = vld [vmem:[%s12899_s2 + $0x20c] sm:$0xf]  ;;  %v5997_v2 = vld [vmem:[%s12899_s2 + $0x538] sm:$0xf0]  ;;  %v6167_v52 = vld [vmem:[%s12901_s4 + $0x60] sm:$0xf] }
  0xb0   :  { %1588 = vmatpush.bf16.msra.mxu3 %v5824_v59  ;;  %1576 = vmatpush.bf16.msrb.mxu1 %v5680_v62  ;;  %v6016_v59 = vor.u32 %v8078_v48, %v6013_v49  ;;  %v8074_v62 = vld [vmem:[%s12899_s2 + $0x52c] sm:$0xf]  ;;  %v6109_v4 = vld [vmem:[%s12899_s2 + $0x618] sm:$0xf0]  ;;  %v5600_v12 = vor.u32 %v7974_v60, %v5597_v61 }
  0xb1   :  { %1614 = vmatpush.bf16.msra.mxu0 %v6080_v3  ;;  %v8102_v3 = vld [vmem:[%s12899_s2 + $0x60c] sm:$0xf]  ;;  %v5853_v14 = vld [vmem:[%s12899_s2 + $0x418] sm:$0xf0] }
  0xb2   :  { %v8070_v19 = vld [vmem:[%s12899_s2 + $0x50c] sm:$0xf]  ;;  %v6112_v20 = vor.u32 %v8102_v3, %v6109_v4  ;;  %v5856_v25 = vor.u32 %v8038_v9, %v5853_v14  ;;  %v8147_v3 = vld [vmem:[%s12901_s4 + $0x14c] sm:$0xf0]  ;;  %v6263_v9 = vld [vmem:[%s12901_s4 + $0x120] sm:$0xf] }
  0xb3   :  { %1602 = vmatpush.bf16.msra.mxu2 %v5936_v10  ;;  %v8006_v10 = vld [vmem:[%s12899_s2 + $0x30c] sm:$0xf]  ;;  %v1325_v15 = vpop.f32.mrf.mxu3 }
  0xb4   :  { %1589 = vmatpush.bf16.msra.mxu3 %v5808_v8  ;;  %1577 = vmatpush.bf16.msrb.mxu1 %v5664_v13  ;;  %v5872_v8 = vor.u32 %v8042_v56, %v5869_v58  ;;  %v5725_v13 = vld [vmem:[%s12899_s2 + $0x318] sm:$0xf0]  ;;  %v6295_v56 = vld [vmem:[%s12901_s4 + $0x160] sm:$0xf] }
  0xb5   :  { %1615 = vmatpush.bf16.msra.mxu0 %v6064_v16  ;;  %v1286_v0 = vpop.f32.mrf.mxu0  ;;  %v1299_v1 = vpop.f32.mrf.mxu1  ;;  %v6000_v16 = vor.u32 %v8074_v62, %v5997_v2  ;;  %v5728_v24 = vor.u32 %v8006_v10, %v5725_v13  ;;  %v6151_v62 = vld [vmem:[%s12901_s4 + $0x40] sm:$0xf] }
  0xb6   :  { %v1312_v6 = vpop.f32.mrf.mxu2  ;;  %v8115_v0 = vld [vmem:[%s12901_s4 + $0x4c] sm:$0xf0]  ;;  %v6135_v10 = vld [vmem:[%s12901_s4 + $0x20] sm:$0xf] }
  0xb7   :  { %1603 = vmatpush.bf16.msra.mxu2 %v5920_v21  ;;  %v6359_v21 = vld [vmem:[%s12901_s4 + $0x1e0] sm:$0xf] }
  0xb8   :  { %1590 = vmatpush.bf16.msra.mxu3 %v5792_v11  ;;  %1578 = vmatpush.bf16.msrb.mxu1 %v5648_v23  ;;  %v5981_v11 = vld [vmem:[%s12899_s2 + $0x518] sm:$0xf0]  ;;  %v283_v23 = vperm.slane %v9982_v5, 0  ;;  %v6360_v32 = vor.u32 %v8167_v22, %v6359_v21  ;;  %v6119_v15 = vld [vmem:[%s12901_s4] sm:$0xf]  ;;  %s5284_s2 = sshll.u32 %s12910_s13, 4  ;;  %s5285_s2 = int_to_ptr.hbm [resolvable:$true] %s5284_s2 }
  0xb9   :  { %1616 = vmatpush.bf16.msra.mxu0 %v6048_v28  ;;  %v5984_v28 = vor.u32 %v8070_v19, %v5981_v11  ;;  %v8133_v19 = vld [vmem:[%s12901_s4 + $0xe4] sm:$0xf]  ;;  %v6487_v11 = vld [vmem:[%s12901_s4 + $0x2e0] sm:$0xf]  ;;  %v8199_v21 = vld [vmem:[%s12901_s4 + $0x2ec] sm:$0xf0] }
  0xbb   :  { %1604 = vmatpush.bf16.msra.mxu2 %v5904_v37  ;;  %v1285_v37 = vadd.f32 %v9905_v27, %v283_v23  ;;  %v8159_v27 = vld [vmem:[%s12901_s4 + $0x1ac] sm:$0xf0]  ;;  %v6233_v23 = vld [vmem:[%s12901_s4 + $0xf0] sm:$0xf0] }
  0xbc   :  { %1591 = vmatpush.bf16.msra.mxu3 %v5776_v36  ;;  %1579 = vmatpush.bf16.msrb.mxu1 %v5632_v40  ;;  %v8163_v36 = vld [vmem:[%s12901_s4 + $0x1cc] sm:$0xf0]  ;;  %v6199_v40 = vld [vmem:[%s12901_s4 + $0xa0] sm:$0xf] }
  0xbd   :  { %1617 = vmatpush.bf16.msra.mxu0 %v6032_v45  ;;  %v6344_v43 = vor.u32 %v8163_v36, %v6343_v33  ;;  %v1298_v44 = vadd.f32 %v9907_v29, %v1285_v37  ;;  %v6200_v46 = vor.u32 %v8127_v42, %v6199_v40  ;;  %v6236_v33 = vor.u32 %v8133_v19, %v6233_v23  ;;  %v6471_v37 = vld [vmem:[%s12901_s4 + $0x2c0] sm:$0xf]  ;;  %v8129_v40 = vld [vmem:[%s12901_s4 + $0xc4] sm:$0xf]  ;;  %v6217_v42 = vld [vmem:[%s12901_s4 + $0xd0] sm:$0xf0] }
  0xbe   :  { %v1362_v45 = vpop.f32.mrf.mxu2 }
  0xbf   :  { %1605 = vmatpush.bf16.msra.mxu2 %v5888_v51  ;;  %v1311_v29 = vadd.f32 %v9921_v35, %v1298_v44  ;;  %v8151_v35 = vld [vmem:[%s12901_s4 + $0x16c] sm:$0xf0]  ;;  %v6345_v44 = vld [vmem:[%s12901_s4 + $0x1d0] sm:$0xf0] }
  0xc0   :  { %1592 = vmatpush.bf16.msra.mxu3 %v5760_v50  ;;  %1580 = vmatpush.bf16.msrb.mxu1 %v5616_v53  ;;  %v8119_v53 = vld [vmem:[%s12901_s4 + $0x6c] sm:$0xf0]  ;;  %v6296_v1 = vor.u32 %v8151_v35, %v6295_v56  ;;  %v8121_v56 = vld [vmem:[%s12901_s4 + $0x84] sm:$0xf]  ;;  %v6185_v35 = vld [vmem:[%s12901_s4 + $0x90] sm:$0xf0] }
  0xc1   :  { %1618 = vmatpush.bf16.msra.mxu0 %v6016_v59  ;;  %v1336_v49 = vpop.f32.mrf.mxu0  ;;  %v1349_v50 = vpop.f32.mrf.mxu1  ;;  %v1324_v58 = vadd.f32 %v9926_v41, %v1311_v29  ;;  %v6168_v60 = vor.u32 %v8119_v53, %v6167_v52  ;;  %v6279_v41 = vld [vmem:[%s12901_s4 + $0x140] sm:$0xf] }
  0xc2   :  { %v6280_v13 = vor.u32 %v8147_v3, %v6279_v41  ;;  %v6439_v53 = vld [vmem:[%s12901_s4 + $0x280] sm:$0xf]  ;;  %v8183_v41 = vld [vmem:[%s12901_s4 + $0x26c] sm:$0xf0]  ;;  %v284_v3 = vperm.slane %v9982_v5, 1 }
  0xc3   :  { %1606 = vmatpush.bf16.msra.mxu2 %v5872_v8  ;;  %v1337_v61 = vadd.f32 %v1336_v49, %v1324_v58  ;;  %v8125_v49 = vld [vmem:[%s12901_s4 + $0xa4] sm:$0xf] }
  0xc4   :  { %1593 = vmatpush.bf16.msra.mxu3 %v5744_v7  ;;  %1581 = vmatpush.bf16.msrb.mxu1 %v5600_v12  ;;  %v6152_v7 = vor.u32 %v8115_v0, %v6151_v62  ;;  %v8111_v12 = vld [vmem:[%s12901_s4 + $0x2c] sm:$0xf0]  ;;  %v6188_v0 = vor.u32 %v8121_v56, %v6185_v35  ;;  %v6223_v35 = vld [vmem:[%s12901_s4 + $0xc8] sm:$0xf] }
  0xc5   :  { %1619 = vmatpush.bf16.msra.mxu0 %v6000_v16  ;;  %v1350_v8 = vadd.f32 %v1349_v50, %v1337_v61  ;;  %v6136_v14 = vor.u32 %v8111_v12, %v6135_v10  ;;  %v8107_v16 = vld [vmem:[%s12901_s4 + $0xc] sm:$0xf0]  ;;  %v8157_v50 = vld [vmem:[%s12901_s4 + $0x1a4] sm:$0xf]  ;;  %v6313_v61 = vld [vmem:[%s12901_s4 + $0x190] sm:$0xf0] }
  0xc6   :  { %v1364_v59 = vpop.f32.mrf.mxu2  ;;  %v6120_v31 = vor.u32 %v8107_v16, %v6119_v15  ;;  %v8149_v12 = vld [vmem:[%s12901_s4 + $0x164] sm:$0xf] }
  0xc7   :  { %1582 = vmatmul.bf16.vlgmr.msrb.gmra.mxu1 %v9007_v55  ;;  %1607 = vmatpush.bf16.msra.mxu2 %v5856_v25  ;;  %v6327_v55 = vld [vmem:[%s12901_s4 + $0x1a0] sm:$0xf]  ;;  %v1363_v18 = vadd.f32 %v1362_v45, %v1350_v8  ;;  %v8139_v25 = vld [vmem:[%s12901_s4 + $0x10c] sm:$0xf0]  ;;  %v8113_v16 = vld [vmem:[%s12901_s4 + $0x44] sm:$0xf] }
  0xc8   :  { %1633 = vmatpush.bf16.msra.mxu1 %v6112_v20  ;;  %1594 = vmatpush.bf16.msra.mxu3 %v5728_v24  ;;  %v6328_v48 = vor.u32 %v8159_v27, %v6327_v55  ;;  %v6247_v24 = vld [vmem:[%s12901_s4 + $0x100] sm:$0xf]  ;;  %v8161_v27 = vld [vmem:[%s12901_s4 + $0x1c4] sm:$0xf] }
  0xc9   :  { %1620 = vmatpush.bf16.msra.mxu0 %v5984_v28  ;;  %v10077_v2 = vpop.f32.mrf.mxu3  ;;  %v1338_v4 = vpop.f32.mrf.mxu0  ;;  %v8165_v28 = vld [vmem:[%s12901_s4 + $0x1e4] sm:$0xf]  ;;  %v6248_v36 = vor.u32 %v8139_v25, %v6247_v24  ;;  %v6391_v25 = vld [vmem:[%s12901_s4 + $0x220] sm:$0xf] }
  0xca   :  { %1608 = vmatmul.bf16.vlgmr.msra.gmra.mxu2 %v9206_v34  ;;  %v6311_v34 = vld [vmem:[%s12901_s4 + $0x180] sm:$0xf]  ;;  %v1351_v6 = vpop.f32.mrf.mxu1  ;;  %v1376_v15 = vadd.f32 %v10077_v2, %v284_v3  ;;  %v6281_v2 = vld [vmem:[%s12901_s4 + $0x150] sm:$0xf0] }
  0xcb   :  { %1595 = vmatmul.bf16.vlgmr.msra.gmra.mxu3 %v9009_v57  ;;  %v6183_v57 = vld [vmem:[%s12901_s4 + $0x80] sm:$0xf]  ;;  %v8117_v6 = vld [vmem:[%s12901_s4 + $0x64] sm:$0xf] }
  0xcc   :  { %2425 = vmatpush.bf16.msrb.mxu3 %v6232_v26  ;;  %2438 = vmatpush.bf16.msrb.mxu1 %v6360_v32  ;;  %v6184_v51 = vor.u32 %v8123_v47, %v6183_v57  ;;  %v6488_v26 = vor.u32 %v8199_v21, %v6487_v11  ;;  %v1639_v32 = vmax.f32 %v1363_v18, 0.0  ;;  %v6220_v57 = vor.u32 %v8129_v40, %v6217_v42  ;;  %v6455_v47 = vld [vmem:[%s12901_s4 + $0x2a0] sm:$0xf]  ;;  %v6153_v18 = vld [vmem:[%s12901_s4 + $0x50] sm:$0xf0] }
  0xcd   :  { %1621 = vmatmul.bf16.vlgmr.msra.gmra.mxu0 %v9217_v39  ;;  %v8155_v39 = vld [vmem:[%s12901_s4 + $0x18c] sm:$0xf0]  ;;  %v8145_v21 = vld [vmem:[%s12901_s4 + $0x144] sm:$0xf]  ;;  %v6156_v24 = vor.u32 %v8113_v16, %v6153_v18  ;;  %v8168_v16 = vld [vmem:[%s12901_s4 + $0x1f4] sm:$0xf0] }
  0xce   :  { %v6312_v54 = vor.u32 %v8155_v39, %v6311_v34  ;;  %v10105_v17 = vpop.f32.mrf.mxu2  ;;  %2451 = vmatpush.bf16.msrb.mxu2 %v6488_v26  ;;  %v6201_v34 = vld [vmem:[%s12901_s4 + $0xb0] sm:$0xf0]  ;;  %v6348_v39 = vor.u32 %v8161_v27, %v6345_v44  ;;  %v8175_v26 = vld [vmem:[%s12901_s4 + $0x22c] sm:$0xf0]  ;;  %v8105_v40 = vld [vmem:[%s12901_s4 + $0x4] sm:$0xf] }
  0xcf   :  { %v6204_v52 = vor.u32 %v8125_v49, %v6201_v34  ;;  %v8171_v27 = vld [vmem:[%s12901_s4 + $0x20c] sm:$0xf0]  ;;  %v6239_v44 = vld [vmem:[%s12901_s4 + $0xe8] sm:$0xf]  ;;  %v8136_v34 = vld [vmem:[%s12901_s4 + $0xf4] sm:$0xf0] }
  0xd0   :  { %2426 = vmatpush.bf16.msrb.mxu3 %v6216_v38  ;;  %2439 = vmatpush.bf16.msrb.mxu1 %v6344_v43  ;;  %v8195_v38 = vld [vmem:[%s12901_s4 + $0x2cc] sm:$0xf0]  ;;  %v6364_v43 = vor.u32 %v8165_v28, %v6361_v30  ;;  %v1389_v28 = vadd.f32 %v10105_v17, %v1376_v15  ;;  %v8109_v30 = vld [vmem:[%s12901_s4 + $0x24] sm:$0xf]  ;;  %v6265_v17 = vld [vmem:[%s12901_s4 + $0x130] sm:$0xf0]  ;;  %v6240_v56 = vor.u32 %v8136_v34, %v6239_v44 }
  0xd1   :  { %v1377_v22 = vpop.f32.mrf.mxu3  ;;  %v6472_v55 = vor.u32 %v8195_v38, %v6471_v37  ;;  %v8141_v37 = vld [vmem:[%s12901_s4 + $0x124] sm:$0xf]  ;;  %v6367_v15 = vld [vmem:[%s12901_s4 + $0x1e8] sm:$0xf]  ;;  %v8219_v44 = vld [vmem:[%s12901_s4 + $0x38c] sm:$0xf0] }
  0xd2   :  { %v6159_v34 = vld [vmem:[%s12901_s4 + $0x48] sm:$0xf] }
  0xd3   :  { %2452 = vmatpush.bf16.msrb.mxu2 %v6472_v55  ;;  %v6375_v55 = vld [vmem:[%s12901_s4 + $0x200] sm:$0xf] }
  0xd4   :  { %2427 = vmatpush.bf16.msrb.mxu3 %v6200_v46  ;;  %2440 = vmatpush.bf16.msrb.mxu1 %v6328_v48  ;;  %v10149_v46 = vpack.c.bf16 %v1639_v32, %v1639_v32  ;;  %v8191_v48 = vld [vmem:[%s12901_s4 + $0x2ac] sm:$0xf0]  ;;  %v6284_v32 = vor.u32 %v8145_v21, %v6281_v2  ;;  %v8124_v21 = vld [vmem:[%s12901_s4 + $0x94] sm:$0xf0]  ;;  %v8185_v2 = vld [vmem:[%s12901_s4 + $0x284] sm:$0xf] }
  0xd5   :  { %v6456_v29 = vor.u32 %v8191_v48, %v6455_v47  ;;  %v8197_v47 = vld [vmem:[%s12901_s4 + $0x2e4] sm:$0xf]  ;;  %v6489_v48 = vld [vmem:[%s12901_s4 + $0x2f0] sm:$0xf0] }
  0xd6   :  { %v1390_v45 = vpop.f32.mrf.mxu2 }
  0xd7   :  { %6116 = vmatmul.msk.bf16.vlgmr.msra.gmra.mxu1 %vm1271_vm0, %v9145_v63  ;;  %v8143_v63 = vld [vmem:[%s12901_s4 + $0x12c] sm:$0xf0]  ;;  %2453 = vmatpush.bf16.msrb.mxu2 %v6456_v29  ;;  %v6268_v45 = vor.u32 %v8141_v37, %v6265_v17  ;;  %v6249_v29 = vld [vmem:[%s12901_s4 + $0x110] sm:$0xf0]  ;;  %v8181_v37 = vld [vmem:[%s12901_s4 + $0x264] sm:$0xf] }
  0xd8   :  { %2428 = vmatpush.bf16.msrb.mxu3 %v6184_v51  ;;  %2441 = vmatpush.bf16.msrb.mxu1 %v6312_v54  ;;  %v6264_v20 = vor.u32 %v8143_v63, %v6263_v9  ;;  %v6329_v51 = vld [vmem:[%s12901_s4 + $0x1b0] sm:$0xf0]  ;;  %v8187_v54 = vld [vmem:[%s12901_s4 + $0x28c] sm:$0xf0]  ;;  %v6407_v63 = vld [vmem:[%s12901_s4 + $0x240] sm:$0xf] }
  0xd9   :  { %v6332_v58 = vor.u32 %v8157_v50, %v6329_v51  ;;  %v6440_v59 = vor.u32 %v8187_v54, %v6439_v53  ;;  %v6492_v50 = vor.u32 %v8197_v47, %v6489_v48  ;;  %v6425_v17 = vld [vmem:[%s12901_s4 + $0x270] sm:$0xf0] }
  0xdb   :  { %2454 = vmatpush.bf16.msrb.mxu2 %v6440_v59  ;;  %v8193_v59 = vld [vmem:[%s12901_s4 + $0x2c4] sm:$0xf] }
  0xdc   :  { %2429 = vmatpush.bf16.msrb.mxu3 %v6168_v60  ;;  %2442 = vmatpush.bf16.msrb.mxu1 %v6296_v1  ;;  %v8153_v60 = vld [vmem:[%s12901_s4 + $0x184] sm:$0xf]  ;;  %v6423_v1 = vld [vmem:[%s12901_s4 + $0x260] sm:$0xf] }
  0xdd   :  { %v6316_v8 = vor.u32 %v8153_v60, %v6313_v61  ;;  %v6424_v10 = vor.u32 %v8183_v41, %v6423_v1  ;;  %v6473_v60 = vld [vmem:[%s12901_s4 + $0x2d0] sm:$0xf0]  ;;  %v8132_v61 = vld [vmem:[%s12901_s4 + $0xd4] sm:$0xf0]  ;;  %v8231_v1 = vld [vmem:[%s12901_s4 + $0x3ec] sm:$0xf0] }
  0xdf   :  { %2455 = vmatpush.bf16.msrb.mxu2 %v6424_v10 }
  0xe0   :  { %2430 = vmatpush.bf16.msrb.mxu3 %v6152_v7  ;;  %2443 = vmatpush.bf16.msrb.mxu1 %v6280_v13  ;;  %v6169_v7 = vld [vmem:[%s12901_s4 + $0x70] sm:$0xf0] }
  0xe1   :  { %v1401_v62 = vpop.f32.mrf.mxu0  ;;  %v1414_v4 = vpop.f32.mrf.mxu1  ;;  %v6297_v13 = vld [vmem:[%s12901_s4 + $0x170] sm:$0xf0]  ;;  %v6172_v9 = vor.u32 %v8117_v6, %v6169_v7  ;;  %v6207_v6 = vld [vmem:[%s12901_s4 + $0xa8] sm:$0xf]  ;;  %v8189_v7 = vld [vmem:[%s12901_s4 + $0x2a4] sm:$0xf] }
  0xe2   :  { %v6300_v19 = vor.u32 %v8149_v12, %v6297_v13  ;;  %v1402_v38 = vadd.f32 %v1401_v62, %v1389_v28  ;;  %v6476_v62 = vor.u32 %v8193_v59, %v6473_v60  ;;  %v8128_v12 = vld [vmem:[%s12901_s4 + $0xb4] sm:$0xf0]  ;;  %v6351_v28 = vld [vmem:[%s12901_s4 + $0x1c8] sm:$0xf] }
  0xe3   :  { %v6143_v60 = vld [vmem:[%s12901_s4 + $0x28] sm:$0xf] }
  0xe4   :  { %2431 = vmatpush.bf16.msrb.mxu3 %v6136_v14  ;;  %2444 = vmatpush.bf16.msrb.mxu1 %v6264_v20  ;;  %v8179_v14 = vld [vmem:[%s12901_s4 + $0x24c] sm:$0xf0]  ;;  %v1415_v51 = vadd.f32 %v1414_v4, %v1402_v38  ;;  %v6224_v4 = vor.u32 %v8132_v61, %v6223_v35  ;;  %v8156_v35 = vld [vmem:[%s12901_s4 + $0x194] sm:$0xf0]  ;;  %v8173_v61 = vld [vmem:[%s12901_s4 + $0x224] sm:$0xf] }
  0xe5   :  { %v6408_v20 = vor.u32 %v8179_v14, %v6407_v63  ;;  %v8227_v63 = vld [vmem:[%s12901_s4 + $0x3cc] sm:$0xf0] }
  0xe7   :  { %2456 = vmatpush.bf16.msrb.mxu2 %v6408_v20 }
  0xe8   :  { %2432 = vmatpush.bf16.msrb.mxu3 %v6120_v31  ;;  %2445 = vmatpush.bf16.msrb.mxu1 %v6248_v36  ;;  %v6137_v31 = vld [vmem:[%s12901_s4 + $0x30] sm:$0xf0]  ;;  %v6392_v36 = vor.u32 %v8175_v26, %v6391_v25  ;;  %v8223_v25 = vld [vmem:[%s12901_s4 + $0x3ac] sm:$0xf0] }
  0xe9   :  { %v1427_v11 = vpop.f32.mrf.mxu3  ;;  %v1403_v22 = vpop.f32.mrf.mxu0  ;;  %v6140_v42 = vor.u32 %v8109_v30, %v6137_v31  ;;  %v8164_v30 = vld [vmem:[%s12901_s4 + $0x1d4] sm:$0xf0] }
  0xea   :  { %v1428_v54 = vadd.f32 %v1427_v11, %v1415_v51  ;;  %v6208_v11 = vor.u32 %v8128_v12, %v6207_v6  ;;  %v6368_v22 = vor.u32 %v8168_v16, %v6367_v15  ;;  %v8116_v51 = vld [vmem:[%s12901_s4 + $0x54] sm:$0xf0]  ;;  %v6535_v6 = vld [vmem:[%s12901_s4 + $0x340] sm:$0xf]  ;;  %v8169_v16 = vld [vmem:[%s12901_s4 + $0x204] sm:$0xf] }
  0xeb   :  { %2433 = vmatmul.bf16.vlgmr.msrb.gmra.mxu3 %v10149_v46  ;;  %2457 = vmatpush.bf16.msrb.mxu2 %v6392_v36  ;;  %v6175_v36 = vld [vmem:[%s12901_s4 + $0x68] sm:$0xf]  ;;  %v6160_v59 = vor.u32 %v8116_v51, %v6159_v34  ;;  %v8108_v15 = vld [vmem:[%s12901_s4 + $0x14] sm:$0xf0]  ;;  %v6209_v51 = vld [vmem:[%s12901_s4 + $0xb8] sm:$0xf0] }
  0xec   :  { %2477 = vmatpush.bf16.msra.mxu3 %v6236_v33  ;;  %2490 = vmatpush.bf16.msra.mxu1 %v6364_v43  ;;  %v1416_v33 = vpop.f32.mrf.mxu1  ;;  %v6121_v43 = vld [vmem:[%s12901_s4 + $0x10] sm:$0xf0] }
  0xed   :  { %v1440_v23 = vpop.f32.mrf.mxu2 }
  0xee   :  { %v1441_v3 = vadd.f32 %v1440_v23, %v1428_v54  ;;  %v6441_v23 = vld [vmem:[%s12901_s4 + $0x290] sm:$0xf0]  ;;  %v8215_v54 = vld [vmem:[%s12901_s4 + $0x36c] sm:$0xf0] }
  0xef   :  { %v6444_v31 = vor.u32 %v8185_v2, %v6441_v23  ;;  %v8207_v2 = vld [vmem:[%s12901_s4 + $0x32c] sm:$0xf0]  ;;  %v8134_v23 = vld [vmem:[%s12901_s4 + $0xec] sm:$0xf] }
  0xf0   :  { %2478 = vmatpush.bf16.msra.mxu3 %v6220_v57  ;;  %2491 = vmatpush.bf16.msra.mxu1 %v6348_v39  ;;  %v6376_v57 = vor.u32 %v8171_v27, %v6375_v55  ;;  %v8137_v39 = vld [vmem:[%s12901_s4 + $0x104] sm:$0xf]  ;;  %v6428_v55 = vor.u32 %v8181_v37, %v6425_v17  ;;  %v6567_v27 = vld [vmem:[%s12901_s4 + $0x380] sm:$0xf] }
  0xf1   :  { %v1429_v49 = vpop.f32.mrf.mxu3  ;;  %v6568_v47 = vor.u32 %v8219_v44, %v6567_v27  ;;  %v8229_v27 = vld [vmem:[%s12901_s4 + $0x3e4] sm:$0xf]  ;;  %v6617_v44 = vld [vmem:[%s12901_s4 + $0x3f0] sm:$0xf0] }
  0xf2   :  { %2458 = vmatpush.bf16.msrb.mxu2 %v6376_v57  ;;  %v8160_v57 = vld [vmem:[%s12901_s4 + $0x1b4] sm:$0xf0] }
  0xf4   :  { %2479 = vmatpush.bf16.msra.mxu3 %v6204_v52  ;;  %2492 = vmatpush.bf16.msra.mxu1 %v6332_v58  ;;  %v6124_v52 = vor.u32 %v8105_v40, %v6121_v43  ;;  %v6252_v58 = vor.u32 %v8137_v39, %v6249_v29  ;;  %v8120_v43 = vld [vmem:[%s12901_s4 + $0x74] sm:$0xf0]  ;;  %v8177_v39 = vld [vmem:[%s12901_s4 + $0x244] sm:$0xf]  ;;  %v6409_v29 = vld [vmem:[%s12901_s4 + $0x250] sm:$0xf0] }
  0xf5   :  { %v1442_v53 = vpop.f32.mrf.mxu2  ;;  %v6176_v49 = vor.u32 %v8120_v43, %v6175_v36  ;;  %v8130_v36 = vld [vmem:[%s12901_s4 + $0xcc] sm:$0xf]  ;;  %v6225_v43 = vld [vmem:[%s12901_s4 + $0xd8] sm:$0xf0] }
  0xf6   :  { %2503 = vmatpush.bf16.msra.mxu2 %v6492_v50  ;;  %v6551_v53 = vld [vmem:[%s12901_s4 + $0x360] sm:$0xf]  ;;  %v6228_v34 = vor.u32 %v8130_v36, %v6225_v43  ;;  %v8209_v43 = vld [vmem:[%s12901_s4 + $0x344] sm:$0xf] }
  0xf8   :  { %2480 = vmatpush.bf16.msra.mxu3 %v6188_v0  ;;  %2493 = vmatpush.bf16.msra.mxu1 %v6316_v8  ;;  %v6615_v0 = vld [vmem:[%s12901_s4 + $0x3e0] sm:$0xf]  ;;  %v6457_v8 = vld [vmem:[%s12901_s4 + $0x2b0] sm:$0xf0] }
  0xf9   :  { %v6616_v41 = vor.u32 %v8231_v1, %v6615_v0  ;;  %v1453_v10 = vpop.f32.mrf.mxu3  ;;  %v6460_v13 = vor.u32 %v8189_v7, %v6457_v8  ;;  %v8211_v7 = vld [vmem:[%s12901_s4 + $0x34c] sm:$0xf0]  ;;  %v6303_v8 = vld [vmem:[%s12901_s4 + $0x168] sm:$0xf] }
  0xfa   :  { %2504 = vmatpush.bf16.msra.mxu2 %v6476_v62  ;;  %v1454_v14 = vadd.f32 %v1453_v10, %v1441_v3  ;;  %v6393_v62 = vld [vmem:[%s12901_s4 + $0x230] sm:$0xf0]  ;;  %v8112_v3 = vld [vmem:[%s12901_s4 + $0x34] sm:$0xf0]  ;;  %v6536_v12 = vor.u32 %v8211_v7, %v6535_v6  ;;  %v8162_v6 = vld [vmem:[%s12901_s4 + $0x1cc] sm:$0xf] }
  0xfb   :  { %2464 = vmatpush.bf16.msrb.mxu0 %v6616_v41  ;;  %v8152_v10 = vld [vmem:[%s12901_s4 + $0x174] sm:$0xf0]  ;;  %v6353_v7 = vld [vmem:[%s12901_s4 + $0x1d8] sm:$0xf0] }
  0xfc   :  { %2481 = vmatpush.bf16.msra.mxu3 %v6172_v9  ;;  %2494 = vmatpush.bf16.msra.mxu1 %v6300_v19  ;;  %v6599_v9 = vld [vmem:[%s12901_s4 + $0x3c0] sm:$0xf]  ;;  %v6191_v19 = vld [vmem:[%s12901_s4 + $0x88] sm:$0xf]  ;;  %v1640_v20 = vmax.f32 %v1454_v14, 0.0  ;;  %v6144_v14 = vor.u32 %v8112_v3, %v6143_v60 }
  0xfd   :  { %v6600_v18 = vor.u32 %v8227_v63, %v6599_v9  ;;  %v6192_v33 = vor.u32 %v8124_v21, %v6191_v19  ;;  %v6127_v9 = vld [vmem:[%s12901_s4 + $0x8] sm:$0xf]  ;;  %v6304_v19 = vor.u32 %v8152_v10, %v6303_v8  ;;  %v6519_v21 = vld [vmem:[%s12901_s4 + $0x320] sm:$0xf]  ;;  %v6585_v3 = vld [vmem:[%s12901_s4 + $0x3b0] sm:$0xf0] }
  0xfe   :  { %2505 = vmatpush.bf16.msra.mxu2 %v6460_v13  ;;  %v10336_v26 = vpack.c.bf16 %v1640_v20, %v1640_v20  ;;  %v6287_v20 = vld [vmem:[%s12901_s4 + $0x148] sm:$0xf] }
  0xff   :  { %2465 = vmatpush.bf16.msrb.mxu0 %v6600_v18  ;;  %v6377_v18 = vld [vmem:[%s12901_s4 + $0x210] sm:$0xf0] }
 0x100   :  { %2482 = vmatpush.bf16.msra.mxu3 %v6156_v24  ;;  %2495 = vmatpush.bf16.msra.mxu1 %v6284_v32  ;;  %v6583_v24 = vld [vmem:[%s12901_s4 + $0x3a0] sm:$0xf] }
 0x101   :  { %v6584_v32 = vor.u32 %v8223_v25, %v6583_v24  ;;  %2446 = vmatmul.bf16.vlgmr.msrb.gmra.mxu1 %v10336_v26  ;;  %v1455_v38 = vpop.f32.mrf.mxu3  ;;  %v6241_v24 = vld [vmem:[%s12901_s4 + $0xf8] sm:$0xf0]  ;;  %v6520_v25 = vor.u32 %v8207_v2, %v6519_v21  ;;  %v8114_v21 = vld [vmem:[%s12901_s4 + $0x4c] sm:$0xf] }
 0x102   :  { %2506 = vmatpush.bf16.msra.mxu2 %v6444_v31  ;;  %v8144_v31 = vld [vmem:[%s12901_s4 + $0x134] sm:$0xf0]  ;;  %v6503_v38 = vld [vmem:[%s12901_s4 + $0x300] sm:$0xf]  ;;  %v6161_v2 = vld [vmem:[%s12901_s4 + $0x58] sm:$0xf0] }
 0x103   :  { %2466 = vmatpush.bf16.msrb.mxu0 %v6584_v32 }
 0x104   :  { %2483 = vmatpush.bf16.msra.mxu3 %v6140_v42  ;;  %2496 = vmatpush.bf16.msra.mxu1 %v6268_v45  ;;  %v6352_v42 = vor.u32 %v8164_v30, %v6351_v28  ;;  %v6335_v45 = vld [vmem:[%s12901_s4 + $0x1a8] sm:$0xf]  ;;  %v6128_v28 = vor.u32 %v8108_v15, %v6127_v9  ;;  %v8118_v9 = vld [vmem:[%s12901_s4 + $0x6c] sm:$0xf]  ;;  %v6569_v15 = vld [vmem:[%s12901_s4 + $0x390] sm:$0xf0] }
 0x105   :  { %v6336_v50 = vor.u32 %v8160_v57, %v6335_v45  ;;  %v6271_v30 = vld [vmem:[%s12901_s4 + $0x128] sm:$0xf]  ;;  %v285_v45 = vperm.slane %v9982_v5, 2 }
 0x106   :  { %v10354_v40 = vpop.f32.mrf.mxu0  ;;  %v10371_v48 = vpop.f32.mrf.mxu1  ;;  %2507 = vmatpush.bf16.msra.mxu2 %v6428_v55 }
 0x107   :  { %2467 = vmatpush.bf16.msrb.mxu0 %v6568_v47  ;;  %v6620_v47 = vor.u32 %v8229_v27, %v6617_v44  ;;  %v8150_v44 = vld [vmem:[%s12901_s4 + $0x16c] sm:$0xf] }
 0x108   :  { %2484 = vmatpush.bf16.msra.mxu3 %v6124_v52  ;;  %2497 = vmatpush.bf16.msra.mxu1 %v6252_v58  ;;  %v6412_v52 = vor.u32 %v8177_v39, %v6409_v29  ;;  %v6552_v58 = vor.u32 %v8215_v54, %v6551_v53  ;;  %v6255_v39 = vld [vmem:[%s12901_s4 + $0x108] sm:$0xf]  ;;  %v8140_v29 = vld [vmem:[%s12901_s4 + $0x114] sm:$0xf0]  ;;  %v6601_v53 = vld [vmem:[%s12901_s4 + $0x3d0] sm:$0xf0]  ;;  %v1467_v54 = vadd.f32 %v10371_v48, %v285_v45 }
 0x109   :  { %v8122_v48 = vld [vmem:[%s12901_s4 + $0x8c] sm:$0xf]  ;;  %v6305_v45 = vld [vmem:[%s12901_s4 + $0x178] sm:$0xf0] }
 0x10a   :  { %2508 = vmatpush.bf16.msra.mxu2 %v6412_v52  ;;  %v8225_v52 = vld [vmem:[%s12901_s4 + $0x3c4] sm:$0xf] }
 0x10b   :  { %2485 = vmatmul.bf16.vlgmr.msra.gmra.mxu3 %v10149_v46  ;;  %2468 = vmatpush.bf16.msrb.mxu0 %v6552_v58  ;;  %v6604_v58 = vor.u32 %v8225_v52, %v6601_v53  ;;  %v8205_v52 = vld [vmem:[%s12901_s4 + $0x324] sm:$0xf]  ;;  %v6521_v53 = vld [vmem:[%s12901_s4 + $0x330] sm:$0xf0] }
 0x10c   :  { %2529 = vmatpush.bf16.msrb.mxu3 %v6240_v56  ;;  %2542 = vmatpush.bf16.msrb.mxu1 %v6368_v22  ;;  %v6319_v56 = vld [vmem:[%s12901_s4 + $0x188] sm:$0xf]  ;;  %v8148_v22 = vld [vmem:[%s12901_s4 + $0x154] sm:$0xf0] }
 0x10d   :  { %v10406_v0 = vpop.f32.mrf.mxu3  ;;  %v6320_v41 = vor.u32 %v8156_v35, %v6319_v56  ;;  %v10423_v13 = vpop.f32.mrf.mxu2  ;;  %v6288_v32 = vor.u32 %v8148_v22, %v6287_v20  ;;  %v8166_v56 = vld [vmem:[%s12901_s4 + $0x1ec] sm:$0xf]  ;;  %v6369_v35 = vld [vmem:[%s12901_s4 + $0x1f8] sm:$0xf0]  ;;  %v8213_v22 = vld [vmem:[%s12901_s4 + $0x364] sm:$0xf] }
 0x10e   :  { %v1494_v1 = vpop.f32.mrf.mxu0  ;;  %v1468_v63 = vpop.f32.mrf.mxu1 }
 0x10f   :  { %2469 = vmatpush.bf16.msrb.mxu0 %v6536_v12  ;;  %v6193_v1 = vld [vmem:[%s12901_s4 + $0x98] sm:$0xf0] }
 0x110   :  { %2530 = vmatpush.bf16.msrb.mxu3 %v6224_v4  ;;  %2543 = vmatpush.bf16.msrb.mxu1 %v6352_v42  ;;  %v6396_v4 = vor.u32 %v8173_v61, %v6393_v62  ;;  %v8203_v42 = vld [vmem:[%s12901_s4 + $0x30c] sm:$0xf0]  ;;  %v6372_v62 = vor.u32 %v8166_v56, %v6369_v35  ;;  %v6196_v12 = vor.u32 %v8122_v48, %v6193_v1  ;;  %v6177_v63 = vld [vmem:[%s12901_s4 + $0x78] sm:$0xf0]  ;;  %v8146_v56 = vld [vmem:[%s12901_s4 + $0x14c] sm:$0xf] }
 0x111   :  { %2498 = vmatmul.bf16.vlgmr.msra.gmra.mxu1 %v10336_v26  ;;  %v6504_v55 = vor.u32 %v8203_v42, %v6503_v38  ;;  %v6145_v42 = vld [vmem:[%s12901_s4 + $0x38] sm:$0xf0]  ;;  %v8196_v1 = vld [vmem:[%s12901_s4 + $0x2d4] sm:$0xf0] }
 0x112   :  { %2509 = vmatpush.bf16.msra.mxu2 %v6396_v4  ;;  %v1480_v4 = vadd.f32 %v10406_v0, %v1467_v54  ;;  %v6356_v0 = vor.u32 %v8162_v6, %v6353_v7  ;;  %v6289_v35 = vld [vmem:[%s12901_s4 + $0x158] sm:$0xf0]  ;;  %v6505_v6 = vld [vmem:[%s12901_s4 + $0x310] sm:$0xf0]  ;;  %v8142_v7 = vld [vmem:[%s12901_s4 + $0x12c] sm:$0xf] }
 0x113   :  { %2470 = vmatpush.bf16.msrb.mxu0 %v6520_v25  ;;  %v8154_v25 = vld [vmem:[%s12901_s4 + $0x18c] sm:$0xf] }
 0x114   :  { %2531 = vmatpush.bf16.msrb.mxu3 %v6208_v11  ;;  %2544 = vmatpush.bf16.msrb.mxu1 %v6336_v50  ;;  %v6380_v11 = vor.u32 %v8169_v16, %v6377_v18  ;;  %v8126_v50 = vld [vmem:[%s12901_s4 + $0xac] sm:$0xf]  ;;  %v1493_v16 = vadd.f32 %v10354_v40, %v1480_v4  ;;  %v8201_v4 = vld [vmem:[%s12901_s4 + $0x304] sm:$0xf] }
 0x115   :  { %v1481_v37 = vpop.f32.mrf.mxu3  ;;  %v1507_v57 = vpop.f32.mrf.mxu2  ;;  %v6212_v60 = vor.u32 %v8126_v50, %v6209_v51  ;;  %v8158_v18 = vld [vmem:[%s12901_s4 + $0x1ac] sm:$0xf]  ;;  %v6308_v51 = vor.u32 %v8150_v44, %v6305_v45  ;;  %v6497_v45 = vld [vmem:[%s12901_s4 + $0x2f8] sm:$0xf0] }
 0x116   :  { %v10465_v17 = vpop.f32.mrf.mxu0  ;;  %2510 = vmatpush.bf16.msra.mxu2 %v6380_v11  ;;  %v6180_v11 = vor.u32 %v8118_v9, %v6177_v63  ;;  %v8106_v50 = vld [vmem:[%s12901_s4 + $0xc] sm:$0xf]  ;;  %v8192_v63 = vld [vmem:[%s12901_s4 + $0x2b4] sm:$0xf0] }
 0x117   :  { %2471 = vmatpush.bf16.msrb.mxu0 %v6504_v55  ;;  %v6537_v55 = vld [vmem:[%s12901_s4 + $0x350] sm:$0xf0]  ;;  %v8198_v44 = vld [vmem:[%s12901_s4 + $0x2ec] sm:$0xf] }
 0x118   :  { %2532 = vmatpush.bf16.msrb.mxu3 %v6192_v33  ;;  %2545 = vmatpush.bf16.msrb.mxu1 %v6320_v41  ;;  %v6244_v33 = vor.u32 %v8134_v23, %v6241_v24  ;;  %v8221_v41 = vld [vmem:[%s12901_s4 + $0x3a4] sm:$0xf]  ;;  %v6553_v23 = vld [vmem:[%s12901_s4 + $0x370] sm:$0xf0]  ;;  %v1506_v24 = vadd.f32 %v10423_v13, %v1493_v16  ;;  %v8110_v13 = vld [vmem:[%s12901_s4 + $0x2c] sm:$0xf] }
 0x119   :  { %v6588_v8 = vor.u32 %v8221_v41, %v6585_v3  ;;  %v6292_v41 = vor.u32 %v8146_v56, %v6289_v35  ;;  %v6257_v16 = vld [vmem:[%s12901_s4 + $0x118] sm:$0xf0] }
 0x11b   :  { %2516 = vmatpush.bf16.msra.mxu0 %v6620_v47  ;;  %v6540_v47 = vor.u32 %v8209_v43, %v6537_v55  ;;  %v6383_v43 = vld [vmem:[%s12901_s4 + $0x208] sm:$0xf]  ;;  %v8172_v55 = vld [vmem:[%s12901_s4 + $0x214] sm:$0xf0] }
 0x11c   :  { %2533 = vmatpush.bf16.msrb.mxu3 %v6176_v49  ;;  %2546 = vmatpush.bf16.msrb.mxu1 %v6304_v19  ;;  %v6272_v49 = vor.u32 %v8144_v31, %v6271_v30  ;;  %v6337_v19 = vld [vmem:[%s12901_s4 + $0x1b8] sm:$0xf0]  ;;  %v6556_v31 = vor.u32 %v8213_v22, %v6553_v23 }
 0x11d   :  { %v6340_v40 = vor.u32 %v8158_v18, %v6337_v19  ;;  %v6447_v19 = vld [vmem:[%s12901_s4 + $0x288] sm:$0xf] }
 0x11e   :  { %v1546_v61 = vpop.f32.mrf.mxu0 }
 0x11f   :  { %2517 = vmatpush.bf16.msra.mxu0 %v6604_v58 }
 0x120   :  { %2534 = vmatpush.bf16.msrb.mxu3 %v6160_v59  ;;  %2547 = vmatpush.bf16.msrb.mxu1 %v6288_v32  ;;  %v6256_v59 = vor.u32 %v8140_v29, %v6255_v39  ;;  %v6495_v39 = vld [vmem:[%s12901_s4 + $0x2e8] sm:$0xf]  ;;  %v8200_v29 = vld [vmem:[%s12901_s4 + $0x2f4] sm:$0xf0] }
 0x123   :  { %2518 = vmatpush.bf16.msra.mxu0 %v6588_v8  ;;  %v6273_v8 = vld [vmem:[%s12901_s4 + $0x138] sm:$0xf0] }
 0x124   :  { %2535 = vmatpush.bf16.msrb.mxu3 %v6144_v14  ;;  %2548 = vmatpush.bf16.msrb.mxu1 %v6272_v49  ;;  %v1518_v10 = vpop.f32.mrf.mxu1  ;;  %v8217_v14 = vld [vmem:[%s12901_s4 + $0x384] sm:$0xf] }
 0x125   :  { %v6572_v20 = vor.u32 %v8217_v14, %v6569_v15  ;;  %v1519_v32 = vadd.f32 %v1518_v10, %v1506_v24  ;;  %v6276_v14 = vor.u32 %v8142_v7, %v6273_v8  ;;  %v8138_v15 = vld [vmem:[%s12901_s4 + $0x10c] sm:$0xf]  ;;  %v6449_v7 = vld [vmem:[%s12901_s4 + $0x298] sm:$0xf0]  ;;  %v6591_v8 = vld [vmem:[%s12901_s4 + $0x3a8] sm:$0xf] }
 0x127   :  { %2519 = vmatpush.bf16.msra.mxu0 %v6572_v20  ;;  %v8188_v20 = vld [vmem:[%s12901_s4 + $0x294] sm:$0xf0] }
 0x128   :  { %2536 = vmatpush.bf16.msrb.mxu3 %v6128_v28  ;;  %2549 = vmatpush.bf16.msrb.mxu1 %v6256_v59  ;;  %v6321_v28 = vld [vmem:[%s12901_s4 + $0x198] sm:$0xf0]  ;;  %v6524_v59 = vor.u32 %v8205_v52, %v6521_v53  ;;  %v6623_v52 = vld [vmem:[%s12901_s4 + $0x3e8] sm:$0xf]  ;;  %v8232_v53 = vld [vmem:[%s12901_s4 + $0x3f4] sm:$0xf0] }
 0x129   :  { %v6324_v38 = vor.u32 %v8154_v25, %v6321_v28  ;;  %v8180_v25 = vld [vmem:[%s12901_s4 + $0x254] sm:$0xf0] }
 0x12b   :  { %2537 = vmatmul.bf16.vlgmr.msrb.gmra.mxu3 %v10149_v46  ;;  %2550 = vmatmul.bf16.vlgmr.msrb.gmra.mxu1 %v10336_v26  ;;  %v10567_v30 = vpop.f32.mrf.mxu0 }
 0x12c   :  { %2581 = vmatpush.bf16.msra.mxu3 %v6244_v33  ;;  %2594 = vmatpush.bf16.msra.mxu1 %v6372_v62  ;;  %v6164_v33 = vor.u32 %v8114_v21, %v6161_v2  ;;  %v1520_v36 = vpop.f32.mrf.mxu1  ;;  %v6479_v62 = vld [vmem:[%s12901_s4 + $0x2c8] sm:$0xf]  ;;  %v6260_v21 = vor.u32 %v8138_v15, %v6257_v16  ;;  %v8220_v15 = vld [vmem:[%s12901_s4 + $0x394] sm:$0xf0] }
 0x12d   :  { %v1557_v57 = vpop.f32.mrf.mxu2  ;;  %2520 = vmatpush.bf16.msra.mxu0 %v6556_v31  ;;  %v6480_v9 = vor.u32 %v8196_v1, %v6479_v62  ;;  %v6431_v2 = vld [vmem:[%s12901_s4 + $0x268] sm:$0xf]  ;;  %v8228_v1 = vld [vmem:[%s12901_s4 + $0x3d4] sm:$0xf0] }
 0x12e   :  { %v1531_v37 = vpop.f32.mrf.mxu3  ;;  %v6607_v62 = vld [vmem:[%s12901_s4 + $0x3c8] sm:$0xf] }
 0x12f   :  { %v1532_v27 = vadd.f32 %v1531_v37, %v1519_v32 }
 0x130   :  { %2582 = vmatpush.bf16.msra.mxu3 %v6228_v34  ;;  %2595 = vmatpush.bf16.msra.mxu1 %v6356_v0  ;;  %v6148_v34 = vor.u32 %v8110_v13, %v6145_v42  ;;  %v6463_v0 = vld [vmem:[%s12901_s4 + $0x2a8] sm:$0xf] }
 0x131   :  { %v1545_v49 = vadd.f32 %v10465_v17, %v1532_v27  ;;  %v6129_v17 = vld [vmem:[%s12901_s4 + $0x18] sm:$0xf0]  ;;  %2521 = vmatpush.bf16.msra.mxu0 %v6540_v47  ;;  %v6464_v18 = vor.u32 %v8192_v63, %v6463_v0  ;;  %v8182_v0 = vld [vmem:[%s12901_s4 + $0x26c] sm:$0xf] }
 0x132   :  { %v6132_v61 = vor.u32 %v8106_v50, %v6129_v17  ;;  %v6481_v50 = vld [vmem:[%s12901_s4 + $0x2d8] sm:$0xf0] }
 0x133   :  { %v1641_v54 = vmax.f32 %v1545_v49, 0.0  ;;  %v1572_v58 = vpop.f32.mrf.mxu0  ;;  %v6384_v49 = vor.u32 %v8172_v55, %v6383_v43  ;;  %v6433_v63 = vld [vmem:[%s12901_s4 + $0x278] sm:$0xf0] }
 0x134   :  { %2583 = vmatpush.bf16.msra.mxu3 %v6212_v60  ;;  %2596 = vmatpush.bf16.msra.mxu1 %v6340_v40  ;;  %v6496_v60 = vor.u32 %v8200_v29, %v6495_v39  ;;  %v6448_v40 = vor.u32 %v8188_v20, %v6447_v19  ;;  %v8194_v29 = vld [vmem:[%s12901_s4 + $0x2cc] sm:$0xf]  ;;  %v6624_v58 = vor.u32 %v8232_v53, %v6623_v52  ;;  %v6417_v20 = vld [vmem:[%s12901_s4 + $0x258] sm:$0xf0] }
 0x135   :  { %v10612_v48 = vpack.c.bf16 %v1641_v54, %v1641_v54  ;;  %v1559_v10 = vpop.f32.mrf.mxu2  ;;  %2522 = vmatpush.bf16.msra.mxu0 %v6524_v59  ;;  %v6484_v35 = vor.u32 %v8194_v29, %v6481_v50  ;;  %v8190_v59 = vld [vmem:[%s12901_s4 + $0x2ac] sm:$0xf]  ;;  %v6436_v16 = vor.u32 %v8182_v0, %v6433_v63  ;;  %v6625_v43 = vld [vmem:[%s12901_s4 + $0x3f8] sm:$0xf0]  ;;  %v10810_v29 = vld [vmem:[%s12902_s5] sm:$0xf] }
 0x136   :  { %v1533_v3 = vpop.f32.mrf.mxu3  ;;  %v8224_v10 = vld [vmem:[%s12901_s4 + $0x3b4] sm:$0xf0]  ;;  %v8178_v19 = vld [vmem:[%s12901_s4 + $0x24c] sm:$0xf]  ;;  %v6561_v52 = vld [vmem:[%s12901_s4 + $0x378] sm:$0xf0] }
 0x137   :  { %2459 = vmatmul.bf16.vlgmr.msrb.gmra.mxu2 %v10612_v48  ;;  %v8246_v63 = vld [vmem:[%s12903_s6 + $0x64] sm:$0xf0] }
 0x138   :  { %2584 = vmatpush.bf16.msra.mxu3 %v6196_v12  ;;  %2597 = vmatpush.bf16.msra.mxu1 %v6324_v38  ;;  %v6508_v12 = vor.u32 %v8201_v4, %v6505_v6  ;;  %v6608_v4 = vor.u32 %v8228_v1, %v6607_v62  ;;  %v8186_v6 = vld [vmem:[%s12901_s4 + $0x28c] sm:$0xf] }
 0x139   :  { %2555 = vmatpush.bf16.msrb.mxu2 %v6496_v60  ;;  %v6465_v60 = vld [vmem:[%s12901_s4 + $0x2b8] sm:$0xf0]  ;;  %v8206_v1 = vld [vmem:[%s12901_s4 + $0x32c] sm:$0xf] }
 0x13a   :  { %2523 = vmatpush.bf16.msra.mxu0 %v6508_v12  ;;  %v6452_v12 = vor.u32 %v8186_v6, %v6449_v7  ;;  %v6513_v6 = vld [vmem:[%s12901_s4 + $0x318] sm:$0xf0] }
 0x13c   :  { %2585 = vmatpush.bf16.msra.mxu3 %v6180_v11  ;;  %2598 = vmatpush.bf16.msra.mxu1 %v6308_v51  ;;  %v286_v11 = vperm.slane %v9982_v5, 3  ;;  %v6415_v5 = vld [vmem:[%s12901_s4 + $0x248] sm:$0xf] }
 0x13d   :  { %2556 = vmatpush.bf16.msrb.mxu2 %v6480_v9  ;;  %v6416_v32 = vor.u32 %v8180_v25, %v6415_v5  ;;  %v6592_v9 = vor.u32 %v8224_v10, %v6591_v8  ;;  %v6687_v10 = vld [vmem:[%s12903_s6 + $0x70] sm:$0xf] }
 0x13e   :  { %v1558_v22 = vadd.f32 %v1557_v57, %v286_v11  ;;  %v6559_v11 = vld [vmem:[%s12901_s4 + $0x368] sm:$0xf] }
 0x140   :  { %2586 = vmatpush.bf16.msra.mxu3 %v6164_v33  ;;  %2599 = vmatpush.bf16.msra.mxu1 %v6292_v41  ;;  %v1571_v28 = vadd.f32 %v10567_v30, %v1558_v22  ;;  %v6399_v33 = vld [vmem:[%s12901_s4 + $0x228] sm:$0xf]  ;;  %v6468_v41 = vor.u32 %v8190_v59, %v6465_v60  ;;  %v6401_v22 = vld [vmem:[%s12901_s4 + $0x238] sm:$0xf0] }
 0x141   :  { %2557 = vmatpush.bf16.msrb.mxu2 %v6464_v18 }
 0x144   :  { %2587 = vmatpush.bf16.msra.mxu3 %v6148_v34  ;;  %2600 = vmatpush.bf16.msra.mxu1 %v6276_v14  ;;  %v1583_v23 = vpop.f32.mrf.mxu1  ;;  %v6500_v34 = vor.u32 %v8198_v44, %v6497_v45  ;;  %v6575_v14 = vld [vmem:[%s12901_s4 + $0x388] sm:$0xf]  ;;  %v8226_v44 = vld [vmem:[%s12901_s4 + $0x3cc] sm:$0xf]  ;;  %v6609_v45 = vld [vmem:[%s12901_s4 + $0x3d8] sm:$0xf0] }
 0x145   :  { %2558 = vmatpush.bf16.msrb.mxu2 %v6448_v40  ;;  %v1584_v36 = vadd.f32 %v1583_v23, %v1571_v28  ;;  %v6576_v18 = vor.u32 %v8220_v15, %v6575_v14  ;;  %v6420_v40 = vor.u32 %v8178_v19, %v6417_v20  ;;  %v6543_v23 = vld [vmem:[%s12901_s4 + $0x348] sm:$0xf]  ;;  %v1778_v15 = vperm.slane %v10810_v29, 1  ;;  %v8244_v19 = vld [vmem:[%s12903_s6 + $0x54] sm:$0xf0] }
 0x147   :  { %2511 = vmatmul.bf16.vlgmr.msra.gmra.mxu2 %v10612_v48 }
 0x148   :  { %2588 = vmatpush.bf16.msra.mxu3 %v6132_v61  ;;  %2601 = vmatpush.bf16.msra.mxu1 %v6260_v21  ;;  %v8216_v21 = vld [vmem:[%s12901_s4 + $0x374] sm:$0xf0] }
 0x14a   :  { %v1622_v31 = vpop.f32.mrf.mxu0 }
 0x14b   :  { %2589 = vmatmul.bf16.vlgmr.msra.gmra.mxu3 %v10149_v46  ;;  %v8184_v46 = vld [vmem:[%s12901_s4 + $0x274] sm:$0xf0]  ;;  %2602 = vmatmul.bf16.vlgmr.msra.gmra.mxu1 %v10336_v26 }
 0x14c   :  { %v6432_v24 = vor.u32 %v8184_v46, %v6431_v2  ;;  %v8176_v26 = vld [vmem:[%s12901_s4 + $0x234] sm:$0xf0]  ;;  %v1585_v13 = vpop.f32.mrf.mxu1  ;;  %v6560_v2 = vor.u32 %v8216_v21, %v6559_v11  ;;  %v8174_v46 = vld [vmem:[%s12901_s4 + $0x22c] sm:$0xf] }
 0x14d   :  { %v1609_v42 = vpop.f32.mrf.mxu2  ;;  %v6400_v30 = vor.u32 %v8176_v26, %v6399_v33  ;;  %v6404_v25 = vor.u32 %v8174_v46, %v6401_v22  ;;  %v6527_v33 = vld [vmem:[%s12901_s4 + $0x328] sm:$0xf]  ;;  %v8208_v26 = vld [vmem:[%s12901_s4 + $0x334] sm:$0xf0] }
 0x14e   :  { %2559 = vmatpush.bf16.msrb.mxu2 %v6432_v24  ;;  %v1596_v37 = vpop.f32.mrf.mxu3  ;;  %v8212_v24 = vld [vmem:[%s12901_s4 + $0x354] sm:$0xf0]  ;;  %v6528_v13 = vor.u32 %v8208_v26, %v6527_v33  ;;  %v8242_v46 = vld [vmem:[%s12903_s6 + $0x44] sm:$0xf0] }
 0x14f   :  { %v1597_v38 = vadd.f32 %v1596_v37, %v1584_v36  ;;  %v6544_v28 = vor.u32 %v8212_v24, %v6543_v23  ;;  %v6511_v37 = vld [vmem:[%s12901_s4 + $0x308] sm:$0xf]  ;;  %v1779_v24 = vperm.slane %v10810_v29, 2 }
 0x151   :  { %v1610_v27 = vadd.f32 %v1609_v42, %v1597_v38  ;;  %v8204_v38 = vld [vmem:[%s12901_s4 + $0x314] sm:$0xf0] }
 0x152   :  { %2560 = vmatpush.bf16.msrb.mxu2 %v6416_v32  ;;  %v1624_v57 = vpop.f32.mrf.mxu0  ;;  %v6385_v32 = vld [vmem:[%s12901_s4 + $0x218] sm:$0xf0]  ;;  %v6512_v55 = vor.u32 %v8204_v38, %v6511_v37  ;;  %v6743_v37 = vld [vmem:[%s12903_s6 + $0xe0] sm:$0xf] }
 0x153   :  { %v1623_v47 = vadd.f32 %v1622_v31, %v1610_v27  ;;  %v8170_v31 = vld [vmem:[%s12901_s4 + $0x20c] sm:$0xf]  ;;  %v6612_v57 = vor.u32 %v8226_v44, %v6609_v45  ;;  %v8236_v44 = vld [vmem:[%s12903_s6 + $0x14] sm:$0xf0]  ;;  %v6735_v45 = vld [vmem:[%s12903_s6 + $0xd0] sm:$0xf] }
 0x154   :  { %v1635_v39 = vpop.f32.mrf.mxu1  ;;  %v6388_v36 = vor.u32 %v8170_v31, %v6385_v32  ;;  %v8264_v31 = vld [vmem:[%s12903_s6 + $0xf4] sm:$0xf0] }
 0x155   :  { %v1636_v51 = vadd.f32 %v1635_v39, %v1623_v47  ;;  %v1611_v54 = vpop.f32.mrf.mxu2  ;;  %v8222_v47 = vld [vmem:[%s12901_s4 + $0x3ac] sm:$0xf]  ;;  %v6577_v39 = vld [vmem:[%s12901_s4 + $0x398] sm:$0xf0] }
 0x156   :  { %2561 = vmatpush.bf16.msrb.mxu2 %v6400_v30  ;;  %v1598_v17 = vpop.f32.mrf.mxu3  ;;  %v8230_v30 = vld [vmem:[%s12901_s4 + $0x3ec] sm:$0xf] }
 0x157   :  { %v1642_v56 = vmax.f32 %v1636_v51, 0.0  ;;  %v6628_v27 = vor.u32 %v8230_v30, %v6625_v43  ;;  %v1777_v51 = vperm.slane %v10810_v29, 0  ;;  %v8214_v17 = vld [vmem:[%s12901_s4 + $0x36c] sm:$0xf] }
 0x158   :  { %v6564_v53 = vor.u32 %v8214_v17, %v6561_v52  ;;  %v8258_v17 = vld [vmem:[%s12903_s6 + $0xc4] sm:$0xf0]  ;;  %v8247_v52 = vld [vmem:[%s12903_s6 + $0x74] sm:$0xf] }
 0x159   :  { %v10704_v61 = vpack.c.bf16 %v1642_v56, %v1642_v56  ;;  %v8210_v56 = vld [vmem:[%s12901_s4 + $0x34c] sm:$0xf] }
 0x15a   :  { %2562 = vmatpush.bf16.msrb.mxu2 %v6384_v49  ;;  %v6593_v49 = vld [vmem:[%s12901_s4 + $0x3b8] sm:$0xf0] }
 0x15b   :  { %2472 = vmatmul.bf16.vlgmr.msrb.gmra.mxu0 %v10704_v61 }
 0x15c   :  { %2568 = vmatpush.bf16.msrb.mxu0 %v6624_v58  ;;  %v1637_v3 = vpop.f32.mrf.mxu1 }
 0x15d   :  { %2563 = vmatmul.bf16.vlgmr.msrb.gmra.mxu2 %v10612_v48 }
 0x15e   :  { %2607 = vmatpush.bf16.msra.mxu2 %v6500_v34  ;;  %v8218_v34 = vld [vmem:[%s12901_s4 + $0x38c] sm:$0xf] }
 0x15f   :  { %v6580_v50 = vor.u32 %v8218_v34, %v6577_v39  ;;  %v6631_v34 = vld [vmem:[%s12903_s6] sm:$0xf]  ;;  %v8234_v39 = vld [vmem:[%s12903_s6 + $0x4] sm:$0xf0] }
 0x160   :  { %2569 = vmatpush.bf16.msrb.mxu0 %v6608_v4  ;;  %v8202_v4 = vld [vmem:[%s12901_s4 + $0x30c] sm:$0xf] }
 0x161   :  { %v6516_v14 = vor.u32 %v8202_v4, %v6513_v6  ;;  %v8245_v4 = vld [vmem:[%s12903_s6 + $0x64] sm:$0xf]  ;;  %v6681_v6 = vld [vmem:[%s12903_s6 + $0x68] sm:$0xf0] }
 0x162   :  { %2608 = vmatpush.bf16.msra.mxu2 %v6484_v35  ;;  %v6545_v35 = vld [vmem:[%s12901_s4 + $0x358] sm:$0xf0] }
 0x163   :  { %v6548_v62 = vor.u32 %v8210_v56, %v6545_v35 }
 0x164   :  { %2570 = vmatpush.bf16.msrb.mxu0 %v6592_v9  ;;  %v6679_v9 = vld [vmem:[%s12903_s6 + $0x60] sm:$0xf] }
 0x166   :  { %2609 = vmatpush.bf16.msra.mxu2 %v6468_v41  ;;  %v6529_v41 = vld [vmem:[%s12901_s4 + $0x338] sm:$0xf0] }
 0x167   :  { %v6532_v3 = vor.u32 %v8206_v1, %v6529_v41  ;;  %v8280_v1 = vld [vmem:[%s12903_s6 + $0x174] sm:$0xf0] }
 0x168   :  { %2571 = vmatpush.bf16.msrb.mxu0 %v6576_v18  ;;  %v6671_v18 = vld [vmem:[%s12903_s6 + $0x50] sm:$0xf] }
 0x169   :  { %v6672_v11 = vor.u32 %v8244_v19, %v6671_v18  ;;  %v6703_v18 = vld [vmem:[%s12903_s6 + $0x90] sm:$0xf]  ;;  %v8252_v19 = vld [vmem:[%s12903_s6 + $0x94] sm:$0xf0] }
 0x16a   :  { %2610 = vmatpush.bf16.msra.mxu2 %v6452_v12  ;;  %v8248_v12 = vld [vmem:[%s12903_s6 + $0x74] sm:$0xf0] }
 0x16b   :  { %2524 = vmatmul.bf16.vlgmr.msra.gmra.mxu0 %v10704_v61  ;;  %v6688_v0 = vor.u32 %v8248_v12, %v6687_v10  ;;  %v8254_v10 = vld [vmem:[%s12903_s6 + $0xa4] sm:$0xf0]  ;;  %v6807_v12 = vld [vmem:[%s12903_s6 + $0x160] sm:$0xf] }
 0x16c   :  { %2572 = vmatpush.bf16.msrb.mxu0 %v6560_v2  ;;  %v6663_v2 = vld [vmem:[%s12903_s6 + $0x40] sm:$0xf] }
 0x16d   :  { %3031 = vmatpush.bf16.msrb.mxu3 %v6688_v0  ;;  %v6664_v22 = vor.u32 %v8242_v46, %v6663_v2  ;;  %v8278_v0 = vld [vmem:[%s12903_s6 + $0x164] sm:$0xf0]  ;;  %v8241_v2 = vld [vmem:[%s12903_s6 + $0x44] sm:$0xf]  ;;  %v6665_v46 = vld [vmem:[%s12903_s6 + $0x48] sm:$0xf0] }
 0x16e   :  { %2611 = vmatpush.bf16.msra.mxu2 %v6436_v16  ;;  %v2434_v5 = vpop.f32.mrf.mxu3  ;;  %v6680_v16 = vor.u32 %v8246_v63, %v6679_v9  ;;  %v6808_v63 = vor.u32 %v8278_v0, %v6807_v12  ;;  %v6729_v12 = vld [vmem:[%s12903_s6 + $0xc8] sm:$0xf0] }
 0x16f   :  { %v2435_v54 = vadd.f32 %v2434_v5, %v1777_v51  ;;  %v6655_v5 = vld [vmem:[%s12903_s6 + $0x30] sm:$0xf]  ;;  %v6632_v51 = vor.u32 %v8234_v39, %v6631_v34 }
 0x170   :  { %2573 = vmatpush.bf16.msrb.mxu0 %v6544_v28 }
 0x171   :  { %3032 = vmatpush.bf16.msrb.mxu3 %v6680_v16 }
 0x172   :  { %2612 = vmatpush.bf16.msra.mxu2 %v6420_v40 }
 0x174   :  { %2574 = vmatpush.bf16.msrb.mxu0 %v6528_v13  ;;  %v8238_v13 = vld [vmem:[%s12903_s6 + $0x24] sm:$0xf0] }
 0x175   :  { %3033 = vmatpush.bf16.msrb.mxu3 %v6672_v11  ;;  %v6704_v11 = vor.u32 %v8252_v19, %v6703_v18  ;;  %v8296_v19 = vld [vmem:[%s12903_s6 + $0x1f4] sm:$0xf0] }
 0x176   :  { %2613 = vmatpush.bf16.msra.mxu2 %v6404_v25  ;;  %v2436_v42 = vpop.f32.mrf.mxu3  ;;  %v6751_v25 = vld [vmem:[%s12903_s6 + $0xf0] sm:$0xf] }
 0x177   :  { %v6752_v32 = vor.u32 %v8264_v31, %v6751_v25  ;;  %v8262_v42 = vld [vmem:[%s12903_s6 + $0xe4] sm:$0xf0] }
 0x178   :  { %2575 = vmatpush.bf16.msrb.mxu0 %v6512_v55  ;;  %v6744_v43 = vor.u32 %v8262_v42, %v6743_v37  ;;  %v8250_v25 = vld [vmem:[%s12903_s6 + $0x84] sm:$0xf0]  ;;  %v6753_v37 = vld [vmem:[%s12903_s6 + $0xf8] sm:$0xf0]  ;;  %v6783_v42 = vld [vmem:[%s12903_s6 + $0x130] sm:$0xf] }
 0x179   :  { %3034 = vmatpush.bf16.msrb.mxu3 %v6664_v22  ;;  %3044 = vmatpush.bf16.msrb.mxu1 %v6752_v32  ;;  %v8239_v32 = vld [vmem:[%s12903_s6 + $0x34] sm:$0xf] }
 0x17a   :  { %2614 = vmatpush.bf16.msra.mxu2 %v6388_v36  ;;  %v6647_v36 = vld [vmem:[%s12903_s6 + $0x20] sm:$0xf] }
 0x17b   :  { %2576 = vmatmul.bf16.vlgmr.msrb.gmra.mxu0 %v10704_v61  ;;  %v6648_v38 = vor.u32 %v8238_v13, %v6647_v36  ;;  %v8263_v13 = vld [vmem:[%s12903_s6 + $0xf4] sm:$0xf] }
 0x17c   :  { %2620 = vmatpush.bf16.msra.mxu0 %v6628_v27  ;;  %v6639_v27 = vld [vmem:[%s12903_s6 + $0x10] sm:$0xf] }
 0x17d   :  { %2615 = vmatmul.bf16.vlgmr.msra.gmra.mxu2 %v10612_v48  ;;  %v6596_v48 = vor.u32 %v8222_v47, %v6593_v49  ;;  %3045 = vmatpush.bf16.msrb.mxu1 %v6744_v43  ;;  %v8260_v47 = vld [vmem:[%s12903_s6 + $0xd4] sm:$0xf0] }
 0x17e   :  { %v2447_v58 = vpop.f32.mrf.mxu1  ;;  %v6736_v49 = vor.u32 %v8260_v47, %v6735_v45  ;;  %v8237_v45 = vld [vmem:[%s12903_s6 + $0x24] sm:$0xf] }
 0x17f   :  { %v10825_v60 = vadd.f32 %v2447_v58, %v2435_v54  ;;  %v6719_v58 = vld [vmem:[%s12903_s6 + $0xb0] sm:$0xf]  ;;  %v8261_v47 = vld [vmem:[%s12903_s6 + $0xe4] sm:$0xf] }
 0x180   :  { %2621 = vmatpush.bf16.msra.mxu0 %v6612_v57  ;;  %v6640_v57 = vor.u32 %v8236_v44, %v6639_v27 }
 0x181   :  { %3046 = vmatpush.bf16.msrb.mxu1 %v6736_v49 }
 0x184   :  { %2622 = vmatpush.bf16.msra.mxu0 %v6596_v48 }
 0x186   :  { %v2449_v7 = vpop.f32.mrf.mxu1 }
 0x187   :  { %v6684_v7 = vor.u32 %v8245_v4, %v6681_v6  ;;  %v8233_v6 = vld [vmem:[%s12903_s6 + $0x4] sm:$0xf] }
 0x188   :  { %2623 = vmatpush.bf16.msra.mxu0 %v6580_v50  ;;  %v6727_v50 = vld [vmem:[%s12903_s6 + $0xc0] sm:$0xf] }
 0x189   :  { %v6728_v56 = vor.u32 %v8258_v17, %v6727_v50  ;;  %v8270_v17 = vld [vmem:[%s12903_s6 + $0x124] sm:$0xf0] }
 0x18b   :  { %3047 = vmatpush.bf16.msrb.mxu1 %v6728_v56  ;;  %v6641_v56 = vld [vmem:[%s12903_s6 + $0x18] sm:$0xf0] }
 0x18c   :  { %2624 = vmatpush.bf16.msra.mxu0 %v6564_v53  ;;  %v6689_v53 = vld [vmem:[%s12903_s6 + $0x78] sm:$0xf0] }
 0x18d   :  { %v6692_v35 = vor.u32 %v8247_v52, %v6689_v53 }
 0x18e   :  { %v2486_v59 = vpop.f32.mrf.mxu3  ;;  %v2499_v21 = vpop.f32.mrf.mxu1 }
 0x18f   :  { %v2487_v20 = vadd.f32 %v2486_v59, %v1778_v15  ;;  %v8256_v59 = vld [vmem:[%s12903_s6 + $0xb4] sm:$0xf0]  ;;  %v6673_v15 = vld [vmem:[%s12903_s6 + $0x58] sm:$0xf0] }
 0x190   :  { %2625 = vmatpush.bf16.msra.mxu0 %v6548_v62  ;;  %v6815_v62 = vld [vmem:[%s12903_s6 + $0x170] sm:$0xf]  ;;  %v6720_v41 = vor.u32 %v8256_v59, %v6719_v58  ;;  %v6737_v59 = vld [vmem:[%s12903_s6 + $0xd8] sm:$0xf0] }
 0x191   :  { %v10858_v40 = vadd.f32 %v2499_v21, %v2487_v20  ;;  %v6799_v20 = vld [vmem:[%s12903_s6 + $0x150] sm:$0xf]  ;;  %v8276_v21 = vld [vmem:[%s12903_s6 + $0x154] sm:$0xf0] }
 0x192   :  { %3048 = vmatpush.bf16.msrb.mxu1 %v6720_v41  ;;  %v6800_v22 = vor.u32 %v8276_v21, %v6799_v20  ;;  %v6767_v41 = vld [vmem:[%s12903_s6 + $0x110] sm:$0xf]  ;;  %v8255_v20 = vld [vmem:[%s12903_s6 + $0xb4] sm:$0xf] }
 0x194   :  { %2626 = vmatpush.bf16.msra.mxu0 %v6532_v3  ;;  %v6816_v3 = vor.u32 %v8280_v1, %v6815_v62 }
 0x196   :  { %v2488_v8 = vpop.f32.mrf.mxu3  ;;  %v2501_v23 = vpop.f32.mrf.mxu1  ;;  %3057 = vmatpush.bf16.msrb.mxu2 %v6816_v3  ;;  %v8268_v3 = vld [vmem:[%s12903_s6 + $0x114] sm:$0xf0] }
 0x197   :  { %v6711_v8 = vld [vmem:[%s12903_s6 + $0xa0] sm:$0xf]  ;;  %v6668_v23 = vor.u32 %v8241_v2, %v6665_v46  ;;  %v6768_v4 = vor.u32 %v8268_v3, %v6767_v41  ;;  %v8279_v46 = vld [vmem:[%s12903_s6 + $0x174] sm:$0xf]  ;;  %v6785_v41 = vld [vmem:[%s12903_s6 + $0x138] sm:$0xf0] }
 0x198   :  { %2627 = vmatpush.bf16.msra.mxu0 %v6516_v14  ;;  %v6712_v9 = vor.u32 %v8254_v10, %v6711_v8  ;;  %v8243_v14 = vld [vmem:[%s12903_s6 + $0x54] sm:$0xf]  ;;  %v8257_v8 = vld [vmem:[%s12903_s6 + $0xc4] sm:$0xf] }
 0x199   :  { %v6676_v16 = vor.u32 %v8243_v14, %v6673_v15  ;;  %v6759_v14 = vld [vmem:[%s12903_s6 + $0x100] sm:$0xf]  ;;  %v8266_v15 = vld [vmem:[%s12903_s6 + $0x104] sm:$0xf0] }
 0x19a   :  { %3058 = vmatpush.bf16.msrb.mxu2 %v6808_v63  ;;  %3049 = vmatpush.bf16.msrb.mxu1 %v6712_v9  ;;  %v6732_v63 = vor.u32 %v8257_v8, %v6729_v12  ;;  %v6760_v18 = vor.u32 %v8266_v15, %v6759_v14  ;;  %v8269_v8 = vld [vmem:[%s12903_s6 + $0x124] sm:$0xf]  ;;  %v6777_v12 = vld [vmem:[%s12903_s6 + $0x128] sm:$0xf0]  ;;  %v8267_v15 = vld [vmem:[%s12903_s6 + $0x114] sm:$0xf] }
 0x19b   :  { %2628 = vmatmul.bf16.vlgmr.msra.gmra.mxu0 %v10704_v61  ;;  %v8240_v61 = vld [vmem:[%s12903_s6 + $0x34] sm:$0xf0]  ;;  %v6780_v14 = vor.u32 %v8269_v8, %v6777_v12 }
 0x19c   :  { %v6656_v28 = vor.u32 %v8240_v61, %v6655_v5  ;;  %v1780_v5 = vperm.slane %v10810_v29, 3  ;;  %v6695_v61 = vld [vmem:[%s12903_s6 + $0x80] sm:$0xf]  ;;  %v8274_v29 = vld [vmem:[%s12903_s6 + $0x144] sm:$0xf0] }
 0x19d   :  { %v6696_v31 = vor.u32 %v8250_v25, %v6695_v61  ;;  %v8294_v61 = vld [vmem:[%s12903_s6 + $0x1e4] sm:$0xf0]  ;;  %v8253_v25 = vld [vmem:[%s12903_s6 + $0xa4] sm:$0xf] }
 0x19e   :  { %3035 = vmatpush.bf16.msrb.mxu3 %v6656_v28  ;;  %3050 = vmatpush.bf16.msrb.mxu1 %v6704_v11  ;;  %v6791_v28 = vld [vmem:[%s12903_s6 + $0x140] sm:$0xf]  ;;  %v6721_v11 = vld [vmem:[%s12903_s6 + $0xb8] sm:$0xf0] }
 0x19f   :  { %3059 = vmatpush.bf16.msrb.mxu2 %v6800_v22  ;;  %v6724_v2 = vor.u32 %v8255_v20, %v6721_v11  ;;  %v6817_v22 = vld [vmem:[%s12903_s6 + $0x178] sm:$0xf0]  ;;  %v6823_v11 = vld [vmem:[%s12903_s6 + $0x180] sm:$0xf] }
 0x1a2   :  { %3036 = vmatpush.bf16.msrb.mxu3 %v6648_v38  ;;  %v6756_v38 = vor.u32 %v8263_v13, %v6753_v37  ;;  %3051 = vmatpush.bf16.msrb.mxu1 %v6696_v31  ;;  %v6713_v31 = vld [vmem:[%s12903_s6 + $0xa8] sm:$0xf0]  ;;  %v8292_v13 = vld [vmem:[%s12903_s6 + $0x1d4] sm:$0xf0] }
 0x1a6   :  { %3037 = vmatpush.bf16.msrb.mxu3 %v6640_v57  ;;  %3096 = vmatpush.bf16.msra.mxu1 %v6756_v38  ;;  %v6649_v57 = vld [vmem:[%s12903_s6 + $0x28] sm:$0xf0] }
 0x1a7   :  { %v6652_v49 = vor.u32 %v8237_v45, %v6649_v57  ;;  %v6801_v45 = vld [vmem:[%s12903_s6 + $0x158] sm:$0xf0] }
 0x1a8   :  { %v2551_v30 = vpop.f32.mrf.mxu1 }
 0x1aa   :  { %3038 = vmatpush.bf16.msrb.mxu3 %v6632_v51  ;;  %v6775_v51 = vld [vmem:[%s12903_s6 + $0x120] sm:$0xf] }
 0x1ab   :  { %v6776_v53 = vor.u32 %v8270_v17, %v6775_v51 }
 0x1ae   :  { %v2538_v33 = vpop.f32.mrf.mxu3  ;;  %3083 = vmatpush.bf16.msra.mxu3 %v6692_v35  ;;  %v8259_v35 = vld [vmem:[%s12903_s6 + $0xd4] sm:$0xf] }
 0x1af   :  { %v2539_v26 = vadd.f32 %v2538_v33, %v1779_v24  ;;  %v6657_v33 = vld [vmem:[%s12903_s6 + $0x38] sm:$0xf0]  ;;  %v6740_v62 = vor.u32 %v8259_v35, %v6737_v59  ;;  %v8288_v59 = vld [vmem:[%s12903_s6 + $0x1b4] sm:$0xf0] }
 0x1b0   :  { %v2553_v54 = vpop.f32.mrf.mxu1  ;;  %v6660_v36 = vor.u32 %v8239_v32, %v6657_v33  ;;  %v6809_v32 = vld [vmem:[%s12903_s6 + $0x168] sm:$0xf0]  ;;  %v6716_v33 = vor.u32 %v8253_v25, %v6713_v31 }
 0x1b1   :  { %v10892_v55 = vadd.f32 %v2551_v30, %v2539_v26  ;;  %v6792_v26 = vor.u32 %v8274_v29, %v6791_v28  ;;  %v8272_v30 = vld [vmem:[%s12903_s6 + $0x134] sm:$0xf0]  ;;  %v8235_v54 = vld [vmem:[%s12903_s6 + $0x14] sm:$0xf]  ;;  %v8277_v29 = vld [vmem:[%s12903_s6 + $0x164] sm:$0xf] }
 0x1b2   :  { %3084 = vmatpush.bf16.msra.mxu3 %v6684_v7  ;;  %v6784_v27 = vor.u32 %v8272_v30, %v6783_v42  ;;  %v6644_v58 = vor.u32 %v8235_v54, %v6641_v56  ;;  %v6633_v7 = vld [vmem:[%s12903_s6 + $0x8] sm:$0xf0]  ;;  %v8251_v42 = vld [vmem:[%s12903_s6 + $0x94] sm:$0xf]  ;;  %v6705_v30 = vld [vmem:[%s12903_s6 + $0x98] sm:$0xf0] }
 0x1b3   :  { %3060 = vmatpush.bf16.msrb.mxu2 %v6792_v26  ;;  %v6636_v10 = vor.u32 %v8233_v6, %v6633_v7  ;;  %v6812_v26 = vor.u32 %v8277_v29, %v6809_v32  ;;  %v6839_v6 = vld [vmem:[%s12903_s6 + $0x1a0] sm:$0xf]  ;;  %v8286_v7 = vld [vmem:[%s12903_s6 + $0x1a4] sm:$0xf0]  ;;  %v8293_v32 = vld [vmem:[%s12903_s6 + $0x1e4] sm:$0xf] }
 0x1b6   :  { %v2540_v48 = vpop.f32.mrf.mxu3  ;;  %3085 = vmatpush.bf16.msra.mxu3 %v6676_v16  ;;  %v6879_v16 = vld [vmem:[%s12903_s6 + $0x1f0] sm:$0xf] }
 0x1b7   :  { %v6745_v48 = vld [vmem:[%s12903_s6 + $0xe8] sm:$0xf0]  ;;  %3061 = vmatpush.bf16.msrb.mxu2 %v6784_v27  ;;  %v6880_v21 = vor.u32 %v8296_v19, %v6879_v16  ;;  %v6769_v16 = vld [vmem:[%s12903_s6 + $0x118] sm:$0xf0] }
 0x1b8   :  { %v6748_v50 = vor.u32 %v8261_v47, %v6745_v48  ;;  %v6855_v48 = vld [vmem:[%s12903_s6 + $0x1c0] sm:$0xf]  ;;  %v6772_v20 = vor.u32 %v8267_v15, %v6769_v16  ;;  %v8327_v15 = vld [vmem:[%s12905_s8 + $0xec] sm:$0xf0] }
 0x1b9   :  { %3070 = vmatpush.bf16.msrb.mxu0 %v6880_v21  ;;  %v8282_v21 = vld [vmem:[%s12903_s6 + $0x184] sm:$0xf0] }
 0x1ba   :  { %v10978_v24 = vpop.f32.mrf.mxu2  ;;  %3086 = vmatpush.bf16.msra.mxu3 %v6668_v23  ;;  %3097 = vmatpush.bf16.msra.mxu1 %v6748_v50  ;;  %v6820_v23 = vor.u32 %v8279_v46, %v6817_v22  ;;  %v8273_v50 = vld [vmem:[%s12903_s6 + $0x144] sm:$0xf]  ;;  %v6761_v22 = vld [vmem:[%s12903_s6 + $0x108] sm:$0xf0] }
 0x1bb   :  { %3062 = vmatpush.bf16.msrb.mxu2 %v6776_v53  ;;  %v2461_v27 = vadd.f32 %v10978_v24, %v10825_v60  ;;  %v8249_v24 = vld [vmem:[%s12903_s6 + $0x84] sm:$0xf]  ;;  %v6793_v53 = vld [vmem:[%s12903_s6 + $0x148] sm:$0xf0] }
 0x1bc   :  { %v6796_v56 = vor.u32 %v8273_v50, %v6793_v53  ;;  %v8283_v50 = vld [vmem:[%s12903_s6 + $0x194] sm:$0xf] }
 0x1be   :  { %3087 = vmatpush.bf16.msra.mxu3 %v6660_v36  ;;  %3098 = vmatpush.bf16.msra.mxu1 %v6740_v62  ;;  %v6863_v36 = vld [vmem:[%s12903_s6 + $0x1d0] sm:$0xf] }
 0x1bf   :  { %3063 = vmatpush.bf16.msrb.mxu2 %v6768_v4  ;;  %v6864_v38 = vor.u32 %v8292_v13, %v6863_v36  ;;  %v8291_v13 = vld [vmem:[%s12903_s6 + $0x1d4] sm:$0xf] }
 0x1c2   :  { %v2462_v39 = vpop.f32.mrf.mxu2  ;;  %3088 = vmatpush.bf16.msra.mxu3 %v6652_v49  ;;  %3099 = vmatpush.bf16.msra.mxu1 %v6732_v63  ;;  %v8284_v63 = vld [vmem:[%s12903_s6 + $0x194] sm:$0xf0] }
 0x1c3   :  { %3064 = vmatpush.bf16.msrb.mxu2 %v6760_v18  ;;  %v6697_v39 = vld [vmem:[%s12903_s6 + $0x88] sm:$0xf0] }
 0x1c4   :  { %v6700_v17 = vor.u32 %v8249_v24, %v6697_v39  ;;  %v6841_v24 = vld [vmem:[%s12903_s6 + $0x1a8] sm:$0xf0] }
 0x1c6   :  { %3089 = vmatpush.bf16.msra.mxu3 %v6644_v58  ;;  %3100 = vmatpush.bf16.msra.mxu1 %v6724_v2  ;;  %v6847_v58 = vld [vmem:[%s12903_s6 + $0x1b0] sm:$0xf]  ;;  %v8265_v2 = vld [vmem:[%s12903_s6 + $0x104] sm:$0xf] }
 0x1c7   :  { %3109 = vmatpush.bf16.msra.mxu2 %v6820_v23  ;;  %v6848_v62 = vor.u32 %v8288_v59, %v6847_v58  ;;  %v8295_v23 = vld [vmem:[%s12903_s6 + $0x1f4] sm:$0xf]  ;;  %v6764_v31 = vor.u32 %v8265_v2, %v6761_v22  ;;  %v8328_v2 = vld [vmem:[%s12905_s8 + $0xf4] sm:$0xf0] }
 0x1c8   :  { %v2603_v34 = vpop.f32.mrf.mxu1 }
 0x1ca   :  { %v11061_v0 = vpop.f32.mrf.mxu2  ;;  %3090 = vmatpush.bf16.msra.mxu3 %v6636_v10  ;;  %3101 = vmatpush.bf16.msra.mxu1 %v6716_v33  ;;  %v6840_v10 = vor.u32 %v8286_v7, %v6839_v6  ;;  %v6873_v33 = vld [vmem:[%s12903_s6 + $0x1e8] sm:$0xf0] }
 0x1cb   :  { %3110 = vmatpush.bf16.msra.mxu2 %v6812_v26  ;;  %v2513_v46 = vadd.f32 %v11061_v0, %v10858_v40  ;;  %v6876_v26 = vor.u32 %v8293_v32, %v6873_v33 }
 0x1ce   :  { %v2590_v43 = vpop.f32.mrf.mxu3 }
 0x1cf   :  { %v2591_v44 = vadd.f32 %v2590_v43, %v1780_v5  ;;  %v6871_v5 = vld [vmem:[%s12903_s6 + $0x1e0] sm:$0xf]  ;;  %v8275_v43 = vld [vmem:[%s12903_s6 + $0x154] sm:$0xf] }
 0x1d0   :  { %v2605_v9 = vpop.f32.mrf.mxu1  ;;  %v6872_v28 = vor.u32 %v8294_v61, %v6871_v5  ;;  %v6804_v47 = vor.u32 %v8275_v43, %v6801_v45  ;;  %v6881_v5 = vld [vmem:[%s12903_s6 + $0x1f8] sm:$0xf0] }
 0x1d1   :  { %v11029_v52 = vadd.f32 %v2603_v34, %v2591_v44  ;;  %v6708_v44 = vor.u32 %v8251_v42, %v6705_v30  ;;  %v8290_v34 = vld [vmem:[%s12903_s6 + $0x1c4] sm:$0xf0]  ;;  %v6831_v9 = vld [vmem:[%s12903_s6 + $0x190] sm:$0xf]  ;;  %v6884_v29 = vor.u32 %v8295_v23, %v6881_v5  ;;  %v8289_v42 = vld [vmem:[%s12903_s6 + $0x1c4] sm:$0xf] }
 0x1d2   :  { %v2514_v37 = vpop.f32.mrf.mxu2  ;;  %3071 = vmatpush.bf16.msrb.mxu0 %v6872_v28  ;;  %3111 = vmatpush.bf16.msra.mxu2 %v6804_v47  ;;  %v6856_v60 = vor.u32 %v8290_v34, %v6855_v48  ;;  %v6832_v19 = vor.u32 %v8284_v63, %v6831_v9  ;;  %v6824_v28 = vor.u32 %v8282_v21, %v6823_v11  ;;  %v6857_v30 = vld [vmem:[%s12903_s6 + $0x1c8] sm:$0xf0]  ;;  %v8287_v47 = vld [vmem:[%s12903_s6 + $0x1b4] sm:$0xf]  ;;  %v8676_v63 = vmov 0.0  }
 0x1d3   :  { %3102 = vmatpush.bf16.msra.mxu1 %v6708_v44  ;;  %v6865_v37 = vld [vmem:[%s12903_s6 + $0x1d8] sm:$0xf0]  ;;  %3135 = vst [vmem:[#allocation2] sm:$0xf] %v8676_v63  ;;  %v7007_v21 = vld [vmem:[%s12905_s8 + $0xe8] sm:$0xf] }
 0x1d4   :  { %v7008_v22 = vor.u32 %v8328_v2, %v7007_v21  ;;  %v7009_v23 = vld [vmem:[%s12905_s8 + $0xf8] sm:$0xf0]  ;;  %v8307_v21 = vld [vmem:[%s12905_s8 + $0x4c] sm:$0xf0]  ;;  %v8305_v2 = vld [vmem:[%s12905_s8 + $0x44] sm:$0xf] }
 0x1d6   :  { %v2592_v1 = vpop.f32.mrf.mxu3  ;;  %3072 = vmatpush.bf16.msrb.mxu0 %v6864_v38  ;;  %3112 = vmatpush.bf16.msra.mxu2 %v6796_v56  ;;  %v6868_v38 = vor.u32 %v8291_v13, %v6865_v37  ;;  %v8281_v56 = vld [vmem:[%s12903_s6 + $0x184] sm:$0xf]  ;;  %v6967_v13 = vld [vmem:[%s12905_s8 + $0xa0] sm:$0xf] }
 0x1d7   :  { %3103 = vmatpush.bf16.msra.mxu1 %v6700_v17  ;;  %v8271_v1 = vld [vmem:[%s12903_s6 + $0x134] sm:$0xf] }
 0x1d8   :  { %v2473_v57 = vpop.f32.mrf.mxu0  ;;  %v6788_v3 = vor.u32 %v8271_v1, %v6785_v41 }
 0x1d9   :  { %v2474_v49 = vadd.f32 %v2473_v57, %v2461_v27  ;;  %v6860_v27 = vor.u32 %v8289_v42, %v6857_v30  ;;  %v8319_v42 = vld [vmem:[%s12905_s8 + $0xac] sm:$0xf0]  ;;  %v8317_v30 = vld [vmem:[%s12905_s8 + $0xa4] sm:$0xf] }
 0x1da   :  { %3073 = vmatpush.bf16.msrb.mxu0 %v6856_v60  ;;  %3113 = vmatpush.bf16.msra.mxu2 %v6788_v3 }
 0x1db   :  { %v2633_v51 = vmax.f32 %v2474_v49, 0.0  ;;  %v6849_v49 = vld [vmem:[%s12903_s6 + $0x1b8] sm:$0xf0] }
 0x1dc   :  { %v6852_v34 = vor.u32 %v8287_v47, %v6849_v49  ;;  %v8318_v47 = vld [vmem:[%s12905_s8 + $0xac] sm:$0xf] }
 0x1dd   :  { %v2637_v35 = vpack.c.bf16 %v2633_v51, %v2633_v51  ;;  %v6833_v51 = vld [vmem:[%s12903_s6 + $0x198] sm:$0xf0] }
 0x1de   :  { %3074 = vmatpush.bf16.msrb.mxu0 %v6848_v62  ;;  %3114 = vmatpush.bf16.msra.mxu2 %v6780_v14  ;;  %v6999_v14 = vld [vmem:[%s12905_s8 + $0xe0] sm:$0xf] }
 0x1df   :  { %3039 = vmatmul.bf16.vlgmr.msrb.gmra.mxu3 %v2637_v35 }
 0x1e0   :  { %v11143_v54 = vpop.f32.mrf.mxu2  ;;  %v2475_v4 = vpop.f32.mrf.mxu0 }
 0x1e1   :  { %v2565_v43 = vadd.f32 %v11143_v54, %v10892_v55  ;;  %v8285_v55 = vld [vmem:[%s12903_s6 + $0x1a4] sm:$0xf]  ;;  %v6836_v54 = vor.u32 %v8283_v50, %v6833_v51  ;;  %v6953_v51 = vld [vmem:[%s12905_s8 + $0x90] sm:$0xf0] }
 0x1e2   :  { %3075 = vmatpush.bf16.msrb.mxu0 %v6840_v10  ;;  %3115 = vmatpush.bf16.msra.mxu2 %v6772_v20  ;;  %v6844_v39 = vor.u32 %v8285_v55, %v6841_v24  ;;  %v7001_v20 = vld [vmem:[%s12905_s8 + $0xf0] sm:$0xf0]  ;;  %v6951_v55 = vld [vmem:[%s12905_s8 + $0x80] sm:$0xf]  ;;  %v8315_v24 = vld [vmem:[%s12905_s8 + $0x8c] sm:$0xf0] }
 0x1e3   :  { %v6952_v50 = vor.u32 %v8315_v24, %v6951_v55  ;;  %v8300_v55 = vld [vmem:[%s12905_s8 + $0x14] sm:$0xf0] }
 0x1e6   :  { %3076 = vmatpush.bf16.msrb.mxu0 %v6832_v19  ;;  %3116 = vmatpush.bf16.msra.mxu2 %v6764_v31  ;;  %v8325_v19 = vld [vmem:[%s12905_s8 + $0xe4] sm:$0xf] }
 0x1e7   :  { %v7004_v11 = vor.u32 %v8325_v19, %v7001_v20 }
 0x1e8   :  { %v2566_v18 = vpop.f32.mrf.mxu2  ;;  %v2525_v61 = vpop.f32.mrf.mxu0 }
 0x1e9   :  { %v2526_v25 = vadd.f32 %v2525_v61, %v2513_v46  ;;  %v7000_v18 = vor.u32 %v8327_v15, %v6999_v14  ;;  %v8326_v46 = vld [vmem:[%s12905_s8 + $0xec] sm:$0xf]  ;;  %v6983_v61 = vld [vmem:[%s12905_s8 + $0xc0] sm:$0xf] }
 0x1ea   :  { %3077 = vmatpush.bf16.msrb.mxu0 %v6824_v28  ;;  %v7012_v5 = vor.u32 %v8326_v46, %v7009_v23  ;;  %v8321_v28 = vld [vmem:[%s12905_s8 + $0xc4] sm:$0xf]  ;;  %v8310_v15 = vld [vmem:[%s12905_s8 + $0x6c] sm:$0xf]  ;;  %v6927_v23 = vld [vmem:[%s12905_s8 + $0x48] sm:$0xf] }
 0x1eb   :  { %v2634_v40 = vmax.f32 %v2526_v25, 0.0  ;;  %3348 = vmatpush.bf16.msrb.mxu3 %v7000_v18  ;;  %v8323_v25 = vld [vmem:[%s12905_s8 + $0xcc] sm:$0xf0]  ;;  %v6945_v18 = vld [vmem:[%s12905_s8 + $0x78] sm:$0xf0] }
 0x1ec   :  { %v6984_v31 = vor.u32 %v8323_v25, %v6983_v61  ;;  %v6948_v20 = vor.u32 %v8310_v15, %v6945_v18  ;;  %v7659_v15 = vld [vmem:[%s12907_s10 + $0x508] sm:$0xf]  ;;  %v8493_v18 = vld [vmem:[%s12907_s10 + $0x520] sm:$0xf0] }
 0x1ed   :  { %v2638_v0 = vpack.c.bf16 %v2634_v40, %v2634_v40  ;;  %v6991_v40 = vld [vmem:[%s12905_s8 + $0xc8] sm:$0xf] }
 0x1ee   :  { %3122 = vmatpush.bf16.msra.mxu0 %v6884_v29  ;;  %v6985_v29 = vld [vmem:[%s12905_s8 + $0xd0] sm:$0xf0] }
 0x1ef   :  { %3052 = vmatmul.bf16.vlgmr.msrb.gmra.mxu1 %v2638_v0  ;;  %3091 = vmatmul.bf16.vlgmr.msra.gmra.mxu3 %v2637_v35  ;;  %v6825_v35 = vld [vmem:[%s12903_s6 + $0x188] sm:$0xf0]  ;;  %v6988_v32 = vor.u32 %v8321_v28, %v6985_v29 }
 0x1f0   :  { %v2527_v36 = vpop.f32.mrf.mxu0  ;;  %v6828_v58 = vor.u32 %v8281_v56, %v6825_v35  ;;  %3361 = vmatpush.bf16.msrb.mxu1 %v7004_v11  ;;  %3349 = vmatpush.bf16.msrb.mxu3 %v6984_v31  ;;  %v8314_v35 = vld [vmem:[%s12905_s8 + $0x8c] sm:$0xf]  ;;  %v6919_v11 = vld [vmem:[%s12905_s8 + $0x40] sm:$0xf]  ;;  %v6929_v31 = vld [vmem:[%s12905_s8 + $0x58] sm:$0xf0] }
 0x1f1   :  { %v6993_v36 = vld [vmem:[%s12905_s8 + $0xd8] sm:$0xf0]  ;;  %v6920_v46 = vor.u32 %v8307_v21, %v6919_v11  ;;  %v8306_v28 = vld [vmem:[%s12905_s8 + $0x4c] sm:$0xf]  ;;  %v7660_v11 = vor.u32 %v8493_v18, %v7659_v15  ;;  %v7379_v21 = vld [vmem:[%s12907_s10 + $0x2d8] sm:$0xf] }
 0x1f2   :  { %3123 = vmatpush.bf16.msra.mxu0 %v6876_v26  ;;  %v8322_v26 = vld [vmem:[%s12905_s8 + $0xcc] sm:$0xf] }
 0x1f3   :  { %v8458_v15 = vld [vmem:[%s12907_s10 + $0x408] sm:$0xf0] }
 0x1f4   :  { %3362 = vmatpush.bf16.msrb.mxu1 %v6988_v32  ;;  %v8303_v32 = vld [vmem:[%s12905_s8 + $0x2c] sm:$0xf0] }
 0x1f6   :  { %3124 = vmatpush.bf16.msra.mxu0 %v6868_v38  ;;  %v6996_v38 = vor.u32 %v8322_v26, %v6993_v36 }
 0x1f8   :  { %v2577_v44 = vpop.f32.mrf.mxu0 }
 0x1f9   :  { %v2578_v45 = vadd.f32 %v2577_v44, %v2565_v43  ;;  %v6969_v43 = vld [vmem:[%s12905_s8 + $0xb0] sm:$0xf0] }
 0x1fa   :  { %3125 = vmatpush.bf16.msra.mxu0 %v6860_v27  ;;  %v6968_v27 = vor.u32 %v8319_v42, %v6967_v13  ;;  %v6972_v44 = vor.u32 %v8317_v30, %v6969_v43  ;;  %v6905_v13 = vld [vmem:[%s12905_s8 + $0x30] sm:$0xf0]  ;;  %v8304_v42 = vld [vmem:[%s12905_s8 + $0x34] sm:$0xf0] }
 0x1fb   :  { %v2635_v48 = vmax.f32 %v2578_v45, 0.0  ;;  %v6975_v45 = vld [vmem:[%s12905_s8 + $0xa8] sm:$0xf] }
 0x1fc   :  { %3350 = vmatpush.bf16.msrb.mxu3 %v6968_v27  ;;  %3363 = vmatpush.bf16.msrb.mxu1 %v6972_v44  ;;  %v6913_v27 = vld [vmem:[%s12905_s8 + $0x38] sm:$0xf0] }
 0x1fd   :  { %v2639_v60 = vpack.c.bf16 %v2635_v48, %v2635_v48 }
 0x1fe   :  { %3126 = vmatpush.bf16.msra.mxu0 %v6852_v34  ;;  %v6977_v34 = vld [vmem:[%s12905_s8 + $0xb8] sm:$0xf0] }
 0x1ff   :  { %3065 = vmatmul.bf16.vlgmr.msrb.gmra.mxu2 %v2639_v60  ;;  %3104 = vmatmul.bf16.vlgmr.msra.gmra.mxu1 %v2638_v0  ;;  %v8324_v0 = vld [vmem:[%s12905_s8 + $0xd4] sm:$0xf0] }
 0x200   :  { %v2616_v57 = vpop.f32.mrf.mxu2  ;;  %v2579_v17 = vpop.f32.mrf.mxu0  ;;  %3374 = vmatpush.bf16.msrb.mxu2 %v7008_v22  ;;  %v6992_v33 = vor.u32 %v8324_v0, %v6991_v40  ;;  %3351 = vmatpush.bf16.msrb.mxu3 %v6952_v50  ;;  %v6921_v22 = vld [vmem:[%s12905_s8 + $0x50] sm:$0xf0]  ;;  %v6932_v40 = vor.u32 %v8306_v28, %v6929_v31  ;;  %v6903_v0 = vld [vmem:[%s12905_s8 + $0x20] sm:$0xf]  ;;  %v7631_v28 = vld [vmem:[%s12907_s10 + $0x4d0] sm:$0xf] }
 0x201   :  { %v2617_v59 = vadd.f32 %v2616_v57, %v11029_v52  ;;  %v3136_v52 = vld [vmem:[%s12898_s1] sm:$0xf]  ;;  %v8320_v57 = vld [vmem:[%s12905_s8 + $0xb4] sm:$0xf0]  ;;  %v6959_v17 = vld [vmem:[%s12905_s8 + $0x88] sm:$0xf]  ;;  %v6924_v61 = vor.u32 %v8305_v2, %v6921_v22  ;;  %v6904_v36 = vor.u32 %v8303_v32, %v6903_v0 }
 0x202   :  { %3127 = vmatpush.bf16.msra.mxu0 %v6844_v39  ;;  %3138 = vst.msk [vmem:[#allocation2] sm:$0xf] %vm3137_vm1, %v3136_v52  ;;  %v6976_v48 = vor.u32 %v8320_v57, %v6975_v45  ;;  %v8313_v39 = vld [vmem:[%s12905_s8 + $0x84] sm:$0xf]  ;;  %v8312_v52 = vld [vmem:[%s12905_s8 + $0x74] sm:$0xf0] }
 0x203   :  { %v6887_v57 = vld [vmem:[%s12905_s8] sm:$0xf]  ;;  %v8423_v2 = vld [vmem:[%s12907_s10 + $0x2f0] sm:$0xf0]  ;;  %v8486_v31 = vld [vmem:[%s12907_s10 + $0x4e8] sm:$0xf0] }
 0x204   :  { %3375 = vmatpush.bf16.msrb.mxu2 %v6992_v33  ;;  %v8301_v33 = vld [vmem:[%s12905_s8 + $0x24] sm:$0xf]  ;;  %v8535_v22 = vld [vmem:[%s12907_s10 + $0x670] sm:$0xf0]  ;;  %v7632_v0 = vor.u32 %v8486_v31, %v7631_v28  ;;  %v7351_v32 = vld [vmem:[%s12907_s10 + $0x2a0] sm:$0xf] }
 0x205   :  { %v6908_v30 = vor.u32 %v8301_v33, %v6905_v13  ;;  %v8367_v13 = vld [vmem:[%s12907_s10 + $0x130] sm:$0xf0] }
 0x206   :  { %3128 = vmatpush.bf16.msra.mxu0 %v6836_v54  ;;  %v6956_v54 = vor.u32 %v8313_v39, %v6953_v51  ;;  %v6897_v51 = vld [vmem:[%s12905_s8 + $0x18] sm:$0xf0]  ;;  %v8451_v28 = vld [vmem:[%s12907_s10 + $0x3d0] sm:$0xf0] }
 0x208   :  { %v2618_v53 = vpop.f32.mrf.mxu2  ;;  %3376 = vmatpush.bf16.msrb.mxu2 %v6976_v48  ;;  %3364 = vmatpush.bf16.msrb.mxu1 %v6956_v54 }
 0x209   :  { %v8316_v53 = vld [vmem:[%s12905_s8 + $0x94] sm:$0xf0] }
 0x20a   :  { %3129 = vmatpush.bf16.msra.mxu0 %v6828_v58  ;;  %v6960_v56 = vor.u32 %v8316_v53, %v6959_v17  ;;  %v6961_v58 = vld [vmem:[%s12905_s8 + $0x98] sm:$0xf0] }
 0x20c   :  { %3377 = vmatpush.bf16.msrb.mxu2 %v6960_v56 }
 0x20f   :  { %3117 = vmatmul.bf16.vlgmr.msra.gmra.mxu2 %v2639_v60  ;;  %v6980_v60 = vor.u32 %v8318_v47, %v6977_v34  ;;  %v8299_v47 = vld [vmem:[%s12905_s8 + $0xc] sm:$0xf0] }
 0x210   :  { %v6888_v34 = vor.u32 %v8299_v47, %v6887_v57  ;;  %v8360_v47 = vld [vmem:[%s12907_s10 + $0xf8] sm:$0xf0] }
 0x218   :  { %v2629_v62 = vpop.f32.mrf.mxu0 }
 0x219   :  { %v2630_v1 = vadd.f32 %v2629_v62, %v2617_v59  ;;  %v11359_v59 = vld [vmem:[%s12904_s7] sm:$0x3]  ;;  %s8678_s7 = smov [#allocation7]  }
 0x21a   :  { %v2707_v19 = vperm.slane %v11359_v59, 0  ;;  %v2708_v56 = vperm.slane %v11359_v59, 1  ;;  %v7407_v59 = vld [vmem:[%s12907_s10 + $0x310] sm:$0xf]  ;;  %s5293_s1 = sshll.u32 %s8678_s7, 4  ;;  %s5294_s1 = int_to_ptr.vmem [resolvable:$true] %s5293_s1 }
 0x21b   :  { %v2636_v41 = vmax.f32 %v2630_v1, 0.0  ;;  %v6964_v1 = vor.u32 %v8314_v35, %v6961_v58  ;;  %v7435_v35 = vld [vmem:[%s12907_s10 + $0x348] sm:$0xf]  ;;  %v8437_v58 = vld [vmem:[%s12907_s10 + $0x360] sm:$0xf0] }
 0x21d   :  { %v2640_v3 = vpack.c.bf16 %v2636_v41, %v2636_v41  ;;  %v6935_v41 = vld [vmem:[%s12905_s8 + $0x60] sm:$0xf] }
 0x21f   :  { %3078 = vmatmul.bf16.vlgmr.msrb.gmra.mxu0 %v2640_v3 }
 0x220   :  { %v2631_v4 = vpop.f32.mrf.mxu0  ;;  %3387 = vmatpush.bf16.msrb.mxu0 %v7012_v5  ;;  %v8308_v5 = vld [vmem:[%s12905_s8 + $0x54] sm:$0xf0] }
 0x221   :  { %v8309_v4 = vld [vmem:[%s12905_s8 + $0x64] sm:$0xf]  ;;  %v6928_v25 = vor.u32 %v8308_v5, %v6927_v23  ;;  %v7183_v23 = vld [vmem:[%s12907_s10 + $0x150] sm:$0xf]  ;;  %v8374_v5 = vld [vmem:[%s12907_s10 + $0x168] sm:$0xf0] }
 0x224   :  { %3388 = vmatpush.bf16.msrb.mxu0 %v6996_v38  ;;  %v6911_v38 = vld [vmem:[%s12905_s8 + $0x28] sm:$0xf] }
 0x225   :  { %v6912_v43 = vor.u32 %v8304_v42, %v6911_v38  ;;  %v7603_v38 = vld [vmem:[%s12907_s10 + $0x498] sm:$0xf]  ;;  %v7799_v42 = vld [vmem:[%s12907_s10 + $0x620] sm:$0xf] }
 0x228   :  { %3389 = vmatpush.bf16.msrb.mxu0 %v6980_v60  ;;  %v6895_v60 = vld [vmem:[%s12905_s8 + $0x8] sm:$0xf] }
 0x229   :  { %v6896_v50 = vor.u32 %v8300_v55, %v6895_v60  ;;  %v8409_v60 = vld [vmem:[%s12907_s10 + $0x280] sm:$0xf0]  ;;  %v7771_v55 = vld [vmem:[%s12907_s10 + $0x5e8] sm:$0xf] }
 0x22c   :  { %3390 = vmatpush.bf16.msrb.mxu0 %v6964_v1  ;;  %v7436_v1 = vor.u32 %v8437_v58, %v7435_v35  ;;  %v8465_v35 = vld [vmem:[%s12907_s10 + $0x440] sm:$0xf0] }
 0x22f   :  { %3130 = vmatmul.bf16.vlgmr.msra.gmra.mxu0 %v2640_v3  ;;  %v8311_v3 = vld [vmem:[%s12905_s8 + $0x6c] sm:$0xf0] }
 0x230   :  { %3391 = vmatpush.bf16.msrb.mxu0 %v6948_v20 }
 0x234   :  { %3392 = vmatpush.bf16.msrb.mxu0 %v6932_v40  ;;  %v7380_v40 = vor.u32 %v8423_v2, %v7379_v21  ;;  %v8507_v21 = vld [vmem:[%s12907_s10 + $0x590] sm:$0xf0]  ;;  %v3139_v2 = vld [vmem:[#allocation2] sm:$0xf] }
 0x262   :  { %v11246_v6 = vpop.f32.mrf.mxu3 }
 0x263   :  { %v3041_v26 = vadd.f32 %v11246_v6, %v2707_v19  ;;  %v8302_v6 = vld [vmem:[%s12905_s8 + $0x2c] sm:$0xf] }
 0x264   :  { %v6916_v45 = vor.u32 %v8302_v6, %v6913_v27 }
 0x266   :  { %3393 = vmatpush.bf16.msrb.mxu0 %v6916_v45 }
 0x26a   :  { %v3042_v7 = vpop.f32.mrf.mxu3 }
 0x26b   :  { %v6936_v7 = vor.u32 %v8311_v3, %v6935_v41  ;;  %v8549_v41 = vld [vmem:[%s12907_s10 + $0x6e0] sm:$0xf0]  ;;  %v8430_v3 = vld [vmem:[%s12907_s10 + $0x328] sm:$0xf0] }
 0x26c   :  { %v11248_v8 = vpop.f32.mrf.mxu1 }
 0x26d   :  { %3352 = vmatpush.bf16.msrb.mxu3 %v6936_v7  ;;  %v3054_v44 = vadd.f32 %v11248_v8, %v3041_v26  ;;  %v6889_v8 = vld [vmem:[%s12905_s8 + $0x10] sm:$0xf0]  ;;  %v7855_v7 = vld [vmem:[%s12907_s10 + $0x690] sm:$0xf] }
 0x271   :  { %3353 = vmatpush.bf16.msrb.mxu3 %v6920_v46  ;;  %v7827_v46 = vld [vmem:[%s12907_s10 + $0x658] sm:$0xf] }
 0x272   :  { %v11250_v10 = vpop.f32.mrf.mxu3  ;;  %v7828_v26 = vor.u32 %v8535_v22, %v7827_v46 }
 0x274   :  { %v3055_v12 = vpop.f32.mrf.mxu1 }
 0x275   :  { %v6937_v12 = vld [vmem:[%s12905_s8 + $0x70] sm:$0xf0]  ;;  %3354 = vmatpush.bf16.msrb.mxu3 %v6904_v36  ;;  %v7155_v36 = vld [vmem:[%s12907_s10 + $0x118] sm:$0xf] }
 0x276   :  { %v6940_v63 = vor.u32 %v8309_v4, %v6937_v12  ;;  %v8542_v12 = vld [vmem:[%s12907_s10 + $0x6a8] sm:$0xf0]  ;;  %v7156_v6 = vor.u32 %v8367_v13, %v7155_v36  ;;  %v7437_v13 = vld [vmem:[%s12907_s10 + $0x364] sm:$0xf0] }
 0x277   :  { %v7856_v19 = vor.u32 %v8542_v12, %v7855_v7  ;;  %v7071_v12 = vld [vmem:[%s12907_s10 + $0x70] sm:$0xf]  ;;  %v8434_v36 = vld [vmem:[%s12907_s10 + $0x34c] sm:$0xf] }
 0x278   :  { %3365 = vmatpush.bf16.msrb.mxu1 %v6940_v63  ;;  %v7408_v63 = vor.u32 %v8430_v3, %v7407_v59  ;;  %v7743_v59 = vld [vmem:[%s12907_s10 + $0x5b0] sm:$0xf]  ;;  %v8514_v3 = vld [vmem:[%s12907_s10 + $0x5c8] sm:$0xf0] }
 0x279   :  { %3355 = vmatpush.bf16.msrb.mxu3 %v6888_v34  ;;  %v7744_v18 = vor.u32 %v8514_v3, %v7743_v59  ;;  %v8420_v59 = vld [vmem:[%s12907_s10 + $0x2dc] sm:$0xf]  ;;  %v7381_v3 = vld [vmem:[%s12907_s10 + $0x2f4] sm:$0xf0] }
 0x27a   :  { %v3094_v9 = vpop.f32.mrf.mxu3 }
 0x27b   :  { %v6943_v9 = vld [vmem:[%s12905_s8 + $0x68] sm:$0xf] }
 0x27c   :  { %v11261_v16 = vpop.f32.mrf.mxu1  ;;  %v6944_v14 = vor.u32 %v8312_v52, %v6943_v9  ;;  %3366 = vmatpush.bf16.msrb.mxu1 %v6924_v61  ;;  %v7211_v9 = vld [vmem:[%s12907_s10 + $0x188] sm:$0xf]  ;;  %v3093_v61 = vadd.f32 %v11250_v10, %v2708_v56  ;;  %v8416_v10 = vld [vmem:[%s12907_s10 + $0x2b8] sm:$0xf0] }
 0x27d   :  { %v7352_v57 = vor.u32 %v8416_v10, %v7351_v32  ;;  %v7547_v56 = vld [vmem:[%s12907_s10 + $0x428] sm:$0xf]  ;;  %v8388_v32 = vld [vmem:[%s12907_s10 + $0x1d8] sm:$0xf0] }
 0x27e   :  { %3378 = vmatpush.bf16.msrb.mxu2 %v6944_v14  ;;  %v8381_v14 = vld [vmem:[%s12907_s10 + $0x1a0] sm:$0xf0]  ;;  %v3106_v33 = vadd.f32 %v11261_v16, %v3093_v61  ;;  %v8528_v16 = vld [vmem:[%s12907_s10 + $0x638] sm:$0xf0]  ;;  %v7548_v7 = vor.u32 %v8465_v35, %v7547_v56  ;;  %v8339_v61 = vld [vmem:[%s12907_s10 + $0x50] sm:$0xf0] }
 0x27f   :  { %v7212_v20 = vor.u32 %v8381_v14, %v7211_v9  ;;  %v7800_v34 = vor.u32 %v8528_v16, %v7799_v42  ;;  %v7519_v14 = vld [vmem:[%s12907_s10 + $0x3f0] sm:$0xf]  ;;  %v7885_v42 = vld [vmem:[%s12907_s10 + $0x6e4] sm:$0xf0]  ;;  %v8371_v56 = vld [vmem:[%s12907_s10 + $0x154] sm:$0xf] }
 0x280   :  { %3367 = vmatpush.bf16.msrb.mxu1 %v6908_v30  ;;  %v8479_v30 = vld [vmem:[%s12907_s10 + $0x4b0] sm:$0xf0]  ;;  %v7520_v22 = vor.u32 %v8458_v15, %v7519_v14  ;;  %v7185_v35 = vld [vmem:[%s12907_s10 + $0x16c] sm:$0xf0]  ;;  %v8476_v14 = vld [vmem:[%s12907_s10 + $0x49c] sm:$0xf] }
 0x281   :  { %4832 = vmatpush.bf16.msra.mxu3 %v7212_v20  ;;  %v7604_v27 = vor.u32 %v8479_v30, %v7603_v38  ;;  %v8395_v20 = vld [vmem:[%s12907_s10 + $0x210] sm:$0xf0]  ;;  %v8546_v38 = vld [vmem:[%s12907_s10 + $0x6cc] sm:$0xf]  ;;  %v7605_v15 = vld [vmem:[%s12907_s10 + $0x4b4] sm:$0xf0] }
 0x282   :  { %v11309_v37 = vpop.f32.mrf.mxu2  ;;  %3379 = vmatpush.bf16.msrb.mxu2 %v6928_v25  ;;  %v7184_v25 = vor.u32 %v8374_v5, %v7183_v23  ;;  %v7043_v23 = vld [vmem:[%s12907_s10 + $0x38] sm:$0xf] }
 0x283   :  { %v3067_v48 = vadd.f32 %v11309_v37, %v3054_v44  ;;  %v8298_v37 = vld [vmem:[%s12905_s8 + $0xc] sm:$0xf]  ;;  %v7127_v44 = vld [vmem:[%s12907_s10 + $0xe0] sm:$0xf]  ;;  %v7044_v16 = vor.u32 %v8339_v61, %v7043_v23  ;;  %v8357_v23 = vld [vmem:[%s12907_s10 + $0xe4] sm:$0xf] }
 0x284   :  { %v3107_v49 = vpop.f32.mrf.mxu1  ;;  %v6900_v54 = vor.u32 %v8298_v37, %v6897_v51  ;;  %v7099_v51 = vld [vmem:[%s12907_s10 + $0xa8] sm:$0xf]  ;;  %v8469_v61 = vld [vmem:[%s12907_s10 + $0x464] sm:$0xf] }
 0x285   :  { %v8297_v49 = vld [vmem:[%s12905_s8 + $0x4] sm:$0xf]  ;;  %4833 = vmatpush.bf16.msra.mxu3 %v7184_v25  ;;  %v7491_v25 = vld [vmem:[%s12907_s10 + $0x3b8] sm:$0xf] }
 0x286   :  { %3380 = vmatpush.bf16.msrb.mxu2 %v6912_v43  ;;  %v6892_v39 = vor.u32 %v8297_v49, %v6889_v8  ;;  %3394 = vmatpush.bf16.msrb.mxu0 %v6900_v54  ;;  %v7575_v49 = vld [vmem:[%s12907_s10 + $0x460] sm:$0xf]  ;;  %v7323_v8 = vld [vmem:[%s12907_s10 + $0x268] sm:$0xf]  ;;  %v8353_v54 = vld [vmem:[%s12907_s10 + $0xc0] sm:$0xf0]  ;;  %v7492_v30 = vor.u32 %v8451_v28, %v7491_v25 }
 0x287   :  { %v7577_v25 = vld [vmem:[%s12907_s10 + $0x47c] sm:$0xf0] }
 0x288   :  { %3368 = vmatpush.bf16.msrb.mxu1 %v6892_v39 }
 0x289   :  { %4834 = vmatpush.bf16.msra.mxu3 %v7156_v6  ;;  %v7015_v6 = vld [vmem:[%s12907_s10] sm:$0xf] }
 0x28a   :  { %v3068_v62 = vpop.f32.mrf.mxu2  ;;  %3381 = vmatpush.bf16.msrb.mxu2 %v6896_v50  ;;  %v7128_v50 = vor.u32 %v8360_v47, %v7127_v44  ;;  %v7463_v44 = vld [vmem:[%s12907_s10 + $0x380] sm:$0xf] }
 0x28b   :  { %v7883_v62 = vld [vmem:[%s12907_s10 + $0x6c8] sm:$0xf] }
 0x28c   :  { %v7884_v4 = vor.u32 %v8549_v41, %v7883_v62  ;;  %4845 = vmatpush.bf16.msra.mxu1 %v7436_v1  ;;  %v7295_v1 = vld [vmem:[%s12907_s10 + $0x230] sm:$0xf]  ;;  %v8402_v41 = vld [vmem:[%s12907_s10 + $0x248] sm:$0xf0] }
 0x28d   :  { %4835 = vmatpush.bf16.msra.mxu3 %v7128_v50  ;;  %v7857_v50 = vld [vmem:[%s12907_s10 + $0x6ac] sm:$0xf0] }
 0x28e   :  { %4871 = vmatpush.bf16.msra.mxu0 %v7884_v4  ;;  %4858 = vmatpush.bf16.msra.mxu2 %v7660_v11  ;;  %v7100_v4 = vor.u32 %v8353_v54, %v7099_v51  ;;  %v7715_v11 = vld [vmem:[%s12907_s10 + $0x578] sm:$0xf] }
 0x290   :  { %4846 = vmatpush.bf16.msra.mxu1 %v7408_v63  ;;  %v8346_v63 = vld [vmem:[%s12907_s10 + $0x88] sm:$0xf0] }
 0x291   :  { %4836 = vmatpush.bf16.msra.mxu3 %v7100_v4  ;;  %v7072_v46 = vor.u32 %v8346_v63, %v7071_v12  ;;  %v8532_v4 = vld [vmem:[%s12907_s10 + $0x65c] sm:$0xf]  ;;  %v7188_v12 = vor.u32 %v8371_v56, %v7185_v35  ;;  %v7157_v63 = vld [vmem:[%s12907_s10 + $0x134] sm:$0xf0]  ;;  %v8497_v56 = vld [vmem:[%s12907_s10 + $0x544] sm:$0xf] }
 0x292   :  { %v11410_v29 = vpop.f32.mrf.mxu2  ;;  %4872 = vmatpush.bf16.msra.mxu0 %v7856_v19  ;;  %4859 = vmatpush.bf16.msra.mxu2 %v7632_v0  ;;  %v7267_v19 = vld [vmem:[%s12907_s10 + $0x1f8] sm:$0xf]  ;;  %v7239_v0 = vld [vmem:[%s12907_s10 + $0x1c0] sm:$0xf] }
 0x293   :  { %v3119_v43 = vadd.f32 %v11410_v29, %v3106_v33  ;;  %v8472_v29 = vld [vmem:[%s12907_s10 + $0x478] sm:$0xf0]  ;;  %v7268_v5 = vor.u32 %v8395_v20, %v7267_v19  ;;  %v7687_v33 = vld [vmem:[%s12907_s10 + $0x540] sm:$0xf]  ;;  %v8413_v20 = vld [vmem:[%s12907_s10 + $0x2a4] sm:$0xf] }
 0x294   :  { %4847 = vmatpush.bf16.msra.mxu1 %v7380_v40  ;;  %v7576_v37 = vor.u32 %v8472_v29, %v7575_v49  ;;  %v7716_v40 = vor.u32 %v8507_v21, %v7715_v11  ;;  %v7240_v49 = vor.u32 %v8388_v32, %v7239_v0  ;;  %v7353_v11 = vld [vmem:[%s12907_s10 + $0x2bc] sm:$0xf0]  ;;  %v8525_v21 = vld [vmem:[%s12907_s10 + $0x624] sm:$0xf]  ;;  %v7325_v0 = vld [vmem:[%s12907_s10 + $0x284] sm:$0xf0] }
 0x295   :  { %4837 = vmatpush.bf16.msra.mxu3 %v7072_v46  ;;  %v7356_v28 = vor.u32 %v8413_v20, %v7353_v11  ;;  %v8518_v32 = vld [vmem:[%s12907_s10 + $0x5ec] sm:$0xf] }
 0x296   :  { %4873 = vmatpush.bf16.msra.mxu0 %v7828_v26  ;;  %4860 = vmatpush.bf16.msra.mxu2 %v7604_v27  ;;  %v8500_v26 = vld [vmem:[%s12907_s10 + $0x558] sm:$0xf0] }
 0x297   :  { %v8332_v27 = vld [vmem:[%s12907_s10 + $0x18] sm:$0xf0]  ;;  %v7688_v29 = vor.u32 %v8500_v26, %v7687_v33  ;;  %v7580_v26 = vor.u32 %v8469_v61, %v7577_v25  ;;  %v8550_v61 = vld [vmem:[%s12907_s10 + $0x6e8] sm:$0xf0] }
 0x298   :  { %4848 = vmatpush.bf16.msra.mxu1 %v7352_v57  ;;  %v7213_v57 = vld [vmem:[%s12907_s10 + $0x1a4] sm:$0xf0] }
 0x299   :  { %4838 = vmatpush.bf16.msra.mxu3 %v7044_v16  ;;  %v8511_v16 = vld [vmem:[%s12907_s10 + $0x5b4] sm:$0xf] }
 0x29a   :  { %v3120_v53 = vpop.f32.mrf.mxu2  ;;  %4874 = vmatpush.bf16.msra.mxu0 %v7800_v34  ;;  %4861 = vmatpush.bf16.msra.mxu2 %v7576_v37  ;;  %v7661_v34 = vld [vmem:[%s12907_s10 + $0x524] sm:$0xf0]  ;;  %v7016_v37 = vor.u32 %v8332_v27, %v7015_v6  ;;  %v8350_v27 = vld [vmem:[%s12907_s10 + $0xac] sm:$0xf] }
 0x29b   :  { %v7324_v53 = vor.u32 %v8409_v60, %v7323_v8  ;;  %v7440_v8 = vor.u32 %v8434_v36, %v7437_v13  ;;  %v7888_v60 = vor.u32 %v8546_v38, %v7885_v42  ;;  %v8399_v38 = vld [vmem:[%s12907_s10 + $0x234] sm:$0xf]  ;;  %v7297_v42 = vld [vmem:[%s12907_s10 + $0x24c] sm:$0xf0] }
 0x29c   :  { %v3079_v24 = vpop.f32.mrf.mxu0 }
 0x29d   :  { %v11463_v17 = vadd.f32 %v3079_v24, %v3067_v48  ;;  %v8521_v24 = vld [vmem:[%s12907_s10 + $0x600] sm:$0xf0]  ;;  %4849 = vmatpush.bf16.msra.mxu1 %v7324_v53  ;;  %4839 = vmatpush.bf16.msra.mxu3 %v7016_v37  ;;  %v7521_v37 = vld [vmem:[%s12907_s10 + $0x40c] sm:$0xf0] }
 0x29e   :  { %v7772_v62 = vor.u32 %v8521_v24, %v7771_v55  ;;  %4862 = vmatpush.bf16.msra.mxu2 %v7548_v7  ;;  %v8427_v55 = vld [vmem:[%s12907_s10 + $0x314] sm:$0xf]  ;;  %v7409_v24 = vld [vmem:[%s12907_s10 + $0x32c] sm:$0xf0]  ;;  %v7829_v7 = vld [vmem:[%s12907_s10 + $0x674] sm:$0xf0] }
 0x29f   :  { %5264 = vst.msk [vmem:[#allocation7] sm:$0xf] %vm3137_vm1, %v11463_v17  ;;  %v7832_v19 = vor.u32 %v8532_v4, %v7829_v7  ;;  %v7493_v4 = vld [vmem:[%s12907_s10 + $0x3d4] sm:$0xf0] }
 0x2a0   :  { %4875 = vmatpush.bf16.msra.mxu0 %v7772_v62  ;;  %v7633_v62 = vld [vmem:[%s12907_s10 + $0x4ec] sm:$0xf0] }
 0x2a2   :  { %4863 = vmatpush.bf16.msra.mxu2 %v7520_v22  ;;  %v7608_v22 = vor.u32 %v8476_v14, %v7605_v15  ;;  %v7465_v14 = vld [vmem:[%s12907_s10 + $0x39c] sm:$0xf0] }
 0x2a4   :  { %v3081_v52 = vpop.f32.mrf.mxu0  ;;  %4876 = vmatpush.bf16.msra.mxu0 %v7744_v18  ;;  %v7384_v18 = vor.u32 %v8420_v59, %v7381_v3  ;;  %v8448_v59 = vld [vmem:[%s12907_s10 + $0x3bc] sm:$0xf] }
 0x2a5   :  { %v7296_v52 = vor.u32 %v8402_v41, %v7295_v1  ;;  %v7412_v1 = vor.u32 %v8427_v55, %v7409_v24  ;;  %v8343_v55 = vld [vmem:[%s12907_s10 + $0x74] sm:$0xf]  ;;  %v7073_v24 = vld [vmem:[%s12907_s10 + $0x8c] sm:$0xf0]  ;;  %v7496_v7 = vor.u32 %v8448_v59, %v7493_v4  ;;  %v8529_v4 = vld [vmem:[%s12907_s10 + $0x640] sm:$0xf0] }
 0x2a6   :  { %4864 = vmatpush.bf16.msra.mxu2 %v7492_v30  ;;  %v7745_v30 = vld [vmem:[%s12907_s10 + $0x5cc] sm:$0xf0] }
 0x2a7   :  { %4850 = vmatpush.bf16.msra.mxu1 %v7296_v52  ;;  %v8364_v52 = vld [vmem:[%s12907_s10 + $0x11c] sm:$0xf]  ;;  %v7748_v6 = vor.u32 %v8511_v16, %v7745_v30 }
 0x2a8   :  { %4877 = vmatpush.bf16.msra.mxu0 %v7716_v40  ;;  %v7160_v46 = vor.u32 %v8364_v52, %v7157_v63  ;;  %v8406_v40 = vld [vmem:[%s12907_s10 + $0x26c] sm:$0xf]  ;;  %v8441_v63 = vld [vmem:[%s12907_s10 + $0x384] sm:$0xf] }
 0x2a9   :  { %v7328_v36 = vor.u32 %v8406_v40, %v7325_v0  ;;  %v7468_v15 = vor.u32 %v8441_v63, %v7465_v14  ;;  %v7611_v14 = vld [vmem:[%s12907_s10 + $0x4a0] sm:$0xf] }
 0x2ab   :  { %4851 = vmatpush.bf16.msra.mxu1 %v7268_v5  ;;  %v7129_v5 = vld [vmem:[%s12907_s10 + $0xfc] sm:$0xf0] }
 0x2ac   :  { %v3131_v45 = vpop.f32.mrf.mxu0  ;;  %4878 = vmatpush.bf16.msra.mxu0 %v7688_v29  ;;  %v7132_v33 = vor.u32 %v8357_v23, %v7129_v5  ;;  %v7269_v29 = vld [vmem:[%s12907_s10 + $0x214] sm:$0xf0]  ;;  %v7891_v5 = vld [vmem:[%s12907_s10 + $0x6d0] sm:$0xf] }
 0x2ad   :  { %v3132_v48 = vadd.f32 %v3131_v45, %v3119_v43  ;;  %v8444_v45 = vld [vmem:[%s12907_s10 + $0x398] sm:$0xf0] }
 0x2ae   :  { %v7464_v51 = vor.u32 %v8444_v45, %v7463_v44  ;;  %v7101_v44 = vld [vmem:[%s12907_s10 + $0xc4] sm:$0xf0]  ;;  %v8462_v45 = vld [vmem:[%s12907_s10 + $0x42c] sm:$0xf] }
 0x2af   :  { %v3140_v39 = vmul.f32 0.5, %v3132_v48  ;;  %5265 = vst.msk [vmem:[#allocation8] sm:$0xf] %vm3137_vm1, %v3132_v48  ;;  %v8490_v48 = vld [vmem:[%s12907_s10 + $0x50c] sm:$0xf]  ;;  %4852 = vmatpush.bf16.msra.mxu1 %v7240_v49 }
 0x2b0   :  { %v7664_v54 = vor.u32 %v8490_v48, %v7661_v34  ;;  %4865 = vmatpush.bf16.msra.mxu2 %v7464_v51  ;;  %v8392_v49 = vld [vmem:[%s12907_s10 + $0x1fc] sm:$0xf] }
 0x2b1   :  { %v3141_v58 = vmul.f32 1.442695, %v3140_v39  ;;  %v8539_v39 = vld [vmem:[%s12907_s10 + $0x694] sm:$0xf]  ;;  %v7272_v48 = vor.u32 %v8392_v49, %v7269_v29  ;;  %v8504_v34 = vld [vmem:[%s12907_s10 + $0x57c] sm:$0xf] }
 0x2b2   :  { %v7860_v41 = vor.u32 %v8539_v39, %v7857_v50  ;;  %v8455_v39 = vld [vmem:[%s12907_s10 + $0x3f4] sm:$0xf]  ;;  %v7076_v50 = vor.u32 %v8343_v55, %v7073_v24  ;;  %v7835_v55 = vld [vmem:[%s12907_s10 + $0x660] sm:$0xf]  ;;  %v8536_v24 = vld [vmem:[%s12907_s10 + $0x678] sm:$0xf0] }
 0x2b3   :  { %8558 = vpow2.f32 %v3141_v58  ;;  %v8483_v58 = vld [vmem:[%s12907_s10 + $0x4d4] sm:$0xf]  ;;  %v7524_v51 = vor.u32 %v8455_v39, %v7521_v37  ;;  %v7191_v37 = vld [vmem:[%s12907_s10 + $0x158] sm:$0xf] }
 0x2b4   :  { %v3133_v9 = vpop.f32.mrf.mxu0 }
 0x2b5   :  { %v7636_v9 = vor.u32 %v8483_v58, %v7633_v62  ;;  %v7689_v58 = vld [vmem:[%s12907_s10 + $0x55c] sm:$0xf0] }
 0x2b6   :  { %v7692_v62 = vor.u32 %v8497_v56, %v7689_v58  ;;  %v7639_v56 = vld [vmem:[%s12907_s10 + $0x4d8] sm:$0xf]  ;;  %v7836_v58 = vor.u32 %v8536_v24, %v7835_v55  ;;  %v8389_v55 = vld [vmem:[%s12907_s10 + $0x1e0] sm:$0xf0]  ;;  %v7695_v24 = vld [vmem:[%s12907_s10 + $0x548] sm:$0xf] }
 0x2b9   :  { %v8559_v31 = vpop.eup %8558 }
 0x2ba   :  { %v3143_v10 = vmul.f32 %v8559_v31, %v3139_v2  ;;  %v7801_v2 = vld [vmem:[%s12907_s10 + $0x63c] sm:$0xf0] }
 0x2bb   :  { %v7804_v31 = vor.u32 %v8525_v21, %v7801_v2 }
 0x2bc   :  { %v3144_v43 = vadd.f32 %v3143_v10, %v11463_v17  ;;  %v8378_v17 = vld [vmem:[%s12907_s10 + $0x18c] sm:$0xf]  ;;  %v7773_v10 = vld [vmem:[%s12907_s10 + $0x604] sm:$0xf0] }
 0x2bd   :  { %v7216_v53 = vor.u32 %v8378_v17, %v7213_v57  ;;  %v7776_v13 = vor.u32 %v8518_v32, %v7773_v10  ;;  %v7104_v17 = vor.u32 %v8350_v27, %v7101_v44  ;;  %v7549_v57 = vld [vmem:[%s12907_s10 + $0x444] sm:$0xf0]  ;;  %v7892_v10 = vor.u32 %v8550_v61, %v7891_v5 }
 0x2be   :  { %5263 = vst.msk [vmem:[#allocation5] sm:$0xf] %vm3137_vm1, %v3144_v43  ;;  %v3145_v47 = vpack.c.bf16 %v3144_v43, %v3144_v43  ;;  %v7300_v43 = vor.u32 %v8399_v38, %v7297_v42  ;;  %v7863_v38 = vld [vmem:[%s12907_s10 + $0x698] sm:$0xf]  ;;  %v8543_v42 = vld [vmem:[%s12907_s10 + $0x6b0] sm:$0xf0] }
 0x2bf   :  { %v7864_v29 = vor.u32 %v8543_v42, %v7863_v38  ;;  %v7583_v61 = vld [vmem:[%s12907_s10 + $0x468] sm:$0xf]  ;;  %v8354_v38 = vld [vmem:[%s12907_s10 + $0xc8] sm:$0xf0]  ;;  %5287 = dma.vmem_to_hbm [thread:$0]  %s5283_s20, 64, %s5285_s2, [#allocation6]  }
 0x2c0   :  { %3356 = vmatmul.bf16.vlgmr.msrb.gmra.mxu3 %v3145_v47  ;;  %3369 = vmatmul.bf16.vlgmr.msrb.gmra.mxu1 %v3145_v47  ;;  %5298 = dma.vmem_to_hbm [thread:$0]  %s5294_s1, 64, %s5296_s22, [#allocation6]  }
 0x2c1   :  { %3382 = vmatmul.bf16.vlgmr.msrb.gmra.mxu2 %v3145_v47  ;;  %3395 = vmatmul.bf16.vlgmr.msrb.gmra.mxu0 %v3145_v47  ;;  %v7552_v47 = vor.u32 %v8462_v45, %v7549_v57  ;;  %v8494_v57 = vld [vmem:[%s12907_s10 + $0x528] sm:$0xf0] }
 0x2c2   :  { %4897 = vmatpush.bf16.msrb.mxu1 %v7440_v8  ;;  %4923 = vmatpush.bf16.msrb.mxu0 %v7888_v60  ;;  %v7717_v8 = vld [vmem:[%s12907_s10 + $0x594] sm:$0xf0] }
 0x2c3   :  { %4884 = vmatpush.bf16.msrb.mxu3 %v7216_v53  ;;  %4910 = vmatpush.bf16.msrb.mxu2 %v7664_v54  ;;  %v7720_v60 = vor.u32 %v8504_v34, %v7717_v8  ;;  %v8385_v53 = vld [vmem:[%s12907_s10 + $0x1c4] sm:$0xf]  ;;  %v7241_v54 = vld [vmem:[%s12907_s10 + $0x1dc] sm:$0xf0]  ;;  %v8424_v34 = vld [vmem:[%s12907_s10 + $0x2f8] sm:$0xf0] }
 0x2c4   :  { %v7244_v35 = vor.u32 %v8385_v53, %v7241_v54 }
 0x2c6   :  { %4898 = vmatpush.bf16.msrb.mxu1 %v7412_v1  ;;  %4924 = vmatpush.bf16.msrb.mxu0 %v7860_v41  ;;  %v8336_v1 = vld [vmem:[%s12907_s10 + $0x3c] sm:$0xf]  ;;  %v7045_v41 = vld [vmem:[%s12907_s10 + $0x54] sm:$0xf0] }
 0x2c7   :  { %4885 = vmatpush.bf16.msrb.mxu3 %v7188_v12  ;;  %4911 = vmatpush.bf16.msrb.mxu2 %v7636_v9  ;;  %v7048_v3 = vor.u32 %v8336_v1, %v7045_v41  ;;  %v8329_v12 = vld [vmem:[%s12907_s10 + $0x4] sm:$0xf]  ;;  %v7017_v9 = vld [vmem:[%s12907_s10 + $0x1c] sm:$0xf0] }
 0x2c8   :  { %v7020_v52 = vor.u32 %v8329_v12, %v7017_v9  ;;  %v8417_v1 = vld [vmem:[%s12907_s10 + $0x2c0] sm:$0xf0]  ;;  %v7163_v9 = vld [vmem:[%s12907_s10 + $0x120] sm:$0xf] }
 0x2ca   :  { %4899 = vmatpush.bf16.msrb.mxu1 %v7384_v18  ;;  %4925 = vmatpush.bf16.msrb.mxu0 %v7832_v19  ;;  %v3178_v18 = vld [vmem:[%s12906_s9] sm:$0xf] }
 0x2cb   :  { %4886 = vmatpush.bf16.msrb.mxu3 %v7160_v46  ;;  %4912 = vmatpush.bf16.msrb.mxu2 %v7608_v22  ;;  %v3181_v19 = vperm.slane %v3178_v18, 1  ;;  %v3183_v20 = vperm.slane %v3178_v18, 3  ;;  %v7443_v46 = vld [vmem:[%s12907_s10 + $0x350] sm:$0xf]  ;;  %v8438_v22 = vld [vmem:[%s12907_s10 + $0x368] sm:$0xf0] }
 0x2cc   :  { %v3182_v40 = vperm.slane %v3178_v18, 2  ;;  %v7444_v0 = vor.u32 %v8438_v22, %v7443_v46  ;;  %v7135_v22 = vld [vmem:[%s12907_s10 + $0xe8] sm:$0xf] }
 0x2ce   :  { %4900 = vmatpush.bf16.msrb.mxu1 %v7356_v28  ;;  %4926 = vmatpush.bf16.msrb.mxu0 %v7804_v31  ;;  %v3180_v28 = vperm.slane %v3178_v18, 0 }
 0x2cf   :  { %4887 = vmatpush.bf16.msrb.mxu3 %v7132_v33  ;;  %4913 = vmatpush.bf16.msrb.mxu2 %v7580_v26  ;;  %v7415_v33 = vld [vmem:[%s12907_s10 + $0x318] sm:$0xf]  ;;  %v8431_v26 = vld [vmem:[%s12907_s10 + $0x330] sm:$0xf0] }
 0x2d0   :  { %v7416_v45 = vor.u32 %v8431_v26, %v7415_v33  ;;  %v8515_v33 = vld [vmem:[%s12907_s10 + $0x5d0] sm:$0xf0] }
 0x2d2   :  { %4901 = vmatpush.bf16.msrb.mxu1 %v7328_v36  ;;  %4927 = vmatpush.bf16.msrb.mxu0 %v7776_v13 }
 0x2d3   :  { %4888 = vmatpush.bf16.msrb.mxu3 %v7104_v17  ;;  %4914 = vmatpush.bf16.msrb.mxu2 %v7552_v47  ;;  %v7667_v17 = vld [vmem:[%s12907_s10 + $0x510] sm:$0xf] }
 0x2d6   :  { %4902 = vmatpush.bf16.msrb.mxu1 %v7300_v43  ;;  %4928 = vmatpush.bf16.msrb.mxu0 %v7748_v6  ;;  %v7219_v43 = vld [vmem:[%s12907_s10 + $0x190] sm:$0xf]  ;;  %v8382_v6 = vld [vmem:[%s12907_s10 + $0x1a8] sm:$0xf0] }
 0x2d7   :  { %4889 = vmatpush.bf16.msrb.mxu3 %v7076_v50  ;;  %4915 = vmatpush.bf16.msrb.mxu2 %v7524_v51  ;;  %v7668_v50 = vor.u32 %v8494_v57, %v7667_v17  ;;  %v8375_v51 = vld [vmem:[%s12907_s10 + $0x170] sm:$0xf0]  ;;  %v8508_v17 = vld [vmem:[%s12907_s10 + $0x598] sm:$0xf0] }
 0x2d8   :  { %v7192_v59 = vor.u32 %v8375_v51, %v7191_v37  ;;  %v8435_v51 = vld [vmem:[%s12907_s10 + $0x354] sm:$0xf] }
 0x2da   :  { %4903 = vmatpush.bf16.msrb.mxu1 %v7272_v48  ;;  %4929 = vmatpush.bf16.msrb.mxu0 %v7720_v60  ;;  %v7387_v48 = vld [vmem:[%s12907_s10 + $0x2e0] sm:$0xf]  ;;  %v7220_v60 = vor.u32 %v8382_v6, %v7219_v43 }
 0x2db   :  { %4890 = vmatpush.bf16.msrb.mxu3 %v7048_v3  ;;  %4916 = vmatpush.bf16.msrb.mxu2 %v7496_v7  ;;  %v7388_v54 = vor.u32 %v8424_v34, %v7387_v48  ;;  %v7807_v3 = vld [vmem:[%s12907_s10 + $0x628] sm:$0xf]  ;;  %v7275_v6 = vld [vmem:[%s12907_s10 + $0x200] sm:$0xf]  ;;  %v7527_v48 = vld [vmem:[%s12907_s10 + $0x3f8] sm:$0xf] }
 0x2dc   :  { %v7808_v18 = vor.u32 %v8529_v4, %v7807_v3  ;;  %v8459_v34 = vld [vmem:[%s12907_s10 + $0x410] sm:$0xf0]  ;;  %v8452_v3 = vld [vmem:[%s12907_s10 + $0x3d8] sm:$0xf0] }
 0x2de   :  { %4904 = vmatpush.bf16.msrb.mxu1 %v7244_v35  ;;  %4930 = vmatpush.bf16.msrb.mxu0 %v7692_v62  ;;  %v8487_v35 = vld [vmem:[%s12907_s10 + $0x4f0] sm:$0xf0]  ;;  %v7359_v62 = vld [vmem:[%s12907_s10 + $0x2a8] sm:$0xf] }
 0x2df   :  { %4891 = vmatpush.bf16.msrb.mxu3 %v7020_v52  ;;  %4917 = vmatpush.bf16.msrb.mxu2 %v7468_v15  ;;  %v7640_v12 = vor.u32 %v8487_v35, %v7639_v56  ;;  %v8368_v52 = vld [vmem:[%s12907_s10 + $0x138] sm:$0xf0]  ;;  %v7360_v63 = vor.u32 %v8417_v1, %v7359_v62  ;;  %v8547_v56 = vld [vmem:[%s12907_s10 + $0x6d4] sm:$0xf]  ;;  %v7528_v35 = vor.u32 %v8459_v34, %v7527_v48  ;;  %v7051_v62 = vld [vmem:[%s12907_s10 + $0x40] sm:$0xf] }
 0x2e0   :  { %v8480_v15 = vld [vmem:[%s12907_s10 + $0x4b8] sm:$0xf0]  ;;  %v8477_v48 = vld [vmem:[%s12907_s10 + $0x4a4] sm:$0xf]  ;;  %v7613_v34 = vld [vmem:[%s12907_s10 + $0x4bc] sm:$0xf0] }
 0x2e1   :  { %v7612_v46 = vor.u32 %v8480_v15, %v7611_v14  ;;  %v8340_v1 = vld [vmem:[%s12907_s10 + $0x58] sm:$0xf0]  ;;  %v7865_v15 = vld [vmem:[%s12907_s10 + $0x6b4] sm:$0xf0] }
 0x2e2   :  { %v8540_v14 = vld [vmem:[%s12907_s10 + $0x69c] sm:$0xf] }
 0x33d   :  { %v3370_v11 = vpop.f32.mrf.mxu1 }
 0x33e   :  { %v3371_v21 = vadd.f32 %v3370_v11, %v3181_v19  ;;  %v3396_v2 = vpop.f32.mrf.mxu0  ;;  %v7331_v19 = vld [vmem:[%s12907_s10 + $0x270] sm:$0xf]  ;;  %v7164_v11 = vor.u32 %v8368_v52, %v7163_v9  ;;  %v7052_v52 = vor.u32 %v8340_v1, %v7051_v62  ;;  %v7585_v62 = vld [vmem:[%s12907_s10 + $0x484] sm:$0xf0] }
 0x33f   :  { %v3397_v23 = vadd.f32 %v3396_v2, %v3183_v20  ;;  %v8410_v20 = vld [vmem:[%s12907_s10 + $0x288] sm:$0xf0] }
 0x340   :  { %v3401_v25 = vmax.f32 %v3371_v21, 0.0  ;;  %v7779_v21 = vld [vmem:[%s12907_s10 + $0x5f0] sm:$0xf]  ;;  %v8522_v2 = vld [vmem:[%s12907_s10 + $0x608] sm:$0xf0]  ;;  %v7332_v5 = vor.u32 %v8410_v20, %v7331_v19 }
 0x341   :  { %v3403_v31 = vmax.f32 %v3397_v23, 0.0  ;;  %v8361_v23 = vld [vmem:[%s12907_s10 + $0x100] sm:$0xf0]  ;;  %v7023_v19 = vld [vmem:[%s12907_s10 + $0x8] sm:$0xf] }
 0x342   :  { %v11873_v32 = vpack.c.bf16 %v3401_v25, %v3401_v25  ;;  %v8473_v25 = vld [vmem:[%s12907_s10 + $0x480] sm:$0xf0] }
 0x343   :  { %v11881_v36 = vpack.c.bf16 %v3403_v31, %v3403_v31  ;;  %v3357_v13 = vpop.f32.mrf.mxu3  ;;  %v7303_v31 = vld [vmem:[%s12907_s10 + $0x238] sm:$0xf]  ;;  %v7584_v26 = vor.u32 %v8473_v25, %v7583_v61  ;;  %v8333_v20 = vld [vmem:[%s12907_s10 + $0x20] sm:$0xf0]  ;;  %v7868_v61 = vor.u32 %v8540_v14, %v7865_v15  ;;  %v8463_v14 = vld [vmem:[%s12907_s10 + $0x434] sm:$0xf] }
 0x344   :  { %v3358_v16 = vadd.f32 %v3357_v13, %v3180_v28  ;;  %v3383_v30 = vpop.f32.mrf.mxu2  ;;  %4853 = vmatmul.bf16.vlgmr.msra.gmra.mxu1 %v11873_v32  ;;  %v7780_v28 = vor.u32 %v8522_v2, %v7779_v21  ;;  %v7107_v13 = vld [vmem:[%s12907_s10 + $0xb0] sm:$0xf]  ;;  %v8445_v21 = vld [vmem:[%s12907_s10 + $0x3a0] sm:$0xf0]  ;;  %v8379_v2 = vld [vmem:[%s12907_s10 + $0x194] sm:$0xf]  ;;  %v7024_v25 = vor.u32 %v8333_v20, %v7023_v19 }
 0x345   :  { %v3384_v27 = vadd.f32 %v3383_v30, %v3182_v40  ;;  %4879 = vmatmul.bf16.vlgmr.msra.gmra.mxu0 %v11881_v36  ;;  %4949 = vmatpush.bf16.msra.mxu1 %v7444_v0  ;;  %v3372_v44 = vpop.f32.mrf.mxu1  ;;  %v8403_v40 = vld [vmem:[%s12907_s10 + $0x250] sm:$0xf0]  ;;  %v7136_v0 = vor.u32 %v8361_v23, %v7135_v22  ;;  %v8466_v30 = vld [vmem:[%s12907_s10 + $0x448] sm:$0xf0]  ;;  %v7557_v15 = vld [vmem:[%s12907_s10 + $0x44c] sm:$0xf0] }
 0x346   :  { %v3400_v47 = vmax.f32 %v3358_v16, 0.0  ;;  %4975 = vmatpush.bf16.msra.mxu0 %v7892_v10  ;;  %v3398_v49 = vpop.f32.mrf.mxu0  ;;  %v7751_v10 = vld [vmem:[%s12907_s10 + $0x5b8] sm:$0xf]  ;;  %v7304_v42 = vor.u32 %v8403_v40, %v7303_v31  ;;  %v7555_v16 = vld [vmem:[%s12907_s10 + $0x430] sm:$0xf]  ;;  %v7108_v44 = vor.u32 %v8354_v38, %v7107_v13 }
 0x347   :  { %v3402_v8 = vmax.f32 %v3384_v27, 0.0  ;;  %v7752_v43 = vor.u32 %v8515_v33, %v7751_v10  ;;  %v8396_v27 = vld [vmem:[%s12907_s10 + $0x218] sm:$0xf0]  ;;  %v7556_v57 = vor.u32 %v8466_v30, %v7555_v16  ;;  %v8347_v49 = vld [vmem:[%s12907_s10 + $0x90] sm:$0xf0] }
 0x348   :  { %v11915_v39 = vpack.c.bf16 %v3400_v47, %v3400_v47  ;;  %v7079_v47 = vld [vmem:[%s12907_s10 + $0x78] sm:$0xf]  ;;  %v8491_v23 = vld [vmem:[%s12907_s10 + $0x514] sm:$0xf]  ;;  %v7389_v31 = vld [vmem:[%s12907_s10 + $0x2fc] sm:$0xf0] }
 0x349   :  { %v11923_v53 = vpack.c.bf16 %v3402_v8, %v3402_v8  ;;  %4950 = vmatpush.bf16.msra.mxu1 %v7416_v45  ;;  %v7723_v45 = vld [vmem:[%s12907_s10 + $0x580] sm:$0xf]  ;;  %v7247_v8 = vld [vmem:[%s12907_s10 + $0x1c8] sm:$0xf]  ;;  %v7080_v37 = vor.u32 %v8347_v49, %v7079_v47  ;;  %v8533_v10 = vld [vmem:[%s12907_s10 + $0x664] sm:$0xf] }
 0x34a   :  { %4976 = vmatpush.bf16.msra.mxu0 %v7864_v29  ;;  %4840 = vmatmul.bf16.vlgmr.msra.gmra.mxu3 %v11915_v39  ;;  %v7276_v29 = vor.u32 %v8396_v27, %v7275_v6  ;;  %v7837_v33 = vld [vmem:[%s12907_s10 + $0x67c] sm:$0xf0]  ;;  %v8372_v13 = vld [vmem:[%s12907_s10 + $0x15c] sm:$0xf]  ;;  %v7193_v38 = vld [vmem:[%s12907_s10 + $0x174] sm:$0xf0] }
 0x34b   :  { %4866 = vmatmul.bf16.vlgmr.msra.gmra.mxu2 %v11923_v53  ;;  %4936 = vmatpush.bf16.msra.mxu3 %v7220_v60  ;;  %v3359_v41 = vpop.f32.mrf.mxu3  ;;  %v7724_v60 = vor.u32 %v8508_v17, %v7723_v45  ;;  %v8484_v16 = vld [vmem:[%s12907_s10 + $0x4dc] sm:$0xf]  ;;  %v7641_v30 = vld [vmem:[%s12907_s10 + $0x4f4] sm:$0xf0]  ;;  %v8414_v6 = vld [vmem:[%s12907_s10 + $0x2ac] sm:$0xf] }
 0x34c   :  { %4962 = vmatpush.bf16.msra.mxu2 %v7668_v50  ;;  %v3385_v7 = vpop.f32.mrf.mxu2  ;;  %v8501_v50 = vld [vmem:[%s12907_s10 + $0x560] sm:$0xf0]  ;;  %v7248_v41 = vor.u32 %v8389_v55, %v7247_v8  ;;  %v7361_v27 = vld [vmem:[%s12907_s10 + $0x2c4] sm:$0xf0]  ;;  %v8526_v45 = vld [vmem:[%s12907_s10 + $0x62c] sm:$0xf] }
 0x34d   :  { %4951 = vmatpush.bf16.msra.mxu1 %v7388_v54  ;;  %v7445_v54 = vld [vmem:[%s12907_s10 + $0x36c] sm:$0xf0]  ;;  %v7696_v4 = vor.u32 %v8501_v50, %v7695_v24  ;;  %v7809_v17 = vld [vmem:[%s12907_s10 + $0x644] sm:$0xf0]  ;;  %v8365_v47 = vld [vmem:[%s12907_s10 + $0x124] sm:$0xf] }
 0x34e   :  { %4977 = vmatpush.bf16.msra.mxu0 %v7836_v58  ;;  %v7893_v58 = vld [vmem:[%s12907_s10 + $0x6ec] sm:$0xf0]  ;;  %v7448_v7 = vor.u32 %v8435_v51, %v7445_v54  ;;  %v7165_v49 = vld [vmem:[%s12907_s10 + $0x13c] sm:$0xf0]  ;;  %v7812_v8 = vor.u32 %v8526_v45, %v7809_v17  ;;  %v8519_v50 = vld [vmem:[%s12907_s10 + $0x5f4] sm:$0xf]  ;;  %v7616_v51 = vor.u32 %v8477_v48, %v7613_v34 }
 0x34f   :  { %4937 = vmatpush.bf16.msra.mxu3 %v7192_v59  ;;  %v7499_v59 = vld [vmem:[%s12907_s10 + $0x3c0] sm:$0xf]  ;;  %v7896_v9 = vor.u32 %v8547_v56, %v7893_v58  ;;  %v7333_v55 = vld [vmem:[%s12907_s10 + $0x28c] sm:$0xf0]  ;;  %v7168_v24 = vor.u32 %v8365_v47, %v7165_v49  ;;  %v8358_v54 = vld [vmem:[%s12907_s10 + $0xec] sm:$0xf] }
 0x350   :  { %4963 = vmatpush.bf16.msra.mxu2 %v7640_v12  ;;  %v8428_v12 = vld [vmem:[%s12907_s10 + $0x31c] sm:$0xf]  ;;  %v7137_v56 = vld [vmem:[%s12907_s10 + $0x104] sm:$0xf0]  ;;  %v8470_v58 = vld [vmem:[%s12907_s10 + $0x46c] sm:$0xf] }
 0x351   :  { %4952 = vmatpush.bf16.msra.mxu1 %v7360_v63  ;;  %v7417_v63 = vld [vmem:[%s12907_s10 + $0x334] sm:$0xf0]  ;;  %v8393_v19 = vld [vmem:[%s12907_s10 + $0x204] sm:$0xf]  ;;  %v7277_v20 = vld [vmem:[%s12907_s10 + $0x21c] sm:$0xf0] }
 0x352   :  { %4978 = vmatpush.bf16.msra.mxu0 %v7808_v18  ;;  %v7500_v18 = vor.u32 %v8452_v3, %v7499_v59  ;;  %v7420_v22 = vor.u32 %v8428_v12, %v7417_v63  ;;  %v7305_v59 = vld [vmem:[%s12907_s10 + $0x254] sm:$0xf0]  ;;  %v7140_v3 = vor.u32 %v8358_v54, %v7137_v56  ;;  %v7588_v12 = vor.u32 %v8470_v58, %v7585_v62  ;;  %v7871_v48 = vld [vmem:[%s12907_s10 + $0x6a0] sm:$0xf]  ;;  %v8544_v34 = vld [vmem:[%s12907_s10 + $0x6b8] sm:$0xf0] }
 0x353   :  { %4938 = vmatpush.bf16.msra.mxu3 %v7164_v11  ;;  %v7471_v11 = vld [vmem:[%s12907_s10 + $0x388] sm:$0xf]  ;;  %v7675_v56 = vld [vmem:[%s12907_s10 + $0x518] sm:$0xf]  ;;  %v7872_v58 = vor.u32 %v8544_v34, %v7871_v48  ;;  %v8467_v34 = vld [vmem:[%s12907_s10 + $0x450] sm:$0xf0] }
 0x354   :  { %4964 = vmatpush.bf16.msra.mxu2 %v7612_v46  ;;  %4905 = vmatmul.bf16.vlgmr.msrb.gmra.mxu1 %v11873_v32  ;;  %v7221_v46 = vld [vmem:[%s12907_s10 + $0x1ac] sm:$0xf0]  ;;  %v7472_v40 = vor.u32 %v8445_v21, %v7471_v11  ;;  %v8505_v21 = vld [vmem:[%s12907_s10 + $0x584] sm:$0xf]  ;;  %v7563_v48 = vld [vmem:[%s12907_s10 + $0x438] sm:$0xf] }
 0x355   :  { %4931 = vmatmul.bf16.vlgmr.msrb.gmra.mxu0 %v11881_v36  ;;  %4953 = vmatpush.bf16.msra.mxu1 %v7332_v5  ;;  %v7669_v5 = vld [vmem:[%s12907_s10 + $0x52c] sm:$0xf0] }
 0x356   :  { %4979 = vmatpush.bf16.msra.mxu0 %v7780_v28  ;;  %v8421_v28 = vld [vmem:[%s12907_s10 + $0x2e4] sm:$0xf] }
 0x357   :  { %4939 = vmatpush.bf16.msra.mxu3 %v7136_v0  ;;  %v7224_v0 = vor.u32 %v8379_v2, %v7221_v46  ;;  %v7725_v2 = vld [vmem:[%s12907_s10 + $0x59c] sm:$0xf0]  ;;  %v7560_v46 = vor.u32 %v8463_v14, %v7557_v15  ;;  %v8488_v15 = vld [vmem:[%s12907_s10 + $0x4f8] sm:$0xf0] }
 0x358   :  { %4965 = vmatpush.bf16.msra.mxu2 %v7584_v26  ;;  %v7672_v26 = vor.u32 %v8491_v23, %v7669_v5  ;;  %v7081_v23 = vld [vmem:[%s12907_s10 + $0x94] sm:$0xf0]  ;;  %v7280_v5 = vor.u32 %v8393_v19, %v7277_v20  ;;  %v7647_v14 = vld [vmem:[%s12907_s10 + $0x4e0] sm:$0xf]  ;;  %v7367_v19 = vld [vmem:[%s12907_s10 + $0x2b0] sm:$0xf] }
 0x359   :  { %4954 = vmatpush.bf16.msra.mxu1 %v7304_v42  ;;  %v7392_v42 = vor.u32 %v8421_v28, %v7389_v31  ;;  %v8386_v28 = vld [vmem:[%s12907_s10 + $0x1cc] sm:$0xf]  ;;  %v7728_v31 = vor.u32 %v8505_v21, %v7725_v2  ;;  %v7815_v21 = vld [vmem:[%s12907_s10 + $0x630] sm:$0xf] }
 0x35a   :  { %4980 = vmatpush.bf16.msra.mxu0 %v7752_v43  ;;  %4892 = vmatmul.bf16.vlgmr.msrb.gmra.mxu3 %v11915_v39  ;;  %v7840_v43 = vor.u32 %v8533_v10, %v7837_v33  ;;  %v7697_v10 = vld [vmem:[%s12907_s10 + $0x564] sm:$0xf0]  ;;  %v8418_v20 = vld [vmem:[%s12907_s10 + $0x2c8] sm:$0xf0] }
 0x35b   :  { %4918 = vmatmul.bf16.vlgmr.msrb.gmra.mxu2 %v11923_v53  ;;  %4940 = vmatpush.bf16.msra.mxu3 %v7108_v44  ;;  %v7196_v44 = vor.u32 %v8372_v13, %v7193_v38  ;;  %v8439_v13 = vld [vmem:[%s12907_s10 + $0x370] sm:$0xf0]  ;;  %v7899_v38 = vld [vmem:[%s12907_s10 + $0x6d8] sm:$0xf]  ;;  %v8530_v2 = vld [vmem:[%s12907_s10 + $0x648] sm:$0xf0] }
 0x35c   :  { %4966 = vmatpush.bf16.msra.mxu2 %v7556_v57  ;;  %v7644_v57 = vor.u32 %v8484_v16, %v7641_v30  ;;  %v8551_v16 = vld [vmem:[%s12907_s10 + $0x6f0] sm:$0xf0]  ;;  %v8337_v30 = vld [vmem:[%s12907_s10 + $0x44] sm:$0xf] }
 0x35d   :  { %4955 = vmatpush.bf16.msra.mxu1 %v7276_v29  ;;  %v7364_v29 = vor.u32 %v8414_v6, %v7361_v27  ;;  %v8449_v27 = vld [vmem:[%s12907_s10 + $0x3c4] sm:$0xf]  ;;  %v7900_v47 = vor.u32 %v8551_v16, %v7899_v38  ;;  %v8362_v38 = vld [vmem:[%s12907_s10 + $0x108] sm:$0xf0]  ;;  %v7591_v16 = vld [vmem:[%s12907_s10 + $0x470] sm:$0xf] }
 0x35e   :  { %4981 = vmatpush.bf16.msra.mxu0 %v7724_v60  ;;  %v8407_v60 = vld [vmem:[%s12907_s10 + $0x274] sm:$0xf] }
 0x35f   :  { %4941 = vmatpush.bf16.msra.mxu3 %v7080_v37  ;;  %v7781_v37 = vld [vmem:[%s12907_s10 + $0x60c] sm:$0xf0] }
 0x360   :  { %4967 = vmatpush.bf16.msra.mxu2 %v7528_v35  ;;  %v7336_v35 = vor.u32 %v8407_v60, %v7333_v55  ;;  %v7784_v1 = vor.u32 %v8519_v50, %v7781_v37  ;;  %v8330_v60 = vld [vmem:[%s12907_s10 + $0xc] sm:$0xf]  ;;  %v7025_v55 = vld [vmem:[%s12907_s10 + $0x24] sm:$0xf0]  ;;  %v7227_v37 = vld [vmem:[%s12907_s10 + $0x198] sm:$0xf] }
 0x361   :  { %4956 = vmatpush.bf16.msra.mxu1 %v7248_v41  ;;  %v8400_v41 = vld [vmem:[%s12907_s10 + $0x23c] sm:$0xf]  ;;  %v7473_v50 = vld [vmem:[%s12907_s10 + $0x3a4] sm:$0xf0]  ;;  %v7028_v62 = vor.u32 %v8330_v60, %v7025_v55  ;;  %v8397_v55 = vld [vmem:[%s12907_s10 + $0x220] sm:$0xf0] }
 0x362   :  { %4982 = vmatpush.bf16.msra.mxu0 %v7696_v4  ;;  %v8512_v4 = vld [vmem:[%s12907_s10 + $0x5bc] sm:$0xf]  ;;  %v7308_v63 = vor.u32 %v8400_v41, %v7305_v59  ;;  %v8425_v41 = vld [vmem:[%s12907_s10 + $0x300] sm:$0xf0]  ;;  %v7283_v60 = vld [vmem:[%s12907_s10 + $0x208] sm:$0xf] }
 0x363   :  { %4942 = vmatpush.bf16.msra.mxu3 %v7052_v52  ;;  %v7109_v52 = vld [vmem:[%s12907_s10 + $0xcc] sm:$0xf0] }
 0x364   :  { %4968 = vmatpush.bf16.msra.mxu2 %v7500_v18  ;;  %4957 = vmatmul.bf16.vlgmr.msra.gmra.mxu1 %v11873_v32 }
 0x365   :  { %5001 = vmatpush.bf16.msrb.mxu1 %v7448_v7  ;;  %4983 = vmatmul.bf16.vlgmr.msra.gmra.mxu0 %v11881_v36  ;;  %v7753_v7 = vld [vmem:[%s12907_s10 + $0x5d4] sm:$0xf0] }
 0x366   :  { %5027 = vmatpush.bf16.msrb.mxu0 %v7896_v9  ;;  %v8351_v9 = vld [vmem:[%s12907_s10 + $0xb4] sm:$0xf]  ;;  %v7756_v18 = vor.u32 %v8512_v4, %v7753_v7  ;;  %v7843_v4 = vld [vmem:[%s12907_s10 + $0x668] sm:$0xf]  ;;  %v8537_v7 = vld [vmem:[%s12907_s10 + $0x680] sm:$0xf0] }
 0x367   :  { %4943 = vmatpush.bf16.msra.mxu3 %v7024_v25  ;;  %v7112_v11 = vor.u32 %v8351_v9, %v7109_v52  ;;  %v7529_v25 = vld [vmem:[%s12907_s10 + $0x414] sm:$0xf0]  ;;  %v7199_v9 = vld [vmem:[%s12907_s10 + $0x160] sm:$0xf]  ;;  %v8376_v52 = vld [vmem:[%s12907_s10 + $0x178] sm:$0xf0] }
 0x368   :  { %4969 = vmatpush.bf16.msra.mxu2 %v7472_v40  ;;  %v7249_v40 = vld [vmem:[%s12907_s10 + $0x1e4] sm:$0xf0] }
 0x369   :  { %5002 = vmatpush.bf16.msrb.mxu1 %v7420_v22  ;;  %v8344_v22 = vld [vmem:[%s12907_s10 + $0x7c] sm:$0xf]  ;;  %v7252_v6 = vor.u32 %v8386_v28, %v7249_v40  ;;  %v7816_v28 = vor.u32 %v8530_v2, %v7815_v21  ;;  %v8411_v40 = vld [vmem:[%s12907_s10 + $0x290] sm:$0xf0] }
 0x36a   :  { %5028 = vmatpush.bf16.msrb.mxu0 %v7868_v61  ;;  %4944 = vmatmul.bf16.vlgmr.msra.gmra.mxu3 %v11915_v39  ;;  %v8456_v61 = vld [vmem:[%s12907_s10 + $0x3fc] sm:$0xf]  ;;  %v7084_v33 = vor.u32 %v8344_v22, %v7081_v23  ;;  %v7171_v22 = vld [vmem:[%s12907_s10 + $0x128] sm:$0xf]  ;;  %v8369_v23 = vld [vmem:[%s12907_s10 + $0x140] sm:$0xf0] }
 0x36b   :  { %4988 = vmatpush.bf16.msrb.mxu3 %v7224_v0  ;;  %4970 = vmatmul.bf16.vlgmr.msra.gmra.mxu2 %v11923_v53  ;;  %v8498_v0 = vld [vmem:[%s12907_s10 + $0x54c] sm:$0xf] }
 0x36c   :  { %5014 = vmatpush.bf16.msrb.mxu2 %v7672_v26  ;;  %v7451_v26 = vld [vmem:[%s12907_s10 + $0x358] sm:$0xf]  ;;  %v7700_v45 = vor.u32 %v8498_v0, %v7697_v10  ;;  %v7172_v0 = vor.u32 %v8369_v23, %v7171_v22 }
 0x36d   :  { %5003 = vmatpush.bf16.msrb.mxu1 %v7392_v42  ;;  %v7532_v42 = vor.u32 %v8456_v61, %v7529_v25  ;;  %v7452_v17 = vor.u32 %v8439_v13, %v7451_v26  ;;  %v7619_v61 = vld [vmem:[%s12907_s10 + $0x4a8] sm:$0xf]  ;;  %v8481_v25 = vld [vmem:[%s12907_s10 + $0x4c0] sm:$0xf0]  ;;  %v7787_v10 = vld [vmem:[%s12907_s10 + $0x5f8] sm:$0xf] }
 0x36e   :  { %5029 = vmatpush.bf16.msrb.mxu0 %v7840_v43  ;;  %v7053_v43 = vld [vmem:[%s12907_s10 + $0x5c] sm:$0xf0]  ;;  %v7620_v26 = vor.u32 %v8481_v25, %v7619_v61  ;;  %v7143_v13 = vld [vmem:[%s12907_s10 + $0xf0] sm:$0xf]  ;;  %v8541_v61 = vld [vmem:[%s12907_s10 + $0x6a4] sm:$0xf] }
 0x36f   :  { %4989 = vmatpush.bf16.msrb.mxu3 %v7196_v44  ;;  %v7501_v44 = vld [vmem:[%s12907_s10 + $0x3dc] sm:$0xf0]  ;;  %v7056_v49 = vor.u32 %v8337_v30, %v7053_v43  ;;  %v8474_v30 = vld [vmem:[%s12907_s10 + $0x488] sm:$0xf0] }
 0x370   :  { %5015 = vmatpush.bf16.msrb.mxu2 %v7644_v57  ;;  %v7423_v57 = vld [vmem:[%s12907_s10 + $0x320] sm:$0xf] }
 0x371   :  { %5004 = vmatpush.bf16.msrb.mxu1 %v7364_v29  ;;  %v8432_v29 = vld [vmem:[%s12907_s10 + $0x338] sm:$0xf0]  ;;  %v7873_v25 = vld [vmem:[%s12907_s10 + $0x6bc] sm:$0xf0] }
 0x372   :  { %5030 = vmatpush.bf16.msrb.mxu0 %v7812_v8  ;;  %v7504_v8 = vor.u32 %v8449_v27, %v7501_v44  ;;  %v7424_v54 = vor.u32 %v8432_v29, %v7423_v57  ;;  %v8404_v27 = vld [vmem:[%s12907_s10 + $0x258] sm:$0xf0]  ;;  %v7144_v44 = vor.u32 %v8362_v38, %v7143_v13  ;;  %v7592_v57 = vor.u32 %v8474_v30, %v7591_v16 }
 0x373   :  { %4990 = vmatpush.bf16.msrb.mxu3 %v7168_v24  ;;  %v8442_v24 = vld [vmem:[%s12907_s10 + $0x38c] sm:$0xf]  ;;  %v8492_v38 = vld [vmem:[%s12907_s10 + $0x51c] sm:$0xf]  ;;  %v7876_v16 = vor.u32 %v8541_v61, %v7873_v25  ;;  %v7565_v25 = vld [vmem:[%s12907_s10 + $0x454] sm:$0xf0] }
 0x374   :  { %5016 = vmatpush.bf16.msrb.mxu2 %v7616_v51  ;;  %v8383_v51 = vld [vmem:[%s12907_s10 + $0x1b0] sm:$0xf0]  ;;  %v7476_v59 = vor.u32 %v8442_v24, %v7473_v50  ;;  %v7731_v50 = vld [vmem:[%s12907_s10 + $0x588] sm:$0xf]  ;;  %v8464_v61 = vld [vmem:[%s12907_s10 + $0x43c] sm:$0xf] }
 0x375   :  { %5005 = vmatpush.bf16.msrb.mxu1 %v7336_v35  ;;  %v8495_v35 = vld [vmem:[%s12907_s10 + $0x530] sm:$0xf0] }
 0x376   :  { %5031 = vmatpush.bf16.msrb.mxu0 %v7784_v1  ;;  %v7395_v1 = vld [vmem:[%s12907_s10 + $0x2e8] sm:$0xf] }
 0x377   :  { %4991 = vmatpush.bf16.msrb.mxu3 %v7140_v3  ;;  %v7228_v3 = vor.u32 %v8383_v51, %v7227_v37  ;;  %v8509_v37 = vld [vmem:[%s12907_s10 + $0x5a0] sm:$0xf0]  ;;  %v7564_v51 = vor.u32 %v8467_v34, %v7563_v48  ;;  %v7649_v34 = vld [vmem:[%s12907_s10 + $0x4fc] sm:$0xf0] }
 0x378   :  { %5017 = vmatpush.bf16.msrb.mxu2 %v7588_v12  ;;  %v7676_v12 = vor.u32 %v8495_v35, %v7675_v56  ;;  %v8348_v56 = vld [vmem:[%s12907_s10 + $0x98] sm:$0xf0]  ;;  %v7284_v35 = vor.u32 %v8397_v55, %v7283_v60  ;;  %v8485_v48 = vld [vmem:[%s12907_s10 + $0x4e4] sm:$0xf]  ;;  %v8415_v60 = vld [vmem:[%s12907_s10 + $0x2b4] sm:$0xf] }
 0x379   :  { %5006 = vmatpush.bf16.msrb.mxu1 %v7308_v63  ;;  %v7396_v63 = vor.u32 %v8425_v41, %v7395_v1  ;;  %v7255_v1 = vld [vmem:[%s12907_s10 + $0x1d0] sm:$0xf]  ;;  %v7732_v41 = vor.u32 %v8509_v37, %v7731_v50  ;;  %v8527_v50 = vld [vmem:[%s12907_s10 + $0x634] sm:$0xf] }
 0x37a   :  { %5032 = vmatpush.bf16.msrb.mxu0 %v7756_v18  ;;  %v7844_v18 = vor.u32 %v8537_v7, %v7843_v4  ;;  %v8502_v4 = vld [vmem:[%s12907_s10 + $0x568] sm:$0xf0]  ;;  %v7369_v55 = vld [vmem:[%s12907_s10 + $0x2cc] sm:$0xf0] }
 0x37b   :  { %4992 = vmatpush.bf16.msrb.mxu3 %v7112_v11  ;;  %v7200_v11 = vor.u32 %v8376_v52, %v7199_v9  ;;  %v7453_v9 = vld [vmem:[%s12907_s10 + $0x374] sm:$0xf0]  ;;  %v8548_v52 = vld [vmem:[%s12907_s10 + $0x6dc] sm:$0xf]  ;;  %v7817_v37 = vld [vmem:[%s12907_s10 + $0x64c] sm:$0xf0] }
 0x37c   :  { %5018 = vmatpush.bf16.msrb.mxu2 %v7560_v46  ;;  %v7648_v46 = vor.u32 %v8488_v15, %v7647_v14  ;;  %v7901_v14 = vld [vmem:[%s12907_s10 + $0x6f4] sm:$0xf0]  ;;  %v7059_v15 = vld [vmem:[%s12907_s10 + $0x48] sm:$0xf] }
 0x37d   :  { %5007 = vmatpush.bf16.msrb.mxu1 %v7280_v5  ;;  %v7368_v5 = vor.u32 %v8418_v20, %v7367_v19  ;;  %v7507_v20 = vld [vmem:[%s12907_s10 + $0x3c8] sm:$0xf]  ;;  %v7904_v22 = vor.u32 %v8548_v52, %v7901_v14  ;;  %v7145_v52 = vld [vmem:[%s12907_s10 + $0x10c] sm:$0xf0]  ;;  %v8471_v14 = vld [vmem:[%s12907_s10 + $0x474] sm:$0xf] }
 0x37e   :  { %5033 = vmatpush.bf16.msrb.mxu0 %v7728_v31  ;;  %v7339_v31 = vld [vmem:[%s12907_s10 + $0x278] sm:$0xf] }
 0x37f   :  { %4993 = vmatpush.bf16.msrb.mxu3 %v7084_v33  ;;  %v8523_v33 = vld [vmem:[%s12907_s10 + $0x610] sm:$0xf0] }
 0x380   :  { %5019 = vmatpush.bf16.msrb.mxu2 %v7532_v42  ;;  %v7340_v42 = vor.u32 %v8411_v40, %v7339_v31  ;;  %v7788_v43 = vor.u32 %v8523_v33, %v7787_v10  ;;  %v7031_v31 = vld [vmem:[%s12907_s10 + $0x10] sm:$0xf]  ;;  %v8334_v40 = vld [vmem:[%s12907_s10 + $0x28] sm:$0xf0]  ;;  %v8380_v33 = vld [vmem:[%s12907_s10 + $0x19c] sm:$0xf] }
 0x381   :  { %5008 = vmatpush.bf16.msrb.mxu1 %v7252_v6  ;;  %v7311_v6 = vld [vmem:[%s12907_s10 + $0x240] sm:$0xf]  ;;  %v8446_v10 = vld [vmem:[%s12907_s10 + $0x3a8] sm:$0xf0]  ;;  %v7032_v30 = vor.u32 %v8334_v40, %v7031_v31  ;;  %v7285_v40 = vld [vmem:[%s12907_s10 + $0x224] sm:$0xf0] }
 0x382   :  { %5034 = vmatpush.bf16.msrb.mxu0 %v7700_v45  ;;  %v7759_v45 = vld [vmem:[%s12907_s10 + $0x5c0] sm:$0xf]  ;;  %v7312_v29 = vor.u32 %v8404_v27, %v7311_v6  ;;  %v7397_v6 = vld [vmem:[%s12907_s10 + $0x304] sm:$0xf0]  ;;  %v8394_v31 = vld [vmem:[%s12907_s10 + $0x20c] sm:$0xf] }
 0x383   :  { %4994 = vmatpush.bf16.msrb.mxu3 %v7056_v49  ;;  %v8355_v49 = vld [vmem:[%s12907_s10 + $0xd0] sm:$0xf0] }
 0x384   :  { %5020 = vmatpush.bf16.msrb.mxu2 %v7504_v8  ;;  %5009 = vmatmul.bf16.vlgmr.msrb.gmra.mxu1 %v11873_v32 }
 0x385   :  { %5053 = vmatpush.bf16.msra.mxu1 %v7452_v17  ;;  %5035 = vmatmul.bf16.vlgmr.msrb.gmra.mxu0 %v11881_v36  ;;  %v8516_v17 = vld [vmem:[%s12907_s10 + $0x5d8] sm:$0xf0] }
 0x386   :  { %5079 = vmatpush.bf16.msra.mxu0 %v7900_v47  ;;  %v7115_v47 = vld [vmem:[%s12907_s10 + $0xb8] sm:$0xf]  ;;  %v7760_v8 = vor.u32 %v8516_v17, %v7759_v45  ;;  %v8534_v45 = vld [vmem:[%s12907_s10 + $0x66c] sm:$0xf]  ;;  %v7845_v17 = vld [vmem:[%s12907_s10 + $0x684] sm:$0xf0] }
 0x387   :  { %4995 = vmatpush.bf16.msrb.mxu3 %v7028_v62  ;;  %v7116_v24 = vor.u32 %v8355_v49, %v7115_v47  ;;  %v8460_v62 = vld [vmem:[%s12907_s10 + $0x418] sm:$0xf0]  ;;  %v8373_v47 = vld [vmem:[%s12907_s10 + $0x164] sm:$0xf]  ;;  %v7201_v49 = vld [vmem:[%s12907_s10 + $0x17c] sm:$0xf0] }
 0x388   :  { %5021 = vmatpush.bf16.msrb.mxu2 %v7476_v59  ;;  %v8390_v59 = vld [vmem:[%s12907_s10 + $0x1e8] sm:$0xf0] }
 0x389   :  { %5054 = vmatpush.bf16.msra.mxu1 %v7424_v54  ;;  %v7087_v54 = vld [vmem:[%s12907_s10 + $0x80] sm:$0xf]  ;;  %v7256_v19 = vor.u32 %v8390_v59, %v7255_v1  ;;  %v7820_v1 = vor.u32 %v8527_v50, %v7817_v37  ;;  %v7341_v59 = vld [vmem:[%s12907_s10 + $0x294] sm:$0xf0] }
 0x38a   :  { %5080 = vmatpush.bf16.msra.mxu0 %v7872_v58  ;;  %4996 = vmatmul.bf16.vlgmr.msrb.gmra.mxu3 %v11915_v39  ;;  %v7535_v58 = vld [vmem:[%s12907_s10 + $0x400] sm:$0xf]  ;;  %v7088_v7 = vor.u32 %v8348_v56, %v7087_v54  ;;  %v8366_v54 = vld [vmem:[%s12907_s10 + $0x12c] sm:$0xf]  ;;  %v7173_v56 = vld [vmem:[%s12907_s10 + $0x144] sm:$0xf0] }
 0x38b   :  { %5040 = vmatpush.bf16.msra.mxu3 %v7228_v3  ;;  %5022 = vmatmul.bf16.vlgmr.msrb.gmra.mxu2 %v11923_v53  ;;  %v7703_v3 = vld [vmem:[%s12907_s10 + $0x550] sm:$0xf] }
 0x38c   :  { %5066 = vmatpush.bf16.msra.mxu2 %v7676_v12  ;;  %v8436_v12 = vld [vmem:[%s12907_s10 + $0x35c] sm:$0xf]  ;;  %v7704_v21 = vor.u32 %v8502_v4, %v7703_v3  ;;  %v7176_v3 = vor.u32 %v8366_v54, %v7173_v56 }
 0x38d   :  { %5055 = vmatpush.bf16.msra.mxu1 %v7396_v63  ;;  %v7536_v63 = vor.u32 %v8460_v62, %v7535_v58  ;;  %v7456_v2 = vor.u32 %v8436_v12, %v7453_v9  ;;  %v8478_v58 = vld [vmem:[%s12907_s10 + $0x4ac] sm:$0xf]  ;;  %v7621_v62 = vld [vmem:[%s12907_s10 + $0x4c4] sm:$0xf0]  ;;  %v8520_v4 = vld [vmem:[%s12907_s10 + $0x5fc] sm:$0xf] }
 0x38e   :  { %5081 = vmatpush.bf16.msra.mxu0 %v7844_v18  ;;  %v8341_v18 = vld [vmem:[%s12907_s10 + $0x60] sm:$0xf0]  ;;  %v7624_v12 = vor.u32 %v8478_v58, %v7621_v62  ;;  %v8359_v9 = vld [vmem:[%s12907_s10 + $0xf4] sm:$0xf]  ;;  %v7879_v58 = vld [vmem:[%s12907_s10 + $0x6a8] sm:$0xf] }
 0x38f   :  { %5041 = vmatpush.bf16.msra.mxu3 %v7200_v11  ;;  %v8453_v11 = vld [vmem:[%s12907_s10 + $0x3e0] sm:$0xf0]  ;;  %v7060_v23 = vor.u32 %v8341_v18, %v7059_v15  ;;  %v7593_v15 = vld [vmem:[%s12907_s10 + $0x48c] sm:$0xf0] }
 0x390   :  { %5067 = vmatpush.bf16.msra.mxu2 %v7648_v46  ;;  %v8429_v46 = vld [vmem:[%s12907_s10 + $0x324] sm:$0xf] }
 0x391   :  { %5056 = vmatpush.bf16.msra.mxu1 %v7368_v5  ;;  %v7425_v5 = vld [vmem:[%s12907_s10 + $0x33c] sm:$0xf0]  ;;  %v8545_v62 = vld [vmem:[%s12907_s10 + $0x6c0] sm:$0xf0] }
 0x392   :  { %5082 = vmatpush.bf16.msra.mxu0 %v7816_v28  ;;  %v7508_v28 = vor.u32 %v8453_v11, %v7507_v20  ;;  %v7428_v13 = vor.u32 %v8429_v46, %v7425_v5  ;;  %v7313_v20 = vld [vmem:[%s12907_s10 + $0x25c] sm:$0xf0]  ;;  %v7148_v11 = vor.u32 %v8359_v9, %v7145_v52  ;;  %v7596_v46 = vor.u32 %v8471_v14, %v7593_v15 }
 0x393   :  { %5042 = vmatpush.bf16.msra.mxu3 %v7172_v0  ;;  %v7479_v0 = vld [vmem:[%s12907_s10 + $0x390] sm:$0xf]  ;;  %v7683_v52 = vld [vmem:[%s12907_s10 + $0x520] sm:$0xf]  ;;  %v7880_v14 = vor.u32 %v8545_v62, %v7879_v58  ;;  %v8356_v62 = vld [vmem:[%s12907_s10 + $0xd8] sm:$0xf0] }
 0x394   :  { %5068 = vmatpush.bf16.msra.mxu2 %v7620_v26  ;;  %v7229_v26 = vld [vmem:[%s12907_s10 + $0x1b4] sm:$0xf0]  ;;  %v7480_v27 = vor.u32 %v8446_v10, %v7479_v0  ;;  %v8506_v10 = vld [vmem:[%s12907_s10 + $0x58c] sm:$0xf]  ;;  %v7123_v58 = vld [vmem:[%s12907_s10 + $0xc0] sm:$0xf] }
 0x395   :  { %5057 = vmatpush.bf16.msra.mxu1 %v7340_v42  ;;  %v7677_v42 = vld [vmem:[%s12907_s10 + $0x534] sm:$0xf0] }
 0x396   :  { %5083 = vmatpush.bf16.msra.mxu0 %v7788_v43  ;;  %v8422_v43 = vld [vmem:[%s12907_s10 + $0x2ec] sm:$0xf] }
 0x397   :  { %5043 = vmatpush.bf16.msra.mxu3 %v7144_v44  ;;  %v7232_v44 = vor.u32 %v8380_v33, %v7229_v26  ;;  %v7733_v33 = vld [vmem:[%s12907_s10 + $0x5a4] sm:$0xf0]  ;;  %v7568_v26 = vor.u32 %v8464_v61, %v7565_v25  ;;  %v8489_v25 = vld [vmem:[%s12907_s10 + $0x500] sm:$0xf0] }
 0x398   :  { %5069 = vmatpush.bf16.msra.mxu2 %v7592_v57  ;;  %v7680_v57 = vor.u32 %v8492_v38, %v7677_v42  ;;  %v7089_v38 = vld [vmem:[%s12907_s10 + $0x9c] sm:$0xf0]  ;;  %v7288_v42 = vor.u32 %v8394_v31, %v7285_v40  ;;  %v7655_v61 = vld [vmem:[%s12907_s10 + $0x4e8] sm:$0xf]  ;;  %v7375_v31 = vld [vmem:[%s12907_s10 + $0x2b8] sm:$0xf] }
 0x399   :  { %5058 = vmatpush.bf16.msra.mxu1 %v7312_v29  ;;  %v7400_v29 = vor.u32 %v8422_v43, %v7397_v6  ;;  %v8387_v43 = vld [vmem:[%s12907_s10 + $0x1d4] sm:$0xf]  ;;  %v7736_v6 = vor.u32 %v8506_v10, %v7733_v33  ;;  %v7823_v10 = vld [vmem:[%s12907_s10 + $0x638] sm:$0xf] }
 0x39a   :  { %5084 = vmatpush.bf16.msra.mxu0 %v7760_v8  ;;  %v7848_v8 = vor.u32 %v8534_v45, %v7845_v17  ;;  %v7705_v45 = vld [vmem:[%s12907_s10 + $0x56c] sm:$0xf0]  ;;  %v8419_v40 = vld [vmem:[%s12907_s10 + $0x2d0] sm:$0xf0] }
 0x39b   :  { %5044 = vmatpush.bf16.msra.mxu3 %v7116_v24  ;;  %v7204_v24 = vor.u32 %v8373_v47, %v7201_v49  ;;  %v8440_v47 = vld [vmem:[%s12907_s10 + $0x378] sm:$0xf0]  ;;  %v7907_v49 = vld [vmem:[%s12907_s10 + $0x6e0] sm:$0xf]  ;;  %v8531_v33 = vld [vmem:[%s12907_s10 + $0x650] sm:$0xf0] }
 0x39c   :  { %5070 = vmatpush.bf16.msra.mxu2 %v7564_v51  ;;  %v7652_v51 = vor.u32 %v8485_v48, %v7649_v34  ;;  %v8552_v48 = vld [vmem:[%s12907_s10 + $0x6f8] sm:$0xf0]  ;;  %v8338_v34 = vld [vmem:[%s12907_s10 + $0x4c] sm:$0xf] }
 0x39d   :  { %5059 = vmatpush.bf16.msra.mxu1 %v7284_v35  ;;  %v7372_v35 = vor.u32 %v8415_v60, %v7369_v55  ;;  %v8450_v55 = vld [vmem:[%s12907_s10 + $0x3cc] sm:$0xf]  ;;  %v7908_v54 = vor.u32 %v8552_v48, %v7907_v49  ;;  %v8363_v48 = vld [vmem:[%s12907_s10 + $0x110] sm:$0xf0] }
 0x39e   :  { %5085 = vmatpush.bf16.msra.mxu0 %v7732_v41  ;;  %v8408_v41 = vld [vmem:[%s12907_s10 + $0x27c] sm:$0xf] }
 0x39f   :  { %5045 = vmatpush.bf16.msra.mxu3 %v7088_v7  ;;  %v7789_v7 = vld [vmem:[%s12907_s10 + $0x614] sm:$0xf0] }
 0x3a0   :  { %5071 = vmatpush.bf16.msra.mxu2 %v7536_v63  ;;  %v7344_v63 = vor.u32 %v8408_v41, %v7341_v59  ;;  %v7792_v18 = vor.u32 %v8520_v4, %v7789_v7  ;;  %v8331_v41 = vld [vmem:[%s12907_s10 + $0x14] sm:$0xf]  ;;  %v7033_v59 = vld [vmem:[%s12907_s10 + $0x2c] sm:$0xf0]  ;;  %v7235_v7 = vld [vmem:[%s12907_s10 + $0x1a0] sm:$0xf] }
 0x3a1   :  { %5060 = vmatpush.bf16.msra.mxu1 %v7256_v19  ;;  %v8401_v19 = vld [vmem:[%s12907_s10 + $0x244] sm:$0xf]  ;;  %v7481_v4 = vld [vmem:[%s12907_s10 + $0x3ac] sm:$0xf0]  ;;  %v7036_v15 = vor.u32 %v8331_v41, %v7033_v59  ;;  %v7571_v59 = vld [vmem:[%s12907_s10 + $0x440] sm:$0xf] }
 0x3a2   :  { %5086 = vmatpush.bf16.msra.mxu0 %v7704_v21  ;;  %v8513_v21 = vld [vmem:[%s12907_s10 + $0x5c4] sm:$0xf]  ;;  %v7316_v5 = vor.u32 %v8401_v19, %v7313_v20  ;;  %v8426_v19 = vld [vmem:[%s12907_s10 + $0x308] sm:$0xf0] }
 0x3a3   :  { %5046 = vmatpush.bf16.msra.mxu3 %v7060_v23  ;;  %v7117_v23 = vld [vmem:[%s12907_s10 + $0xd4] sm:$0xf0] }
 0x3a4   :  { %5072 = vmatpush.bf16.msra.mxu2 %v7508_v28  ;;  %5061 = vmatmul.bf16.vlgmr.msra.gmra.mxu1 %v11873_v32 }
 0x3a5   :  { %5105 = vmatpush.bf16.msrb.mxu1 %v7456_v2  ;;  %5087 = vmatmul.bf16.vlgmr.msra.gmra.mxu0 %v11881_v36  ;;  %v7761_v2 = vld [vmem:[%s12907_s10 + $0x5dc] sm:$0xf0] }
 0x3a6   :  { %5131 = vmatpush.bf16.msrb.mxu0 %v7904_v22  ;;  %v8352_v22 = vld [vmem:[%s12907_s10 + $0xbc] sm:$0xf]  ;;  %v7764_v28 = vor.u32 %v8513_v21, %v7761_v2  ;;  %v7851_v21 = vld [vmem:[%s12907_s10 + $0x670] sm:$0xf]  ;;  %v8538_v2 = vld [vmem:[%s12907_s10 + $0x688] sm:$0xf0] }
 0x3a7   :  { %5047 = vmatpush.bf16.msra.mxu3 %v7032_v30  ;;  %v7120_v0 = vor.u32 %v8352_v22, %v7117_v23  ;;  %v7537_v30 = vld [vmem:[%s12907_s10 + $0x41c] sm:$0xf0]  ;;  %v7207_v22 = vld [vmem:[%s12907_s10 + $0x168] sm:$0xf]  ;;  %v8377_v23 = vld [vmem:[%s12907_s10 + $0x180] sm:$0xf0] }
 0x3a8   :  { %5073 = vmatpush.bf16.msra.mxu2 %v7480_v27  ;;  %v7257_v27 = vld [vmem:[%s12907_s10 + $0x1ec] sm:$0xf0] }
 0x3a9   :  { %5106 = vmatpush.bf16.msrb.mxu1 %v7428_v13  ;;  %v8345_v13 = vld [vmem:[%s12907_s10 + $0x84] sm:$0xf]  ;;  %v7260_v60 = vor.u32 %v8387_v43, %v7257_v27  ;;  %v8482_v43 = vld [vmem:[%s12907_s10 + $0x4c8] sm:$0xf0]  ;;  %v7824_v27 = vor.u32 %v8531_v33, %v7823_v10  ;;  %v7067_v33 = vld [vmem:[%s12907_s10 + $0x50] sm:$0xf] }
 0x3aa   :  { %5132 = vmatpush.bf16.msrb.mxu0 %v7876_v16  ;;  %5048 = vmatmul.bf16.vlgmr.msra.gmra.mxu3 %v11915_v39  ;;  %v8457_v16 = vld [vmem:[%s12907_s10 + $0x404] sm:$0xf]  ;;  %v7092_v17 = vor.u32 %v8345_v13, %v7089_v38  ;;  %v7179_v13 = vld [vmem:[%s12907_s10 + $0x130] sm:$0xf]  ;;  %v8370_v38 = vld [vmem:[%s12907_s10 + $0x148] sm:$0xf0] }
 0x3ab   :  { %5092 = vmatpush.bf16.msrb.mxu3 %v7232_v44  ;;  %5074 = vmatmul.bf16.vlgmr.msra.gmra.mxu2 %v11923_v53  ;;  %v8499_v44 = vld [vmem:[%s12907_s10 + $0x554] sm:$0xf] }
 0x3ac   :  { %5118 = vmatpush.bf16.msrb.mxu2 %v7680_v57  ;;  %v7459_v57 = vld [vmem:[%s12907_s10 + $0x360] sm:$0xf]  ;;  %v7708_v50 = vor.u32 %v8499_v44, %v7705_v45  ;;  %v8412_v45 = vld [vmem:[%s12907_s10 + $0x298] sm:$0xf0] }
 0x3ad   :  { %5107 = vmatpush.bf16.msrb.mxu1 %v7400_v29  ;;  %v7540_v29 = vor.u32 %v8457_v16, %v7537_v30  ;;  %v7460_v37 = vor.u32 %v8440_v47, %v7459_v57  ;;  %v7376_v16 = vor.u32 %v8419_v40, %v7375_v31  ;;  %v7627_v30 = vld [vmem:[%s12907_s10 + $0x4b0] sm:$0xf]  ;;  %v7347_v44 = vld [vmem:[%s12907_s10 + $0x280] sm:$0xf]  ;;  %v8524_v47 = vld [vmem:[%s12907_s10 + $0x618] sm:$0xf0] }
 0x3ae   :  { %5133 = vmatpush.bf16.msrb.mxu0 %v7848_v8  ;;  %v7061_v8 = vld [vmem:[%s12907_s10 + $0x64] sm:$0xf0]  ;;  %v7795_v57 = vld [vmem:[%s12907_s10 + $0x600] sm:$0xf]  ;;  %v7628_v49 = vor.u32 %v8482_v43, %v7627_v30  ;;  %v7711_v31 = vld [vmem:[%s12907_s10 + $0x558] sm:$0xf] }
 0x3af   :  { %5093 = vmatpush.bf16.msrb.mxu3 %v7204_v24  ;;  %v7509_v24 = vld [vmem:[%s12907_s10 + $0x3e4] sm:$0xf0]  ;;  %v7064_v56 = vor.u32 %v8338_v34, %v7061_v8  ;;  %v7348_v34 = vor.u32 %v8412_v45, %v7347_v44  ;;  %v7599_v8 = vld [vmem:[%s12907_s10 + $0x478] sm:$0xf]  ;;  %v8503_v40 = vld [vmem:[%s12907_s10 + $0x570] sm:$0xf0] }
 0x3b0   :  { %5119 = vmatpush.bf16.msrb.mxu2 %v7652_v51  ;;  %v7431_v51 = vld [vmem:[%s12907_s10 + $0x328] sm:$0xf] }
 0x3b1   :  { %5108 = vmatpush.bf16.msrb.mxu1 %v7372_v35  ;;  %v8433_v35 = vld [vmem:[%s12907_s10 + $0x340] sm:$0xf0] }
 0x3b2   :  { %5134 = vmatpush.bf16.msrb.mxu0 %v7820_v1  ;;  %v7512_v1 = vor.u32 %v8450_v55, %v7509_v24  ;;  %v7432_v9 = vor.u32 %v8433_v35, %v7431_v51  ;;  %v7796_v55 = vor.u32 %v8524_v47, %v7795_v57  ;;  %v7319_v24 = vld [vmem:[%s12907_s10 + $0x248] sm:$0xf]  ;;  %v7039_v57 = vld [vmem:[%s12907_s10 + $0x18] sm:$0xf]  ;;  %v8335_v47 = vld [vmem:[%s12907_s10 + $0x30] sm:$0xf0] }
 0x3b3   :  { %5094 = vmatpush.bf16.msrb.mxu3 %v7176_v3  ;;  %v8443_v3 = vld [vmem:[%s12907_s10 + $0x394] sm:$0xf]  ;;  %v7767_v51 = vld [vmem:[%s12907_s10 + $0x5c8] sm:$0xf] }
 0x3b4   :  { %5120 = vmatpush.bf16.msrb.mxu2 %v7624_v12  ;;  %v8384_v12 = vld [vmem:[%s12907_s10 + $0x1b8] sm:$0xf0]  ;;  %v7484_v20 = vor.u32 %v8443_v3, %v7481_v4 }
 0x3b5   :  { %5109 = vmatpush.bf16.msrb.mxu1 %v7344_v63  ;;  %v8496_v63 = vld [vmem:[%s12907_s10 + $0x538] sm:$0xf0] }
 0x3b6   :  { %5135 = vmatpush.bf16.msrb.mxu0 %v7792_v18  ;;  %v7403_v18 = vld [vmem:[%s12907_s10 + $0x2f0] sm:$0xf]  ;;  %v8468_v3 = vld [vmem:[%s12907_s10 + $0x458] sm:$0xf0] }
 0x3b7   :  { %5095 = vmatpush.bf16.msrb.mxu3 %v7148_v11  ;;  %v7236_v11 = vor.u32 %v8384_v12, %v7235_v7 }
 0x3b8   :  { %5121 = vmatpush.bf16.msrb.mxu2 %v7596_v46  ;;  %v7684_v46 = vor.u32 %v8496_v63, %v7683_v52  ;;  %v8398_v52 = vld [vmem:[%s12907_s10 + $0x228] sm:$0xf0]  ;;  %v7124_v63 = vor.u32 %v8356_v62, %v7123_v58 }
 0x3b9   :  { %5110 = vmatpush.bf16.msrb.mxu1 %v7316_v5  ;;  %v7404_v5 = vor.u32 %v8426_v19, %v7403_v18  ;;  %v7572_v18 = vor.u32 %v8468_v3, %v7571_v59  ;;  %v7095_v19 = vld [vmem:[%s12907_s10 + $0x88] sm:$0xf] }
 0x3ba   :  { %5136 = vmatpush.bf16.msrb.mxu0 %v7764_v28  ;;  %v7852_v28 = vor.u32 %v8538_v2, %v7851_v21  ;;  %v7543_v2 = vld [vmem:[%s12907_s10 + $0x408] sm:$0xf] }
 0x3bb   :  { %5096 = vmatpush.bf16.msrb.mxu3 %v7120_v0  ;;  %v7208_v0 = vor.u32 %v8377_v23, %v7207_v22 }
 0x3bc   :  { %5122 = vmatpush.bf16.msrb.mxu2 %v7568_v26  ;;  %v7656_v26 = vor.u32 %v8489_v25, %v7655_v61  ;;  %v7263_v61 = vld [vmem:[%s12907_s10 + $0x1d8] sm:$0xf]  ;;  %v8391_v25 = vld [vmem:[%s12907_s10 + $0x1f0] sm:$0xf0] }
 0x3bd   :  { %5111 = vmatpush.bf16.msrb.mxu1 %v7288_v42 }
 0x3be   :  { %5137 = vmatpush.bf16.msrb.mxu0 %v7736_v6 }
 0x3bf   :  { %5097 = vmatpush.bf16.msrb.mxu3 %v7092_v17  ;;  %v7180_v17 = vor.u32 %v8370_v38, %v7179_v13  ;;  %v7264_v38 = vor.u32 %v8391_v25, %v7263_v61 }
 0x3c0   :  { %5123 = vmatpush.bf16.msrb.mxu2 %v7540_v29  ;;  %v7151_v29 = vld [vmem:[%s12907_s10 + $0xf8] sm:$0xf] }
 0x3c1   :  { %5112 = vmatpush.bf16.msrb.mxu1 %v7260_v60  ;;  %v12738_v42 = vpop.f32.mrf.mxu1  ;;  %v8475_v60 = vld [vmem:[%s12907_s10 + $0x490] sm:$0xf0] }
 0x3c2   :  { %5138 = vmatpush.bf16.msrb.mxu0 %v7708_v50  ;;  %v12747_v6 = vpop.f32.mrf.mxu0  ;;  %v8405_v50 = vld [vmem:[%s12907_s10 + $0x260] sm:$0xf0]  ;;  %v7600_v35 = vor.u32 %v8475_v60, %v7599_v8 }
 0x3c3   :  { %5098 = vmatpush.bf16.msrb.mxu3 %v7064_v56  ;;  %v12788_v56 = vld [vmem:[%s12908_s11] sm:$0x7f]  ;;  %v7320_v41 = vor.u32 %v8405_v50, %v7319_v24  ;;  %s8679_s11 = smov [#allocation8]  }
 0x3c4   :  { %5124 = vmatpush.bf16.msrb.mxu2 %v7512_v1  ;;  %5113 = vmatmul.bf16.vlgmr.msrb.gmra.mxu1 %v11873_v32  ;;  %v3666_v12 = vperm.slane %v12788_v56, 0  ;;  %s5304_s4 = sshll.u32 %s8679_s11, 4  ;;  %s5305_s4 = int_to_ptr.vmem [resolvable:$true] %s5304_s4 }
 0x3c5   :  { %5157 = vmatpush.bf16.msra.mxu1 %v7460_v37  ;;  %5139 = vmatmul.bf16.vlgmr.msrb.gmra.mxu0 %v11881_v36  ;;  %v7152_v37 = vor.u32 %v8363_v48, %v7151_v29  ;;  %v7487_v29 = vld [vmem:[%s12907_s10 + $0x398] sm:$0xf]  ;;  %5309 = dma.vmem_to_hbm [thread:$0]  %s5305_s4, 64, %s5307_s24, [#allocation9]  }
 0x3c6   :  { %5183 = vmatpush.bf16.msra.mxu0 %v7908_v54  ;;  %v8517_v54 = vld [vmem:[%s12907_s10 + $0x5e0] sm:$0xf0] }
 0x3c7   :  { %5099 = vmatpush.bf16.msrb.mxu3 %v7036_v15  ;;  %v7768_v7 = vor.u32 %v8517_v54, %v7767_v51  ;;  %v8510_v15 = vld [vmem:[%s12907_s10 + $0x5a8] sm:$0xf0] }
 0x3c8   :  { %5125 = vmatpush.bf16.msrb.mxu2 %v7484_v20  ;;  %v8349_v20 = vld [vmem:[%s12907_s10 + $0xa0] sm:$0xf0] }
 0x3c9   :  { %5158 = vmatpush.bf16.msra.mxu1 %v7432_v9  ;;  %v4856_v1 = vpop.f32.mrf.mxu1  ;;  %v7291_v9 = vld [vmem:[%s12907_s10 + $0x210] sm:$0xf] }
 0x3ca   :  { %5184 = vmatpush.bf16.msra.mxu0 %v7880_v14  ;;  %5100 = vmatmul.bf16.vlgmr.msrb.gmra.mxu3 %v11915_v39  ;;  %v4882_v4 = vpop.f32.mrf.mxu0  ;;  %v7739_v14 = vld [vmem:[%s12907_s10 + $0x590] sm:$0xf]  ;;  %v7292_v21 = vor.u32 %v8398_v52, %v7291_v9 }
 0x3cb   :  { %5144 = vmatpush.bf16.msra.mxu3 %v7236_v11  ;;  %5126 = vmatmul.bf16.vlgmr.msrb.gmra.mxu2 %v11923_v53  ;;  %v3668_v4 = vperm.slane %v12788_v56, 2 }
 0x3cc   :  { %5170 = vmatpush.bf16.msra.mxu2 %v7684_v46  ;;  %v8461_v46 = vld [vmem:[%s12907_s10 + $0x420] sm:$0xf0] }
 0x3cd   :  { %5159 = vmatpush.bf16.msra.mxu1 %v7404_v5  ;;  %v4841_v11 = vpop.f32.mrf.mxu3  ;;  %v7740_v5 = vor.u32 %v8510_v15, %v7739_v14  ;;  %v7544_v10 = vor.u32 %v8461_v46, %v7543_v2 }
 0x3ce   :  { %5185 = vmatpush.bf16.msra.mxu0 %v7852_v28  ;;  %v4842_v22 = vadd.f32 %v4841_v11, %v3666_v12  ;;  %v4867_v23 = vpop.f32.mrf.mxu2  ;;  %v7096_v28 = vor.u32 %v8349_v20, %v7095_v19  ;;  %v3669_v20 = vperm.slane %v12788_v56, 3 }
 0x3cf   :  { %5145 = vmatpush.bf16.msra.mxu3 %v7208_v0 }
 0x3d0   :  { %5171 = vmatpush.bf16.msra.mxu2 %v7656_v26  ;;  %v4855_v0 = vadd.f32 %v12738_v42, %v4842_v22  ;;  %v8342_v26 = vld [vmem:[%s12907_s10 + $0x68] sm:$0xf0] }
 0x3d1   :  { %5160 = vmatpush.bf16.msra.mxu1 %v7376_v16  ;;  %v4906_v13 = vpop.f32.mrf.mxu1  ;;  %v7515_v16 = vld [vmem:[%s12907_s10 + $0x3d0] sm:$0xf]  ;;  %v8454_v42 = vld [vmem:[%s12907_s10 + $0x3e8] sm:$0xf0]  ;;  %v7068_v44 = vor.u32 %v8342_v26, %v7067_v33 }
 0x3d2   :  { %5186 = vmatpush.bf16.msra.mxu0 %v7824_v27  ;;  %v4868_v30 = vadd.f32 %v4867_v23, %v4855_v0  ;;  %v4932_v43 = vpop.f32.mrf.mxu0  ;;  %v7712_v27 = vor.u32 %v8503_v40, %v7711_v31 }
 0x3d3   :  { %5146 = vmatpush.bf16.msra.mxu3 %v7180_v17  ;;  %v7516_v17 = vor.u32 %v8454_v42, %v7515_v16 }
 0x3d4   :  { %5172 = vmatpush.bf16.msra.mxu2 %v7628_v49  ;;  %v12853_v45 = vadd.f32 %v12747_v6, %v4868_v30  ;;  %v8447_v6 = vld [vmem:[%s12907_s10 + $0x3b0] sm:$0xf0] }
 0x3d5   :  { %5161 = vmatpush.bf16.msra.mxu1 %v7348_v34  ;;  %v4843_v49 = vpop.f32.mrf.mxu3  ;;  %v7040_v34 = vor.u32 %v8335_v47, %v7039_v57  ;;  %v7488_v8 = vor.u32 %v8447_v6, %v7487_v29 }
 0x3d6   :  { %5187 = vmatpush.bf16.msra.mxu0 %v7796_v55  ;;  %v4869_v48 = vpop.f32.mrf.mxu2  ;;  %v5196_v11 = vmul.f32 0.5, %v12853_v45 }
 0x3d7   :  { %5147 = vmatpush.bf16.msra.mxu3 %v7152_v37 }
 0x3d8   :  { %5173 = vmatpush.bf16.msra.mxu2 %v7600_v35 }
 0x3d9   :  { %5162 = vmatpush.bf16.msra.mxu1 %v7320_v41  ;;  %v4908_v60 = vpop.f32.mrf.mxu1 }
 0x3da   :  { %5188 = vmatpush.bf16.msra.mxu0 %v7768_v7  ;;  %v4934_v55 = vpop.f32.mrf.mxu0 }
 0x3db   :  { %5148 = vmatpush.bf16.msra.mxu3 %v7124_v63 }
 0x3dc   :  { %5174 = vmatpush.bf16.msra.mxu2 %v7572_v18 }
 0x3dd   :  { %5163 = vmatpush.bf16.msra.mxu1 %v7292_v21  ;;  %v4893_v24 = vpop.f32.mrf.mxu3 }
 0x3de   :  { %5189 = vmatpush.bf16.msra.mxu0 %v7740_v5  ;;  %v4919_v50 = vpop.f32.mrf.mxu2 }
 0x3df   :  { %5149 = vmatpush.bf16.msra.mxu3 %v7096_v28 }
 0x3e0   :  { %5175 = vmatpush.bf16.msra.mxu2 %v7544_v10 }
 0x3e1   :  { %5164 = vmatpush.bf16.msra.mxu1 %v7264_v38  ;;  %v4958_v37 = vpop.f32.mrf.mxu1 }
 0x3e2   :  { %5190 = vmatpush.bf16.msra.mxu0 %v7712_v27  ;;  %v4984_v51 = vpop.f32.mrf.mxu0 }
 0x3e3   :  { %5150 = vmatpush.bf16.msra.mxu3 %v7068_v44 }
 0x3e4   :  { %5176 = vmatpush.bf16.msra.mxu2 %v7516_v17  ;;  %5165 = vmatmul.bf16.vlgmr.msra.gmra.mxu1 %v11873_v32 }
 0x3e5   :  { %5191 = vmatmul.bf16.vlgmr.msra.gmra.mxu0 %v11881_v36  ;;  %v4895_v54 = vpop.f32.mrf.mxu3  ;;  %v3667_v36 = vperm.slane %v12788_v56, 1 }
 0x3e6   :  { %v4921_v35 = vpop.f32.mrf.mxu2 }
 0x3e7   :  { %5151 = vmatpush.bf16.msra.mxu3 %v7040_v34  ;;  %v4894_v3 = vadd.f32 %v4893_v24, %v3667_v36 }
 0x3e8   :  { %5177 = vmatpush.bf16.msra.mxu2 %v7488_v8  ;;  %v3670_v8 = vperm.slane %v12788_v56, 4 }
 0x3e9   :  { %v4960_v58 = vpop.f32.mrf.mxu1 }
 0x3ea   :  { %5152 = vmatmul.bf16.vlgmr.msra.gmra.mxu3 %v11915_v39  ;;  %v4986_v62 = vpop.f32.mrf.mxu0  ;;  %v4907_v39 = vadd.f32 %v4906_v13, %v4894_v3 }
 0x3eb   :  { %5178 = vmatmul.bf16.vlgmr.msra.gmra.mxu2 %v11923_v53 }
 0x3ec   :  { %v4920_v12 = vadd.f32 %v4919_v50, %v4907_v39  ;;  %v3671_v39 = vperm.slane %v12788_v56, 5 }
 0x3ed   :  { %v4945_v32 = vpop.f32.mrf.mxu3 }
 0x3ee   :  { %v4971_v1 = vpop.f32.mrf.mxu2  ;;  %v4946_v53 = vadd.f32 %v4945_v32, %v3668_v4  ;;  %v4933_v63 = vadd.f32 %v4932_v43, %v4920_v12 }
 0x3f0   :  { %v4959_v52 = vadd.f32 %v4958_v37, %v4946_v53  ;;  %v5197_v18 = vmul.f32 0.5, %v4933_v63 }
 0x3f2   :  { %v4972_v14 = vadd.f32 %v4971_v1, %v4959_v52  ;;  %8560 = vtanh.f32 %v5197_v18 }
 0x3f3   :  { %8562 = vtanh.f32 %v5196_v11  ;;  %v3672_v11 = vperm.slane %v12788_v56, 6 }
 0x3f4   :  { %v4985_v21 = vadd.f32 %v4984_v51, %v4972_v14 }
 0x3f5   :  { %v4947_v41 = vpop.f32.mrf.mxu3 }
 0x3f6   :  { %v4973_v59 = vpop.f32.mrf.mxu2  ;;  %v5198_v23 = vmul.f32 0.5, %v4985_v21 }
 0x3f8   :  { %v8561_v25 = vpop.eup %8560  ;;  %8564 = vtanh.f32 %v5198_v23 }
 0x3f9   :  { %v8563_v40 = vpop.eup %8562  ;;  %v5211_v33 = vadd.f32 1.0, %v8561_v25 }
 0x3fa   :  { %v5210_v26 = vadd.f32 1.0, %v8563_v40 }
 0x3fb   :  { %v5218_v38 = vmul.f32 0.5, %v5211_v33 }
 0x3fc   :  { %v5217_v16 = vmul.f32 0.5, %v5210_v26 }
 0x3fe   :  { %v8565_v13 = vpop.eup %8564  ;;  %v5224_v27 = vpack.c.bf16 %v5218_v38, %v5217_v16 }
 0x3ff   :  { %v5212_v42 = vadd.f32 1.0, %v8565_v13 }
 0x400   :  { %v5232_v47 = vrot.slane %v5224_v27, 2 }
 0x401   :  { %v5010_v7 = vpop.f32.mrf.mxu1  ;;  %v5219_v17 = vmul.f32 0.5, %v5212_v42 }
 0x402   :  { %v5036_v9 = vpop.f32.mrf.mxu0  ;;  %v5241_v60 = vsel %vm5238_vm2, %v5224_v27, %v5232_v47 }
 0x409   :  { %v5012_v15 = vpop.f32.mrf.mxu1 }
 0x40a   :  { %v5038_v19 = vpop.f32.mrf.mxu0 }
 0x40d   :  { %v4997_v2 = vpop.f32.mrf.mxu3 }
 0x40e   :  { %v4998_v46 = vadd.f32 %v4997_v2, %v3669_v20  ;;  %v5023_v22 = vpop.f32.mrf.mxu2 }
 0x410   :  { %v5011_v5 = vadd.f32 %v5010_v7, %v4998_v46 }
 0x412   :  { %v5024_v61 = vadd.f32 %v5023_v22, %v5011_v5 }
 0x414   :  { %v5037_v28 = vadd.f32 %v5036_v9, %v5024_v61 }
 0x415   :  { %v4999_v31 = vpop.f32.mrf.mxu3 }
 0x416   :  { %v5199_v0 = vmul.f32 0.5, %v5037_v28  ;;  %v5025_v10 = vpop.f32.mrf.mxu2 }
 0x418   :  { %8566 = vtanh.f32 %v5199_v0 }
 0x41e   :  { %v8567_v30 = vpop.eup %8566 }
 0x41f   :  { %v5213_v44 = vadd.f32 1.0, %v8567_v30 }
 0x421   :  { %v5062_v43 = vpop.f32.mrf.mxu1  ;;  %v5220_v57 = vmul.f32 0.5, %v5213_v44 }
 0x422   :  { %v5088_v45 = vpop.f32.mrf.mxu0 }
 0x423   :  { %v5225_v49 = vpack.c.bf16 %v5220_v57, %v5219_v17 }
 0x425   :  { %v5233_v29 = vrot.slane %v5225_v49, 4  ;;  %v5234_v6 = vrot.slane %v5225_v49, 6 }
 0x427   :  { %v5245_v55 = vsel %vm5242_vm3, %v5233_v29, %v5234_v6 }
 0x428   :  { %v5247_v24 = vsel %vm5246_vm4, %v5241_v60, %v5245_v55 }
 0x429   :  { %v5064_v48 = vpop.f32.mrf.mxu1  ;;  %5257 = vst [vmem:[#allocation3] sm:$0xff] %v5247_v24 }
 0x42a   :  { %v5090_v34 = vpop.f32.mrf.mxu0 }
 0x42d   :  { %v5049_v50 = vpop.f32.mrf.mxu3 }
 0x42e   :  { %v5050_v37 = vadd.f32 %v5049_v50, %v3670_v8  ;;  %v5075_v51 = vpop.f32.mrf.mxu2 }
 0x430   :  { %v5063_v54 = vadd.f32 %v5062_v43, %v5050_v37 }
 0x432   :  { %v5076_v35 = vadd.f32 %v5075_v51, %v5063_v54 }
 0x434   :  { %v5089_v58 = vadd.f32 %v5088_v45, %v5076_v35 }
 0x435   :  { %v5051_v62 = vpop.f32.mrf.mxu3 }
 0x436   :  { %v5077_v32 = vpop.f32.mrf.mxu2  ;;  %v5200_v21 = vmul.f32 0.5, %v5089_v58 }
 0x441   :  { %v5114_v1 = vpop.f32.mrf.mxu1 }
 0x442   :  { %v5140_v36 = vpop.f32.mrf.mxu0 }
 0x449   :  { %v5116_v41 = vpop.f32.mrf.mxu1 }
 0x44a   :  { %v5142_v59 = vpop.f32.mrf.mxu0 }
 0x44d   :  { %v5101_v3 = vpop.f32.mrf.mxu3 }
 0x44e   :  { %v5127_v4 = vpop.f32.mrf.mxu2  ;;  %v5102_v12 = vadd.f32 %v5101_v3, %v3671_v39 }
 0x450   :  { %v5115_v9 = vadd.f32 %v5114_v1, %v5102_v12 }
 0x452   :  { %v5128_v63 = vadd.f32 %v5127_v4, %v5115_v9 }
 0x454   :  { %v5141_v15 = vadd.f32 %v5140_v36, %v5128_v63 }
 0x455   :  { %v5103_v53 = vpop.f32.mrf.mxu3 }
 0x456   :  { %v5129_v7 = vpop.f32.mrf.mxu2  ;;  %v5201_v19 = vmul.f32 0.5, %v5141_v15 }
 0x458   :  { %8568 = vtanh.f32 %v5201_v19 }
 0x459   :  { %8570 = vtanh.f32 %v5200_v21 }
 0x45e   :  { %v8569_v61 = vpop.eup %8568 }
 0x45f   :  { %v8571_v31 = vpop.eup %8570  ;;  %v5215_v10 = vadd.f32 1.0, %v8569_v61 }
 0x460   :  { %v5214_v33 = vadd.f32 1.0, %v8571_v31 }
 0x461   :  { %v5166_v52 = vpop.f32.mrf.mxu1  ;;  %v5222_v26 = vmul.f32 0.5, %v5215_v10 }
 0x462   :  { %v5192_v14 = vpop.f32.mrf.mxu0  ;;  %v5221_v13 = vmul.f32 0.5, %v5214_v33 }
 0x464   :  { %v5226_v38 = vpack.c.bf16 %v5222_v26, %v5221_v13 }
 0x466   :  { %v5235_v30 = vrot.slane %v5226_v38, 2 }
 0x468   :  { %v5250_v45 = vsel %vm5238_vm2, %v5226_v38, %v5235_v30 }
 0x469   :  { %v5168_v18 = vpop.f32.mrf.mxu1 }
 0x46a   :  { %v5194_v20 = vpop.f32.mrf.mxu0 }
 0x46d   :  { %v5153_v2 = vpop.f32.mrf.mxu3 }
 0x46e   :  { %v5154_v46 = vadd.f32 %v5153_v2, %v3672_v11  ;;  %v5179_v22 = vpop.f32.mrf.mxu2 }
 0x470   :  { %v5167_v23 = vadd.f32 %v5166_v52, %v5154_v46 }
 0x472   :  { %v5180_v5 = vadd.f32 %v5179_v22, %v5167_v23 }
 0x474   :  { %v5193_v25 = vadd.f32 %v5192_v14, %v5180_v5 }
 0x475   :  { %v5155_v28 = vpop.f32.mrf.mxu3 }
 0x476   :  { %v5202_v40 = vmul.f32 0.5, %v5193_v25  ;;  %v5181_v0 = vpop.f32.mrf.mxu2 }
 0x478   :  { %8572 = vtanh.f32 %v5202_v40 }
 0x47e   :  { %v8573_v56 = vpop.eup %8572 }
 0x47f   :  { %v5216_v16 = vadd.f32 1.0, %v8573_v56 }
 0x481   :  { %v5223_v42 = vmul.f32 0.5, %v5216_v16 }
 0x483   :  { %v5227_v43 = vpack.c.bf16 %v5223_v42, %v5223_v42 }
 0x485   :  { %v5236_v27 = vrot.slane %v5227_v43, 4  ;;  %v5237_v44 = vrot.slane %v5227_v43, 6 }
 0x487   :  { %v5253_v17 = vsel %vm5242_vm3, %v5236_v27, %v5237_v44 }
 0x488   :  { %v5254_v57 = vsel %vm5246_vm4, %v5250_v45, %v5253_v17 }
 0x489   :  { %5262 = vst.msk [vmem:[#allocation3 + $0x8] sm:$0x3f] %vm5261_vm8, %v5254_v57 }
 0x48a   :  { %5276 = dma.vmem_to_hbm [thread:$0]  %s5272_s15, 224, %s5274_s26, [#allocation4]  }
 0x48b   :  { %8670 = dma.done.wait [#allocation4], 224  }
 0x48c   :  { %8671 = vsyncadd [#allocation4], 4294967072 }
 0x48d   :  { %8672 = dma.done.wait [#allocation6], 128  }
 0x48e   :  { %8673 = vsyncadd [#allocation6], 4294967168 }
 0x48f   :  { %8674 = dma.done.wait [#allocation9], 64  }
 0x490   :  { %8675 = vsyncadd [#allocation9], 4294967232 }
 0x491   :  { %5326 = vsyncpa [#allocation4], 1 }
 0x492   :  { %5327 = vsyncpa [#allocation6], 1 }
 0x493   :  { %5328 = vsyncpa [#allocation9], 1 }

</bundles_post_ra>
